<compile_context>
chip_gen: v5e
topology: v5e:2x2
jax: 0.10.0
libtpu: 0.0.40
codegen_flags: <defaults>
</compile_context>

<pallas_src>
import functools

import jax
import jax.numpy as jnp
from jax import lax
from jax.experimental import pallas as pl
from jax.experimental.pallas import tpu as pltpu


def _round_up(x, m):
    return (x + m - 1) // m * m


# ------------------------------ fused kernel -------------------------------- #

def _residual_block_kernel(*refs, Ho, Wo, Cin_p, Cout_p, stride, projection):
    """One batch image per grid step. x_ref is spatially pre-padded (+1 halo)
    and channel-padded to a multiple of 128 (lane-dense)."""
    if projection:
        (x_ref, w1_ref, b1_ref, w2_ref, b2_ref, ws_ref, bs_ref,
         o_ref, mid_ref, col_ref) = refs
    else:
        (x_ref, w1_ref, b1_ref, w2_ref, b2_ref,
         o_ref, mid_ref, col_ref) = refs
        ws_ref = bs_ref = None

    f32 = jnp.float32
    mdt = mid_ref.dtype            # bf16 staging dtype
    cdt = col_ref.dtype            # bf16 MXU operand dtype
    COFF = 16                      # mid interior column offset (bf16 sublane tile)

    def read_x(y0, x0):
        """(Ho, Wo, Cin_p) tap window of the padded input (strided iff stride>1)."""
        if stride == 1:
            return x_ref[y0:y0 + Ho, x0:x0 + Wo, :]
        return x_ref[pl.ds(y0, Ho, stride), pl.ds(x0, Wo, stride), :]

    # ---- conv1 (3x3, stride s): im2col taps written straight into col scratch
    t = 0
    for dy in range(3):
        for dx in range(3):
            col_ref[:, t * Cin_p:(t + 1) * Cin_p] = (
                read_x(dy, dx).reshape(Ho * Wo, Cin_p).astype(cdt))
            t += 1
    acc1 = jnp.dot(col_ref[:, :9 * Cin_p], w1_ref[...],
                   preferred_element_type=f32)
    h1 = jnp.maximum(acc1 + b1_ref[...], 0.0)        # BN scale folded into w1

    # ---- stage conv2 input in VMEM: zero only the halo ring, bf16 interior ---
    zrow = jnp.zeros((1, Wo + 2, Cout_p), mdt)
    zcol = jnp.zeros((Ho, 1, Cout_p), mdt)
    mid_ref[0:1, COFF - 1:COFF + 1 + Wo, :] = zrow
    mid_ref[Ho + 1:Ho + 2, COFF - 1:COFF + 1 + Wo, :] = zrow
    mid_ref[1:Ho + 1, COFF - 1:COFF, :] = zcol
    mid_ref[1:Ho + 1, COFF + Wo:COFF + Wo + 1, :] = zcol
    mid_ref[1:Ho + 1, COFF:COFF + Wo, :] = (
        h1.reshape(Ho, Wo, Cout_p).astype(mdt))

    # ---- conv2 (3x3, stride 1): taps from VMEM, already bf16 (no recast) -----
    t = 0
    for dy in range(3):
        for dx in range(3):
            c0 = COFF - 1 + dx
            col_ref[:, t * Cout_p:(t + 1) * Cout_p] = (
                mid_ref[dy:dy + Ho, c0:c0 + Wo, :].reshape(Ho * Wo, Cout_p))
            t += 1
    out = jnp.dot(col_ref[:, :9 * Cout_p], w2_ref[...],
                  preferred_element_type=f32)
    out = out + b2_ref[...]                          # BN scale folded into w2

    # ---- shortcut (read directly from the padded input block) ----------------
    if projection:    # 1x1 stride-s conv, BN scale folded into ws
        xs = read_x(1, 1).reshape(Ho * Wo, Cin_p).astype(cdt)
        sc = jnp.dot(xs, ws_ref[...], preferred_element_type=f32) + bs_ref[...]
    else:             # identity (stride == 1, Cin_p == Cout_p)
        sc = read_x(1, 1).reshape(Ho * Wo, Cin_p).astype(f32)

    res = jnp.maximum(out + sc, 0.0)
    o_ref[...] = res.reshape(Ho, Wo, Cout_p).astype(o_ref.dtype)


# --------------------------------- wrapper ----------------------------------- #

def _fold_bn_into_weight(w, gamma, beta, mean, var, eps, conv_bias):
    """BN(conv(x, w) + conv_bias) == conv(x, w*scale) + bias (inference BN)."""
    scale = gamma / jnp.sqrt(var + eps)
    bias = beta - mean * scale
    if conv_bias is not None:
        bias = bias + conv_bias * scale
    return (w * scale).astype(jnp.float32), bias.astype(jnp.float32)


def residual_block_forward(x_nchw, p, stride, eps=1e-5):
    """Pallas forward pass. Input/output NCHW (PyTorch convention)."""
    x = jnp.transpose(x_nchw, (0, 2, 3, 1)).astype(jnp.float32)   # NCHW -> NHWC
    N, H, W, Cin = x.shape
    Cout = p["w1"].shape[-1]
    assert H % stride == 0 and W % stride == 0
    Ho, Wo = H // stride, W // stride
    Cin_p, Cout_p = _round_up(Cin, 128), _round_up(Cout, 128)
    Cmax = max(Cin_p, Cout_p)
    projection = (stride != 1) or (Cin != Cout)

    # Single pad of x: 1-pixel spatial halo + lane padding of channels.
    # bf16 DMA for stride-1 blocks; f32 for stride>1 (strided tap loads).
    x_dtype = jnp.bfloat16 if stride == 1 else jnp.float32
    x_p = jnp.pad(x, ((0, 0), (1, 1), (1, 1), (0, Cin_p - Cin))).astype(x_dtype)

    # Weights: fold BN scale, channel-pad, flatten taps, bf16 for the MXU.
    w1, b1 = _fold_bn_into_weight(p["w1"], p["g1"], p["be1"], p["m1"], p["v1"],
                                  eps, p["b1"])
    w1 = jnp.pad(w1, ((0, 0), (0, 0), (0, Cin_p - Cin), (0, Cout_p - Cout)))
    w1 = w1.reshape(9 * Cin_p, Cout_p).astype(jnp.bfloat16)
    b1 = jnp.pad(b1, (0, Cout_p - Cout))[None, :]

    w2, b2 = _fold_bn_into_weight(p["w2"], p["g2"], p["be2"], p["m2"], p["v2"],
                                  eps, p["b2"])
    w2 = jnp.pad(w2, ((0, 0), (0, 0), (0, Cout_p - Cout), (0, Cout_p - Cout)))
    w2 = w2.reshape(9 * Cout_p, Cout_p).astype(jnp.bfloat16)
    b2 = jnp.pad(b2, (0, Cout_p - Cout))[None, :]

    inputs = [x_p, w1, b1, w2, b2]
    in_specs = [
        pl.BlockSpec((None, H + 2, W + 2, Cin_p), lambda n: (n, 0, 0, 0)),
        pl.BlockSpec((9 * Cin_p, Cout_p), lambda n: (0, 0)),
        pl.BlockSpec((1, Cout_p), lambda n: (0, 0)),
        pl.BlockSpec((9 * Cout_p, Cout_p), lambda n: (0, 0)),
        pl.BlockSpec((1, Cout_p), lambda n: (0, 0)),
    ]
    if projection:
        ws, bs = _fold_bn_into_weight(p["ws"], p["gs"], p["bes"], p["ms"],
                                      p["vs"], eps, None)
        ws = jnp.pad(ws, ((0, Cin_p - Cin), (0, Cout_p - Cout))).astype(jnp.bfloat16)
        bs = jnp.pad(bs, (0, Cout_p - Cout))[None, :]
        inputs += [ws, bs]
        in_specs += [
            pl.BlockSpec((Cin_p, Cout_p), lambda n: (0, 0)),
            pl.BlockSpec((1, Cout_p), lambda n: (0, 0)),
        ]

    kern = functools.partial(_residual_block_kernel, Ho=Ho, Wo=Wo,
                             Cin_p=Cin_p, Cout_p=Cout_p, stride=stride,
                             projection=projection)

    # VMEM budget: double-buffered blocks + persistent scratch + headroom.
    x_bpe = 2 if x_dtype == jnp.bfloat16 else 4
    blk_bytes = ((H + 2) * (W + 2) * Cin_p * x_bpe          # x block
                 + Ho * Wo * Cout_p * 4                     # out block
                 + 9 * Cin_p * Cout_p * 2                   # w1
                 + 9 * Cout_p * Cout_p * 2                  # w2
                 + 2 * Cout_p * 4)                          # biases
    if projection:
        blk_bytes += Cin_p * Cout_p * 2 + Cout_p * 4
    scratch_bytes = ((Ho + 2) * (Wo + 32) * Cout_p * 2      # mid (bf16)
                     + Ho * Wo * 9 * Cmax * 2)              # col scratch (bf16)
    vmem_limit = int(min(96 * 2 ** 20, 2 * blk_bytes + scratch_bytes + 16 * 2 ** 20))

    flops = 2 * N * Ho * Wo * (9 * Cin * Cout + 9 * Cout * Cout
                               + (Cin * Cout if projection else 0))
    bytes_accessed = int(N * (H + 2) * (W + 2) * Cin_p * x_bpe
                         + N * Ho * Wo * Cout_p * 4
                         + 9 * Cin_p * Cout_p * 2 + 9 * Cout_p * Cout_p * 2
                         + (Cin_p * Cout_p * 2 if projection else 0))

    out = pl.pallas_call(
        kern,
        out_shape=jax.ShapeDtypeStruct((N, Ho, Wo, Cout_p), jnp.float32),
        grid_spec=pltpu.PrefetchScalarGridSpec(
            num_scalar_prefetch=0,
            grid=(N,),
            in_specs=in_specs,
            out_specs=pl.BlockSpec((None, Ho, Wo, Cout_p), lambda n: (n, 0, 0, 0)),
            scratch_shapes=[
                pltpu.VMEM((Ho + 2, Wo + 32, Cout_p), jnp.bfloat16),  # conv2 staging
                pltpu.VMEM((Ho * Wo, 9 * Cmax), jnp.bfloat16),        # im2col scratch
            ],
        ),
        compiler_params=pltpu.CompilerParams(
            dimension_semantics=("parallel",),
            vmem_limit_bytes=vmem_limit),
        cost_estimate=pl.CostEstimate(flops=flops, transcendentals=0,
                                      bytes_accessed=bytes_accessed),
    )(*inputs)

    out = out[..., :Cout]                                  # drop lane padding
    return jnp.transpose(out, (0, 3, 1, 2))                # NHWC -> NCHW


# ----------------------- deterministic parameter init ----------------------- #

def init_params(key, cin, cout):
    ks = jax.random.split(key, 17)
    f32 = jnp.float32

    def bn_params(k0, k1, k2, k3, c):
        return dict(
            gamma=1.0 + 0.1 * jax.random.normal(k0, (c,), f32),
            beta=0.1 * jax.random.normal(k1, (c,), f32),
            mean=0.1 * jax.random.normal(k2, (c,), f32),
            var=jnp.abs(jax.random.normal(k3, (c,), f32)) + 0.5,
        )

    bn1 = bn_params(ks[2], ks[3], ks[4], ks[5], cout)
    bn2 = bn_params(ks[8], ks[9], ks[10], ks[11], cout)
    bns = bn_params(ks[13], ks[14], ks[15], ks[16], cout)
    return {
        "w1": 0.1 * jax.random.normal(ks[0], (3, 3, cin, cout), f32),   # HWIO
        "b1": 0.1 * jax.random.normal(ks[1], (cout,), f32),
        "g1": bn1["gamma"], "be1": bn1["beta"], "m1": bn1["mean"], "v1": bn1["var"],
        "w2": 0.1 * jax.random.normal(ks[6], (3, 3, cout, cout), f32),
        "b2": 0.1 * jax.random.normal(ks[7], (cout,), f32),
        "g2": bn2["gamma"], "be2": bn2["beta"], "m2": bn2["mean"], "v2": bn2["var"],
        "ws": 0.1 * jax.random.normal(ks[12], (cin, cout), f32),        # 1x1, no bias
        "gs": bns["gamma"], "bes": bns["beta"], "ms": bns["mean"], "vs": bns["var"],
    }


# ------------------------ pure-JAX reference (check) ------------------------ #

def reference_forward(x_nchw, p, stride, eps=1e-5):
    x = jnp.transpose(x_nchw, (0, 2, 3, 1)).astype(jnp.float32)
    cin, cout = x.shape[-1], p["w1"].shape[-1]

    def conv(v, w, s, pad):
        return lax.conv_general_dilated(v, w, (s, s), (pad, pad),
                                        dimension_numbers=("NHWC", "HWIO", "NHWC"))

    def bn(v, g, be, m, var):
        return (v - m) / jnp.sqrt(var + eps) * g + be

    out = jax.nn.relu(bn(conv(x, p["w1"], stride, (1, 1)) + p["b1"],
                         p["g1"], p["be1"], p["m1"], p["v1"]))
    out = bn(conv(out, p["w2"], 1, (1, 1)) + p["b2"],
             p["g2"], p["be2"], p["m2"], p["v2"])
    if stride != 1 or cin != cout:
        sc = conv(x, p["ws"][None, None], stride, (0, 0))
        sc = bn(sc, p["gs"], p["bes"], p["ms"], p["vs"])
    else:
        sc = x
    out = jax.nn.relu(out + sc)
    return jnp.transpose(out, (0, 3, 1, 2))


# ---------------------------------- main ------------------------------------ #

if __name__ == "__main__":
    key = jax.random.PRNGKey(0)
    kx1, kp1, kx2, kp2 = jax.random.split(key, 4)

    # config 1: stride-2 + channel change -> projection shortcut
    N, Cin, H, W, Cout, stride = 2, 4, 16, 16, 8, 2
    x1 = jax.random.normal(kx1, (N, Cin, H, W), jnp.float32)
    p1 = init_params(kp1, Cin, Cout)
    out1 = jax.block_until_ready(residual_block_forward(x1, p1, stride))
    ref1 = reference_forward(x1, p1, stride)
    assert out1.shape == ref1.shape, (out1.shape, ref1.shape)
    # bf16 MXU operands (+ BN folded into bf16 weights) -> bf16-level tolerance.
    assert jnp.allclose(out1, ref1, atol=5e-2, rtol=5e-2), \
        float(jnp.max(jnp.abs(out1 - ref1)))

    # config 2: stride-1, same channels -> identity shortcut (bf16 input DMA)
    x2 = jax.random.normal(kx2, (2, 8, H, W), jnp.float32)
    p2 = init_params(kp2, 8, 8)
    out2 = jax.block_until_ready(residual_block_forward(x2, p2, 1))
    ref2 = reference_forward(x2, p2, 1)
    assert out2.shape == ref2.shape, (out2.shape, ref2.shape)
    assert jnp.allclose(out2, ref2, atol=5e-2, rtol=5e-2), \
        float(jnp.max(jnp.abs(out2 - ref2)))

    print("KERNEL_OK")
</pallas_src>

<mosaic_0001>
module attributes {stable_mosaic.version = 11 : i64} {
  func.func @_residual_block_kernel(%arg0: i32, %arg1: memref<1x18x18x128xf32, #tpu.memory_space<vmem>>, %arg2: memref<1152x128xbf16, #tpu.memory_space<vmem>>, %arg3: memref<1x128xf32, #tpu.memory_space<vmem>>, %arg4: memref<1152x128xbf16, #tpu.memory_space<vmem>>, %arg5: memref<1x128xf32, #tpu.memory_space<vmem>>, %arg6: memref<128x128xbf16, #tpu.memory_space<vmem>>, %arg7: memref<1x128xf32, #tpu.memory_space<vmem>>, %arg8: memref<1x8x8x128xf32, #tpu.memory_space<vmem>>, %arg9: memref<10x40x128xbf16, #tpu.memory_space<vmem>>, %arg10: memref<64x1152xbf16, #tpu.memory_space<vmem>>) attributes {dimension_semantics = [#tpu.dimension_semantics<parallel>], iteration_bounds = array<i64: 2>, scalar_prefetch = 0 : i64, scratch_operands = 2 : i64, tpu.core_type = #tpu.core_type<tc>, window_params = [{transform_indices = @transform_0, window_bounds = array<i64: 1, 18, 18, 128>}, {pipeline_mode = #tpu.pipeline_mode<synchronous>, transform_indices = @transform_1, window_bounds = array<i64: 1152, 128>}, {pipeline_mode = #tpu.pipeline_mode<synchronous>, transform_indices = @transform_2, window_bounds = array<i64: 1, 128>}, {pipeline_mode = #tpu.pipeline_mode<synchronous>, transform_indices = @transform_3, window_bounds = array<i64: 1152, 128>}, {pipeline_mode = #tpu.pipeline_mode<synchronous>, transform_indices = @transform_4, window_bounds = array<i64: 1, 128>}, {pipeline_mode = #tpu.pipeline_mode<synchronous>, transform_indices = @transform_5, window_bounds = array<i64: 128, 128>}, {pipeline_mode = #tpu.pipeline_mode<synchronous>, transform_indices = @transform_6, window_bounds = array<i64: 1, 128>}, {transform_indices = @transform_7, window_bounds = array<i64: 1, 8, 8, 128>}]} {
    %c0 = arith.constant 0 : index
    %c0_0 = arith.constant 0 : index
    %c0_1 = arith.constant 0 : index
    %c0_2 = arith.constant 0 : index
    %0 = tpu.strided_load %arg1[%c0, %c0_0, %c0_1, %c0_2] {strides = array<i32: 1, 2, 2, 1>} : memref<1x18x18x128xf32, #tpu.memory_space<vmem>>, vector<1x8x8x128xf32>
    %1 = vector.shape_cast %0 : vector<1x8x8x128xf32> to vector<8x8x128xf32>
    %2 = vector.shape_cast %1 : vector<8x8x128xf32> to vector<64x128xf32>
    %3 = arith.truncf %2 : vector<64x128xf32> to vector<64x128xbf16>
    %c0_3 = arith.constant 0 : index
    %c0_4 = arith.constant 0 : index
    %4 = vector.load %arg10[%c0_3, %c0_4] : memref<64x1152xbf16, #tpu.memory_space<vmem>>, vector<64x128xbf16>
    tpu.vector_store %arg10[%c0_3, %c0_4], %3 {strides = array<i32>} : memref<64x1152xbf16, #tpu.memory_space<vmem>>, vector<64x128xbf16>,
    %c0_5 = arith.constant 0 : index
    %c0_6 = arith.constant 0 : index
    %c1 = arith.constant 1 : index
    %c0_7 = arith.constant 0 : index
    %5 = tpu.strided_load %arg1[%c0_5, %c0_6, %c1, %c0_7] {strides = array<i32: 1, 2, 2, 1>} : memref<1x18x18x128xf32, #tpu.memory_space<vmem>>, vector<1x8x8x128xf32>
    %6 = vector.shape_cast %5 : vector<1x8x8x128xf32> to vector<8x8x128xf32>
    %7 = vector.shape_cast %6 : vector<8x8x128xf32> to vector<64x128xf32>
    %8 = arith.truncf %7 : vector<64x128xf32> to vector<64x128xbf16>
    %c0_8 = arith.constant 0 : index
    %c128 = arith.constant 128 : index
    %9 = vector.load %arg10[%c0_8, %c128] : memref<64x1152xbf16, #tpu.memory_space<vmem>>, vector<64x128xbf16>
    tpu.vector_store %arg10[%c0_8, %c128], %8 {strides = array<i32>} : memref<64x1152xbf16, #tpu.memory_space<vmem>>, vector<64x128xbf16>,
    %c0_9 = arith.constant 0 : index
    %c0_10 = arith.constant 0 : index
    %c2 = arith.constant 2 : index
    %c0_11 = arith.constant 0 : index
    %10 = tpu.strided_load %arg1[%c0_9, %c0_10, %c2, %c0_11] {strides = array<i32: 1, 2, 2, 1>} : memref<1x18x18x128xf32, #tpu.memory_space<vmem>>, vector<1x8x8x128xf32>
    %11 = vector.shape_cast %10 : vector<1x8x8x128xf32> to vector<8x8x128xf32>
    %12 = vector.shape_cast %11 : vector<8x8x128xf32> to vector<64x128xf32>
    %13 = arith.truncf %12 : vector<64x128xf32> to vector<64x128xbf16>
    %c0_12 = arith.constant 0 : index
    %c256 = arith.constant 256 : index
    %14 = vector.load %arg10[%c0_12, %c256] : memref<64x1152xbf16, #tpu.memory_space<vmem>>, vector<64x128xbf16>
    tpu.vector_store %arg10[%c0_12, %c256], %13 {strides = array<i32>} : memref<64x1152xbf16, #tpu.memory_space<vmem>>, vector<64x128xbf16>,
    %c0_13 = arith.constant 0 : index
    %c1_14 = arith.constant 1 : index
    %c0_15 = arith.constant 0 : index
    %c0_16 = arith.constant 0 : index
    %15 = tpu.strided_load %arg1[%c0_13, %c1_14, %c0_15, %c0_16] {strides = array<i32: 1, 2, 2, 1>} : memref<1x18x18x128xf32, #tpu.memory_space<vmem>>, vector<1x8x8x128xf32>
    %16 = vector.shape_cast %15 : vector<1x8x8x128xf32> to vector<8x8x128xf32>
    %17 = vector.shape_cast %16 : vector<8x8x128xf32> to vector<64x128xf32>
    %18 = arith.truncf %17 : vector<64x128xf32> to vector<64x128xbf16>
    %c0_17 = arith.constant 0 : index
    %c384 = arith.constant 384 : index
    %19 = vector.load %arg10[%c0_17, %c384] : memref<64x1152xbf16, #tpu.memory_space<vmem>>, vector<64x128xbf16>
    tpu.vector_store %arg10[%c0_17, %c384], %18 {strides = array<i32>} : memref<64x1152xbf16, #tpu.memory_space<vmem>>, vector<64x128xbf16>,
    %c0_18 = arith.constant 0 : index
    %c1_19 = arith.constant 1 : index
    %c1_20 = arith.constant 1 : index
    %c0_21 = arith.constant 0 : index
    %20 = tpu.strided_load %arg1[%c0_18, %c1_19, %c1_20, %c0_21] {strides = array<i32: 1, 2, 2, 1>} : memref<1x18x18x128xf32, #tpu.memory_space<vmem>>, vector<1x8x8x128xf32>
    %21 = vector.shape_cast %20 : vector<1x8x8x128xf32> to vector<8x8x128xf32>
    %22 = vector.shape_cast %21 : vector<8x8x128xf32> to vector<64x128xf32>
    %23 = arith.truncf %22 : vector<64x128xf32> to vector<64x128xbf16>
    %c0_22 = arith.constant 0 : index
    %c512 = arith.constant 512 : index
    %24 = vector.load %arg10[%c0_22, %c512] : memref<64x1152xbf16, #tpu.memory_space<vmem>>, vector<64x128xbf16>
    tpu.vector_store %arg10[%c0_22, %c512], %23 {strides = array<i32>} : memref<64x1152xbf16, #tpu.memory_space<vmem>>, vector<64x128xbf16>,
    %c0_23 = arith.constant 0 : index
    %c1_24 = arith.constant 1 : index
    %c2_25 = arith.constant 2 : index
    %c0_26 = arith.constant 0 : index
    %25 = tpu.strided_load %arg1[%c0_23, %c1_24, %c2_25, %c0_26] {strides = array<i32: 1, 2, 2, 1>} : memref<1x18x18x128xf32, #tpu.memory_space<vmem>>, vector<1x8x8x128xf32>
    %26 = vector.shape_cast %25 : vector<1x8x8x128xf32> to vector<8x8x128xf32>
    %27 = vector.shape_cast %26 : vector<8x8x128xf32> to vector<64x128xf32>
    %28 = arith.truncf %27 : vector<64x128xf32> to vector<64x128xbf16>
    %c0_27 = arith.constant 0 : index
    %c640 = arith.constant 640 : index
    %29 = vector.load %arg10[%c0_27, %c640] : memref<64x1152xbf16, #tpu.memory_space<vmem>>, vector<64x128xbf16>
    tpu.vector_store %arg10[%c0_27, %c640], %28 {strides = array<i32>} : memref<64x1152xbf16, #tpu.memory_space<vmem>>, vector<64x128xbf16>,
    %c0_28 = arith.constant 0 : index
    %c2_29 = arith.constant 2 : index
    %c0_30 = arith.constant 0 : index
    %c0_31 = arith.constant 0 : index
    %30 = tpu.strided_load %arg1[%c0_28, %c2_29, %c0_30, %c0_31] {strides = array<i32: 1, 2, 2, 1>} : memref<1x18x18x128xf32, #tpu.memory_space<vmem>>, vector<1x8x8x128xf32>
    %31 = vector.shape_cast %30 : vector<1x8x8x128xf32> to vector<8x8x128xf32>
    %32 = vector.shape_cast %31 : vector<8x8x128xf32> to vector<64x128xf32>
    %33 = arith.truncf %32 : vector<64x128xf32> to vector<64x128xbf16>
    %c0_32 = arith.constant 0 : index
    %c768 = arith.constant 768 : index
    %34 = vector.load %arg10[%c0_32, %c768] : memref<64x1152xbf16, #tpu.memory_space<vmem>>, vector<64x128xbf16>
    tpu.vector_store %arg10[%c0_32, %c768], %33 {strides = array<i32>} : memref<64x1152xbf16, #tpu.memory_space<vmem>>, vector<64x128xbf16>,
    %c0_33 = arith.constant 0 : index
    %c2_34 = arith.constant 2 : index
    %c1_35 = arith.constant 1 : index
    %c0_36 = arith.constant 0 : index
    %35 = tpu.strided_load %arg1[%c0_33, %c2_34, %c1_35, %c0_36] {strides = array<i32: 1, 2, 2, 1>} : memref<1x18x18x128xf32, #tpu.memory_space<vmem>>, vector<1x8x8x128xf32>
    %36 = vector.shape_cast %35 : vector<1x8x8x128xf32> to vector<8x8x128xf32>
    %37 = vector.shape_cast %36 : vector<8x8x128xf32> to vector<64x128xf32>
    %38 = arith.truncf %37 : vector<64x128xf32> to vector<64x128xbf16>
    %c0_37 = arith.constant 0 : index
    %c896 = arith.constant 896 : index
    %39 = vector.load %arg10[%c0_37, %c896] : memref<64x1152xbf16, #tpu.memory_space<vmem>>, vector<64x128xbf16>
    tpu.vector_store %arg10[%c0_37, %c896], %38 {strides = array<i32>} : memref<64x1152xbf16, #tpu.memory_space<vmem>>, vector<64x128xbf16>,
    %c0_38 = arith.constant 0 : index
    %c2_39 = arith.constant 2 : index
    %c2_40 = arith.constant 2 : index
    %c0_41 = arith.constant 0 : index
    %40 = tpu.strided_load %arg1[%c0_38, %c2_39, %c2_40, %c0_41] {strides = array<i32: 1, 2, 2, 1>} : memref<1x18x18x128xf32, #tpu.memory_space<vmem>>, vector<1x8x8x128xf32>
    %41 = vector.shape_cast %40 : vector<1x8x8x128xf32> to vector<8x8x128xf32>
    %42 = vector.shape_cast %41 : vector<8x8x128xf32> to vector<64x128xf32>
    %43 = arith.truncf %42 : vector<64x128xf32> to vector<64x128xbf16>
    %c0_42 = arith.constant 0 : index
    %c1024 = arith.constant 1024 : index
    %44 = vector.load %arg10[%c0_42, %c1024] : memref<64x1152xbf16, #tpu.memory_space<vmem>>, vector<64x128xbf16>
    tpu.vector_store %arg10[%c0_42, %c1024], %43 {strides = array<i32>} : memref<64x1152xbf16, #tpu.memory_space<vmem>>, vector<64x128xbf16>,
    %c0_43 = arith.constant 0 : index
    %c0_44 = arith.constant 0 : index
    %45 = vector.load %arg10[%c0_43, %c0_44] : memref<64x1152xbf16, #tpu.memory_space<vmem>>, vector<64x1152xbf16>
    %c0_45 = arith.constant 0 : index
    %c0_46 = arith.constant 0 : index
    %46 = vector.load %arg2[%c0_45, %c0_46] : memref<1152x128xbf16, #tpu.memory_space<vmem>>, vector<1152x128xbf16>
    %cst = arith.constant dense<0.000000e+00> : vector<64x128xf32>
    %47 = tpu.matmul %45, %46, %cst {dimension_numbers = #tpu.dot_dimension_numbers<[1], [0], [0], [1], [0, 0, 1, 1], [], []>} : vector<64x1152xbf16>, vector<1152x128xbf16>, vector<64x128xf32> -> vector<64x128xf32>
    %c0_47 = arith.constant 0 : index
    %c0_48 = arith.constant 0 : index
    %48 = vector.load %arg3[%c0_47, %c0_48] : memref<1x128xf32, #tpu.memory_space<vmem>>, vector<1x128xf32>
    %49 = vector.broadcast %48 : vector<1x128xf32> to vector<64x128xf32>
    %50 = arith.addf %47, %49 : vector<64x128xf32>
    %cst_49 = arith.constant 0.000000e+00 : f32
    %51 = vector.broadcast %cst_49 : f32 to vector<64x128xf32>
    %52 = arith.maximumf %50, %51 : vector<64x128xf32>
    %cst_50 = arith.constant 0.000000e+00 : bf16
    %53 = vector.broadcast %cst_50 : bf16 to vector<1x10x128xbf16>
    %cst_51 = arith.constant 0.000000e+00 : bf16
    %54 = vector.broadcast %cst_51 : bf16 to vector<8x1x128xbf16>
    %c0_52 = arith.constant 0 : index
    %c15 = arith.constant 15 : index
    %c0_53 = arith.constant 0 : index
    %55 = vector.load %arg9[%c0_52, %c15, %c0_53] : memref<10x40x128xbf16, #tpu.memory_space<vmem>>, vector<1x10x128xbf16>
    tpu.vector_store %arg9[%c0_52, %c15, %c0_53], %53 {strides = array<i32>} : memref<10x40x128xbf16, #tpu.memory_space<vmem>>, vector<1x10x128xbf16>,
    %c9 = arith.constant 9 : index
    %c15_54 = arith.constant 15 : index
    %c0_55 = arith.constant 0 : index
    %56 = vector.load %arg9[%c9, %c15_54, %c0_55] : memref<10x40x128xbf16, #tpu.memory_space<vmem>>, vector<1x10x128xbf16>
    tpu.vector_store %arg9[%c9, %c15_54, %c0_55], %53 {strides = array<i32>} : memref<10x40x128xbf16, #tpu.memory_space<vmem>>, vector<1x10x128xbf16>,
    %c1_56 = arith.constant 1 : index
    %c15_57 = arith.constant 15 : index
    %c0_58 = arith.constant 0 : index
    %57 = vector.load %arg9[%c1_56, %c15_57, %c0_58] : memref<10x40x128xbf16, #tpu.memory_space<vmem>>, vector<8x1x128xbf16>
    tpu.vector_store %arg9[%c1_56, %c15_57, %c0_58], %54 {strides = array<i32>} : memref<10x40x128xbf16, #tpu.memory_space<vmem>>, vector<8x1x128xbf16>,
    %c1_59 = arith.constant 1 : index
    %c24 = arith.constant 24 : index
    %c0_60 = arith.constant 0 : index
    %58 = vector.load %arg9[%c1_59, %c24, %c0_60] : memref<10x40x128xbf16, #tpu.memory_space<vmem>>, vector<8x1x128xbf16>
    tpu.vector_store %arg9[%c1_59, %c24, %c0_60], %54 {strides = array<i32>} : memref<10x40x128xbf16, #tpu.memory_space<vmem>>, vector<8x1x128xbf16>,
    %59 = vector.shape_cast %52 : vector<64x128xf32> to vector<8x8x128xf32>
    %60 = arith.truncf %59 : vector<8x8x128xf32> to vector<8x8x128xbf16>
    %c1_61 = arith.constant 1 : index
    %c16 = arith.constant 16 : index
    %c0_62 = arith.constant 0 : index
    %61 = vector.load %arg9[%c1_61, %c16, %c0_62] : memref<10x40x128xbf16, #tpu.memory_space<vmem>>, vector<8x8x128xbf16>
    tpu.vector_store %arg9[%c1_61, %c16, %c0_62], %60 {strides = array<i32>} : memref<10x40x128xbf16, #tpu.memory_space<vmem>>, vector<8x8x128xbf16>,
    %c0_63 = arith.constant 0 : index
    %c15_64 = arith.constant 15 : index
    %c0_65 = arith.constant 0 : index
    %62 = vector.load %arg9[%c0_63, %c15_64, %c0_65] : memref<10x40x128xbf16, #tpu.memory_space<vmem>>, vector<8x8x128xbf16>
    %63 = vector.shape_cast %62 : vector<8x8x128xbf16> to vector<64x128xbf16>
    %c0_66 = arith.constant 0 : index
    %c0_67 = arith.constant 0 : index
    %64 = vector.load %arg10[%c0_66, %c0_67] : memref<64x1152xbf16, #tpu.memory_space<vmem>>, vector<64x128xbf16>
    tpu.vector_store %arg10[%c0_66, %c0_67], %63 {strides = array<i32>} : memref<64x1152xbf16, #tpu.memory_space<vmem>>, vector<64x128xbf16>,
    %c0_68 = arith.constant 0 : index
    %c16_69 = arith.constant 16 : index
    %c0_70 = arith.constant 0 : index
    %65 = vector.load %arg9[%c0_68, %c16_69, %c0_70] : memref<10x40x128xbf16, #tpu.memory_space<vmem>>, vector<8x8x128xbf16>
    %66 = vector.shape_cast %65 : vector<8x8x128xbf16> to vector<64x128xbf16>
    %c0_71 = arith.constant 0 : index
    %c128_72 = arith.constant 128 : index
    %67 = vector.load %arg10[%c0_71, %c128_72] : memref<64x1152xbf16, #tpu.memory_space<vmem>>, vector<64x128xbf16>
    tpu.vector_store %arg10[%c0_71, %c128_72], %66 {strides = array<i32>} : memref<64x1152xbf16, #tpu.memory_space<vmem>>, vector<64x128xbf16>,
    %c0_73 = arith.constant 0 : index
    %c17 = arith.constant 17 : index
    %c0_74 = arith.constant 0 : index
    %68 = vector.load %arg9[%c0_73, %c17, %c0_74] : memref<10x40x128xbf16, #tpu.memory_space<vmem>>, vector<8x8x128xbf16>
    %69 = vector.shape_cast %68 : vector<8x8x128xbf16> to vector<64x128xbf16>
    %c0_75 = arith.constant 0 : index
    %c256_76 = arith.constant 256 : index
    %70 = vector.load %arg10[%c0_75, %c256_76] : memref<64x1152xbf16, #tpu.memory_space<vmem>>, vector<64x128xbf16>
    tpu.vector_store %arg10[%c0_75, %c256_76], %69 {strides = array<i32>} : memref<64x1152xbf16, #tpu.memory_space<vmem>>, vector<64x128xbf16>,
    %c1_77 = arith.constant 1 : index
    %c15_78 = arith.constant 15 : index
    %c0_79 = arith.constant 0 : index
    %71 = vector.load %arg9[%c1_77, %c15_78, %c0_79] : memref<10x40x128xbf16, #tpu.memory_space<vmem>>, vector<8x8x128xbf16>
    %72 = vector.shape_cast %71 : vector<8x8x128xbf16> to vector<64x128xbf16>
    %c0_80 = arith.constant 0 : index
    %c384_81 = arith.constant 384 : index
    %73 = vector.load %arg10[%c0_80, %c384_81] : memref<64x1152xbf16, #tpu.memory_space<vmem>>, vector<64x128xbf16>
    tpu.vector_store %arg10[%c0_80, %c384_81], %72 {strides = array<i32>} : memref<64x1152xbf16, #tpu.memory_space<vmem>>, vector<64x128xbf16>,
    %c1_82 = arith.constant 1 : index
    %c16_83 = arith.constant 16 : index
    %c0_84 = arith.constant 0 : index
    %74 = vector.load %arg9[%c1_82, %c16_83, %c0_84] : memref<10x40x128xbf16, #tpu.memory_space<vmem>>, vector<8x8x128xbf16>
    %75 = vector.shape_cast %74 : vector<8x8x128xbf16> to vector<64x128xbf16>
    %c0_85 = arith.constant 0 : index
    %c512_86 = arith.constant 512 : index
    %76 = vector.load %arg10[%c0_85, %c512_86] : memref<64x1152xbf16, #tpu.memory_space<vmem>>, vector<64x128xbf16>
    tpu.vector_store %arg10[%c0_85, %c512_86], %75 {strides = array<i32>} : memref<64x1152xbf16, #tpu.memory_space<vmem>>, vector<64x128xbf16>,
    %c1_87 = arith.constant 1 : index
    %c17_88 = arith.constant 17 : index
    %c0_89 = arith.constant 0 : index
    %77 = vector.load %arg9[%c1_87, %c17_88, %c0_89] : memref<10x40x128xbf16, #tpu.memory_space<vmem>>, vector<8x8x128xbf16>
    %78 = vector.shape_cast %77 : vector<8x8x128xbf16> to vector<64x128xbf16>
    %c0_90 = arith.constant 0 : index
    %c640_91 = arith.constant 640 : index
    %79 = vector.load %arg10[%c0_90, %c640_91] : memref<64x1152xbf16, #tpu.memory_space<vmem>>, vector<64x128xbf16>
    tpu.vector_store %arg10[%c0_90, %c640_91], %78 {strides = array<i32>} : memref<64x1152xbf16, #tpu.memory_space<vmem>>, vector<64x128xbf16>,
    %c2_92 = arith.constant 2 : index
    %c15_93 = arith.constant 15 : index
    %c0_94 = arith.constant 0 : index
    %80 = vector.load %arg9[%c2_92, %c15_93, %c0_94] : memref<10x40x128xbf16, #tpu.memory_space<vmem>>, vector<8x8x128xbf16>
    %81 = vector.shape_cast %80 : vector<8x8x128xbf16> to vector<64x128xbf16>
    %c0_95 = arith.constant 0 : index
    %c768_96 = arith.constant 768 : index
    %82 = vector.load %arg10[%c0_95, %c768_96] : memref<64x1152xbf16, #tpu.memory_space<vmem>>, vector<64x128xbf16>
    tpu.vector_store %arg10[%c0_95, %c768_96], %81 {strides = array<i32>} : memref<64x1152xbf16, #tpu.memory_space<vmem>>, vector<64x128xbf16>,
    %c2_97 = arith.constant 2 : index
    %c16_98 = arith.constant 16 : index
    %c0_99 = arith.constant 0 : index
    %83 = vector.load %arg9[%c2_97, %c16_98, %c0_99] : memref<10x40x128xbf16, #tpu.memory_space<vmem>>, vector<8x8x128xbf16>
    %84 = vector.shape_cast %83 : vector<8x8x128xbf16> to vector<64x128xbf16>
    %c0_100 = arith.constant 0 : index
    %c896_101 = arith.constant 896 : index
    %85 = vector.load %arg10[%c0_100, %c896_101] : memref<64x1152xbf16, #tpu.memory_space<vmem>>, vector<64x128xbf16>
    tpu.vector_store %arg10[%c0_100, %c896_101], %84 {strides = array<i32>} : memref<64x1152xbf16, #tpu.memory_space<vmem>>, vector<64x128xbf16>,
    %c2_102 = arith.constant 2 : index
    %c17_103 = arith.constant 17 : index
    %c0_104 = arith.constant 0 : index
    %86 = vector.load %arg9[%c2_102, %c17_103, %c0_104] : memref<10x40x128xbf16, #tpu.memory_space<vmem>>, vector<8x8x128xbf16>
    %87 = vector.shape_cast %86 : vector<8x8x128xbf16> to vector<64x128xbf16>
    %c0_105 = arith.constant 0 : index
    %c1024_106 = arith.constant 1024 : index
    %88 = vector.load %arg10[%c0_105, %c1024_106] : memref<64x1152xbf16, #tpu.memory_space<vmem>>, vector<64x128xbf16>
    tpu.vector_store %arg10[%c0_105, %c1024_106], %87 {strides = array<i32>} : memref<64x1152xbf16, #tpu.memory_space<vmem>>, vector<64x128xbf16>,
    %c0_107 = arith.constant 0 : index
    %c0_108 = arith.constant 0 : index
    %89 = vector.load %arg10[%c0_107, %c0_108] : memref<64x1152xbf16, #tpu.memory_space<vmem>>, vector<64x1152xbf16>
    %c0_109 = arith.constant 0 : index
    %c0_110 = arith.constant 0 : index
    %90 = vector.load %arg4[%c0_109, %c0_110] : memref<1152x128xbf16, #tpu.memory_space<vmem>>, vector<1152x128xbf16>
    %cst_111 = arith.constant dense<0.000000e+00> : vector<64x128xf32>
    %91 = tpu.matmul %89, %90, %cst_111 {dimension_numbers = #tpu.dot_dimension_numbers<[1], [0], [0], [1], [0, 0, 1, 1], [], []>} : vector<64x1152xbf16>, vector<1152x128xbf16>, vector<64x128xf32> -> vector<64x128xf32>
    %c0_112 = arith.constant 0 : index
    %c0_113 = arith.constant 0 : index
    %92 = vector.load %arg5[%c0_112, %c0_113] : memref<1x128xf32, #tpu.memory_space<vmem>>, vector<1x128xf32>
    %93 = vector.broadcast %92 : vector<1x128xf32> to vector<64x128xf32>
    %94 = arith.addf %91, %93 : vector<64x128xf32>
    %c0_114 = arith.constant 0 : index
    %c1_115 = arith.constant 1 : index
    %c1_116 = arith.constant 1 : index
    %c0_117 = arith.constant 0 : index
    %95 = tpu.strided_load %arg1[%c0_114, %c1_115, %c1_116, %c0_117] {strides = array<i32: 1, 2, 2, 1>} : memref<1x18x18x128xf32, #tpu.memory_space<vmem>>, vector<1x8x8x128xf32>
    %96 = vector.shape_cast %95 : vector<1x8x8x128xf32> to vector<8x8x128xf32>
    %97 = vector.shape_cast %96 : vector<8x8x128xf32> to vector<64x128xf32>
    %98 = arith.truncf %97 : vector<64x128xf32> to vector<64x128xbf16>
    %c0_118 = arith.constant 0 : index
    %c0_119 = arith.constant 0 : index
    %99 = vector.load %arg6[%c0_118, %c0_119] : memref<128x128xbf16, #tpu.memory_space<vmem>>, vector<128x128xbf16>
    %cst_120 = arith.constant dense<0.000000e+00> : vector<64x128xf32>
    %100 = tpu.matmul %98, %99, %cst_120 {dimension_numbers = #tpu.dot_dimension_numbers<[1], [0], [0], [1], [0, 0, 1, 1], [], []>} : vector<64x128xbf16>, vector<128x128xbf16>, vector<64x128xf32> -> vector<64x128xf32>
    %c0_121 = arith.constant 0 : index
    %c0_122 = arith.constant 0 : index
    %101 = vector.load %arg7[%c0_121, %c0_122] : memref<1x128xf32, #tpu.memory_space<vmem>>, vector<1x128xf32>
    %102 = vector.broadcast %101 : vector<1x128xf32> to vector<64x128xf32>
    %103 = arith.addf %100, %102 : vector<64x128xf32>
    %104 = arith.addf %94, %103 : vector<64x128xf32>
    %cst_123 = arith.constant 0.000000e+00 : f32
    %105 = vector.broadcast %cst_123 : f32 to vector<64x128xf32>
    %106 = arith.maximumf %104, %105 : vector<64x128xf32>
    %107 = vector.shape_cast %106 : vector<64x128xf32> to vector<8x8x128xf32>
    %c0_124 = arith.constant 0 : index
    %c0_125 = arith.constant 0 : index
    %c0_126 = arith.constant 0 : index
    %c0_127 = arith.constant 0 : index
    %108 = vector.load %arg8[%c0_124, %c0_125, %c0_126, %c0_127] : memref<1x8x8x128xf32, #tpu.memory_space<vmem>>, vector<1x8x8x128xf32>
    %109 = vector.shape_cast %108 : vector<1x8x8x128xf32> to vector<8x8x128xf32>
    %110 = vector.shape_cast %107 : vector<8x8x128xf32> to vector<1x8x8x128xf32>
    tpu.vector_store %arg8[%c0_124, %c0_125, %c0_126, %c0_127], %110 {strides = array<i32>} : memref<1x8x8x128xf32, #tpu.memory_space<vmem>>, vector<1x8x8x128xf32>,
    return
  }
  func.func @transform_0(%arg0: i32) -> (i32, i32, i32, i32) {
    %c0_i32 = arith.constant 0 : i32
    %c0_i32_0 = arith.constant 0 : i32
    %c0_i32_1 = arith.constant 0 : i32
    %c0_i32_2 = arith.constant 0 : i32
    return %arg0, %c0_i32, %c0_i32_0, %c0_i32_1 : i32, i32, i32, i32
  }
  func.func @transform_1(%arg0: i32) -> (i32, i32) {
    %c0_i32 = arith.constant 0 : i32
    %c0_i32_0 = arith.constant 0 : i32
    %c0_i32_1 = arith.constant 0 : i32
    return %c0_i32, %c0_i32_0 : i32, i32
  }
  func.func @transform_2(%arg0: i32) -> (i32, i32) {
    %c0_i32 = arith.constant 0 : i32
    %c0_i32_0 = arith.constant 0 : i32
    %c0_i32_1 = arith.constant 0 : i32
    return %c0_i32, %c0_i32_0 : i32, i32
  }
  func.func @transform_3(%arg0: i32) -> (i32, i32) {
    %c0_i32 = arith.constant 0 : i32
    %c0_i32_0 = arith.constant 0 : i32
    %c0_i32_1 = arith.constant 0 : i32
    return %c0_i32, %c0_i32_0 : i32, i32
  }
  func.func @transform_4(%arg0: i32) -> (i32, i32) {
    %c0_i32 = arith.constant 0 : i32
    %c0_i32_0 = arith.constant 0 : i32
    %c0_i32_1 = arith.constant 0 : i32
    return %c0_i32, %c0_i32_0 : i32, i32
  }
  func.func @transform_5(%arg0: i32) -> (i32, i32) {
    %c0_i32 = arith.constant 0 : i32
    %c0_i32_0 = arith.constant 0 : i32
    %c0_i32_1 = arith.constant 0 : i32
    return %c0_i32, %c0_i32_0 : i32, i32
  }
  func.func @transform_6(%arg0: i32) -> (i32, i32) {
    %c0_i32 = arith.constant 0 : i32
    %c0_i32_0 = arith.constant 0 : i32
    %c0_i32_1 = arith.constant 0 : i32
    return %c0_i32, %c0_i32_0 : i32, i32
  }
  func.func @transform_7(%arg0: i32) -> (i32, i32, i32, i32) {
    %c0_i32 = arith.constant 0 : i32
    %c0_i32_0 = arith.constant 0 : i32
    %c0_i32_1 = arith.constant 0 : i32
    %c0_i32_2 = arith.constant 0 : i32
    return %arg0, %c0_i32, %c0_i32_0, %c0_i32_1 : i32, i32, i32, i32
  }
}

</mosaic_0001>

<bundles_post_ra>
// kernel: tpu_custom_call.1
= control target key start
LH: loop header
LB: loop body
LE: loop exit
PB: predicated region body
PF: predicated region fallthrough
CT: control target
= control target key end

     0   :  { %12 = vsyncpa [#allocation5], 0  ;;  %s6622_s0 = inlined_call_operand.vmem [shape: f32[2,18,18,128], index: 0, kind: input, shape index: {}]   ;;  %s6623_s1 = inlined_call_operand.vmem [shape: bf16[1152,128], index: 1, kind: input, shape index: {}]   ;;  %s6624_s2 = inlined_call_operand.vmem [shape: f32[1,128], index: 2, kind: input, shape index: {}]   ;;  %s6625_s3 = inlined_call_operand.vmem [shape: bf16[1152,128], index: 3, kind: input, shape index: {}]   ;;  %s6626_s4 = inlined_call_operand.vmem [shape: f32[1,128], index: 4, kind: input, shape index: {}]   ;;  %s6627_s5 = inlined_call_operand.vmem [shape: bf16[128,128], index: 5, kind: input, shape index: {}]   ;;  %s6628_s6 = inlined_call_operand.vmem [shape: f32[1,128], index: 6, kind: input, shape index: {}]   ;;  %s6629_s7 = inlined_call_operand.hbm [shape: f32[2,8,8,128], index: 7, kind: output, shape index: {}]  }
   0x1   :  { %14 = vsyncpa [#allocation5 + $0x1], 0  ;;  %s5352_s24 = smov 0   ;;  %s5354_s25 = smov 0  }
   0x2   :  { %s5356_s26 = smov 0   ;;  %s5358_s27 = smov 0  }
   0x3 LB: > { %s5373_s28 = sadd.s32 4294967295, %s5307_s27   ;;  %s3940_s29 = sadd.s32 4294967294, %s5307_s27   ;;  %s5307_s27 = sphi %s5358_s27, %s6643_s27   ;;  %s5303_s26 = sphi %s5356_s26, %s6642_s26   ;;  %s5299_s25 = sphi %s5354_s25, %s6641_s25   ;;  %s5295_s24 = sphi %s5352_s24, %s6640_s24  }
   0x4   : > { %s5377_s30 = sadd.s32 1, %s5307_s27   ;;  %s179_s8 = sadd.s32 1, %s5303_s26 }
   0x5   : > { %s176_s9 = ssub.s32 %s5307_s27, %s5377_s30  ;;  %p189_p0 = scmp.ne.s32.totalorder %s5303_s26, %s5299_s25 }
   0x6   : > { %p177_p1 = scmp.eq.s32.totalorder %s176_s9, 0  ;;  %p190_p2 = scmp.eq.s32.totalorder %s5373_s28, 1 }
   0x7   : > { %p195_p3 = scmp.ne.s32.totalorder %s5299_s25, %s5295_s24  ;;  %p196_p4 = scmp.eq.s32.totalorder %s3940_s29, 1 }
   0x8   : > { %s5388_s10 = scalar_select %p177_p1, %s5303_s26, %s179_s8  }
   0x9   : > { %p5390_p5 = por %p190_p2, %p189_p0  ;;  %p5394_p6 = por %p196_p4, %p195_p3 }
   0xa   : > { %p3943_p7 = scmp.ge.s32.totalorder %s5307_s27, 1  ;;  %p240_p8 = scmp.lt.s32.totalorder %s5307_s27, 3 }
   0xc   : > { %p241_p9 = pnand %p3943_p7, %p240_p8 }
   0xd   : > { %p272_p10 = scmp.lt.s32.totalorder (!%p241_p9), %s5373_s28, 1  ;;  %s269_s13 = sand.u32 (!%p241_p9), 1, %s5299_s25  }
   0xe   : > { %244 = sbr.rel (%p241_p9) target bundleno = 668 (0x29c), region = 48  ;;  %s3944_s14 = sshll.u32 (!%p241_p9), %s269_s13, 6 }
   0xf   : > { %s6561_s15 = scalar_lea.vmem (!%p241_p9), [#allocation4], %s3944_s14  ;;  %s5174_s16 = sshll.u32 (!%p241_p9), %s5373_s28, 6 }
  0x10   : > { %s3828_s20 = scalar_lea.hbm (!%p241_p9), %s6629_s7, %s5174_s16 }
  0x11   : > { %s3831_s22 = sshll.u32 (!%p241_p9), %s3828_s20, 4  ;;  %s3832_s22 = int_to_ptr.hbm [resolvable:$true] %s3831_s22 }
  0x12   : > { %s5259_s23 = sshra.s32 (!%p241_p9), %s3832_s22, 4  ;;  %s5260_s23 = int_to_ptr.hbm [resolvable:$true] %s5259_s23 }
  0x13   : > { %v4993_v0 = vld [vmem:[%s6623_s1 + $0x38] sm:$0xff]  ;;  %v4992_v3 = vld [vmem:[%s6623_s1 + $0x30] sm:$0xff]  ;;  %s273_s21 = scalar_select %p272_p10, %s5373_s28, 1  ;;  %v5309_v6 = vmov 0   ;;  %vm1638_vm0 = vcmask 1043459   ;;  %v4991_v7 = vld [vmem:[%s6623_s1 + $0x28] sm:$0xff] }
  0x14   : > { %v5001_v1 = vld [vmem:[%s6623_s1 + $0x78] sm:$0xff]  ;;  %1369 = vmatpush.bf16.msra.mxu0 %v4993_v0  ;;  %5175 = vmatpush.bf16.msra.mxu3 %v4993_v0  ;;  %v5000_v4 = vld [vmem:[%s6623_s1 + $0x70] sm:$0xff]  ;;  %1644 = vst [vmem:[#allocation2 + $0x8] sm:$0xf] %v5309_v6  ;;  %vm1639_vm1 = vsmask.f32 7950  ;;  %p5266_p0 = scmp.lt.s32.totalorder %s5260_s23, %s6629_s7 }
  0x15   : > { %v5009_v2 = vld [vmem:[%s6623_s1 + $0xb8] sm:$0xff]  ;;  %1398 = vmatpush.bf16.msra.mxu1 %v5001_v1  ;;  %v5008_v5 = vld [vmem:[%s6623_s1 + $0xb0] sm:$0xff]  ;;  %s5199_s9 = smul.u32 432, %s273_s21  ;;  %1655 = vst [vmem:[#allocation2 + $0xbc] sm:$0xf] %v5309_v6  ;;  %v4999_v8 = vld [vmem:[%s6623_s1 + $0x68] sm:$0xff] }
  0x16   : > { %1427 = vmatpush.bf16.msra.mxu2 %v5009_v2  ;;  %v5007_v9 = vld [vmem:[%s6623_s1 + $0xa8] sm:$0xff]  ;;  %v4990_v10 = vld [vmem:[%s6623_s1 + $0x20] sm:$0xff]  ;;  %vm5439_vm2 = vmand %vm1638_vm0, %vm1639_vm1  ;;  %vm1645_vm3 = vcmask 1040384   ;;  %vm1646_vm4 = vsmask.f32 256  ;;  %s3829_s21 = sshll.u32 %s6561_s15, 4  ;;  %s3830_s21 = int_to_ptr.vmem [resolvable:$true] %s3829_s21 }
  0x17   : > { %s5426_s17 = scalar_lea.vmem %s6622_s0, %s5199_s9  ;;  %v4998_v14 = vld [vmem:[%s6623_s1 + $0x60] sm:$0xff]  ;;  %v4989_v28 = vld [vmem:[%s6623_s1 + $0x18] sm:$0xff]  ;;  %vm5462_vm5 = vmand %vm1645_vm3, %vm1646_vm4  ;;  %vm1740_vm6 = vsmask.f32 4368  ;;  %vm1894_vm8 = vsmask.f32 3328 }
  0x18   : > { %1370 = vmatpush.bf16.msra.mxu0 %v4992_v3  ;;  %5176 = vmatpush.bf16.msra.mxu3 %v4992_v3  ;;  %v278_v11 = vld [vmem:[%s5426_s17] ss:$2 sm:$0xff]  ;;  %v3946_v12 = vld [vmem:[%s5426_s17 + $0x30] ss:$2 sm:$0xff]  ;;  %v1641_v17 = vld [vmem:[#allocation2 + $0x4] sm:$0x8] }
  0x19   : > { %1399 = vmatpush.bf16.msra.mxu1 %v5000_v4  ;;  %v293_v15 = vpack.c.bf16 %v278_v11, %v278_v11  ;;  %v294_v16 = vpack.c.bf16 %v3946_v12, %v3946_v12  ;;  %v3949_v18 = vld [vmem:[%s5426_s17 + $0xc0] ss:$2 sm:$0xff]  ;;  %v1642_v20 = vsel %vm5439_vm2, 0, %v1641_v17  ;;  %v3950_v22 = vld [vmem:[%s5426_s17 + $0xf0] ss:$2 sm:$0xff]  ;;  %vm5493_vm7 = vmor %vm1646_vm4, %vm1740_vm6  ;;  %s3817_s28 = scalar_lea.sflag [#allocation5], %s269_s13 }
  0x1a   : > { %1428 = vmatpush.bf16.msra.mxu2 %v5008_v5  ;;  %v5006_v19 = vld [vmem:[%s6623_s1 + $0xa0] sm:$0xff]  ;;  %v297_v23 = vpack.c.bf16 %v3949_v18, %v3949_v18  ;;  %v298_v24 = vpack.c.bf16 %v3950_v22, %v3950_v22  ;;  %v3954_v26 = vld [vmem:[%s5426_s17 + $0x31] ss:$2 sm:$0xff]  ;;  %1643 = vst [vmem:[#allocation2 + $0x4] sm:$0x8] %v1642_v20  ;;  %v4987_v50 = vld [vmem:[%s6623_s1 + $0x8] sm:$0xff] }
  0x1b   : > { %v1725_v21 = vld [vmem:[#allocation2 + $0x8] sm:$0xf]  ;;  %301 = vst [vmem:[#allocation3] sm:$0xf] %v293_v15  ;;  %v326_v30 = vpack.c.bf16 %v3954_v26, %v3954_v26  ;;  %v3962_v32 = vld [vmem:[%s5426_s17 + $0x32] ss:$2 sm:$0xff] }
  0x1c   : > { %1371 = vmatpush.bf16.msra.mxu0 %v4991_v7  ;;  %5177 = vmatpush.bf16.msra.mxu3 %v4991_v7  ;;  %v3953_v25 = vld [vmem:[%s5426_s17 + $0x1] ss:$2 sm:$0xff]  ;;  %302 = vst [vmem:[#allocation3 + $0x24] sm:$0xf] %v294_v16  ;;  %v1748_v29 = vshrl.u32 %v1725_v21, 16  ;;  %v4997_v36 = vld [vmem:[%s6623_s1 + $0x58] sm:$0xff]  ;;  %v358_v38 = vpack.c.bf16 %v3962_v32, %v3962_v32 }
  0x1d   : > { %1400 = vmatpush.bf16.msra.mxu1 %v4999_v8  ;;  %v325_v27 = vpack.c.bf16 %v3953_v25, %v3953_v25  ;;  %v3961_v31 = vld [vmem:[%s5426_s17 + $0x2] ss:$2 sm:$0xff]  ;;  %305 = vst [vmem:[#allocation3 + $0x90] sm:$0xf] %v297_v23  ;;  %v5005_v37 = vld [vmem:[%s6623_s1 + $0x98] sm:$0xff]  ;;  %v1751_v43 = vshll.u32 %v1725_v21, 16 }
  0x1e   : > { %1429 = vmatpush.bf16.msra.mxu2 %v5007_v9  ;;  %v357_v33 = vpack.c.bf16 %v3961_v31, %v3961_v31  ;;  %v1648_v35 = vld [vmem:[#allocation2 + $0xc] sm:$0x1]  ;;  %306 = vst [vmem:[#allocation3 + $0xb4] sm:$0xf] %v298_v24  ;;  %v1878_v39 = vld [vmem:[#allocation2 + $0x8] sm:$0xf] }
  0x1f   : > { %333 = vst [vmem:[#allocation3 + $0x4] sm:$0xf] %v325_v27  ;;  %v1898_v40 = vshrl.u32 %v1878_v39, 16  ;;  %v1901_v41 = vshll.u32 %v1878_v39, 16  ;;  %v1750_v42 = vrot.slane %v1748_v29, 7  ;;  %v1649_v44 = vsel %vm5462_vm5, 0, %v1648_v35 }
  0x20   : > { %1372 = vmatpush.bf16.msra.mxu0 %v4990_v10  ;;  %5178 = vmatpush.bf16.msra.mxu3 %v4990_v10  ;;  %334 = vst [vmem:[#allocation3 + $0x28] sm:$0xf] %v326_v30  ;;  %v4988_v45 = vld [vmem:[%s6623_s1 + $0x10] sm:$0xff]  ;;  %v3947_v52 = vld [vmem:[%s5426_s17 + $0x60] ss:$2 sm:$0xff]  ;;  %v5017_v18 = vld [vmem:[%s6623_s1 + $0xf8] sm:$0xff] }
  0x21   : > { %1401 = vmatpush.bf16.msra.mxu1 %v4998_v14  ;;  %v4996_v46 = vld [vmem:[%s6623_s1 + $0x50] sm:$0xff]  ;;  %365 = vst [vmem:[#allocation3 + $0x8] sm:$0xf] %v357_v33  ;;  %v1900_v48 = vrot.slane %v1898_v40, 4  ;;  %v1903_v49 = vrot.slane %v1901_v41, 5  ;;  %v4995_v53 = vld [vmem:[%s6623_s1 + $0x48] sm:$0xff]  ;;  %v1753_v55 = vor.u32 %v1751_v43, %v1750_v42  ;;  %v295_v58 = vpack.c.bf16 %v3947_v52, %v3947_v52 }
  0x22   : > { %1430 = vmatpush.bf16.msra.mxu2 %v5006_v19  ;;  %v5004_v47 = vld [vmem:[%s6623_s1 + $0x90] sm:$0xff]  ;;  %366 = vst [vmem:[#allocation3 + $0x2c] sm:$0xf] %v358_v38  ;;  %v1724_v51 = vld [vmem:[#allocation2 + $0x4] sm:$0x8]  ;;  %v5003_v62 = vld [vmem:[%s6623_s1 + $0x88] sm:$0xff] }
  0x23   : > { %1650 = vst [vmem:[#allocation2 + $0xc] sm:$0x1] %v1649_v44  ;;  %v1743_v54 = vshrl.u32 %v1724_v51, 16  ;;  %v1862_v56 = vld [vmem:[#allocation2 + $0x8] sm:$0xf]  ;;  %v4986_v3 = vld [vmem:[%s6623_s1] sm:$0xff]  ;;  %v1904_v7 = vor.u32 %v1903_v49, %v1900_v48 }
  0x24   : > { %1373 = vmatpush.bf16.msra.mxu0 %v4989_v28  ;;  %5179 = vmatpush.bf16.msra.mxu3 %v4989_v28  ;;  %v3948_v57 = vld [vmem:[%s5426_s17 + $0x90] ss:$2 sm:$0xff]  ;;  %vm1895_vm9 = vsmask.f32 7440  ;;  %v3951_v61 = vld [vmem:[%s5426_s17 + $0x120] ss:$2 sm:$0xff] }
  0x25   : > { %1402 = vmatpush.bf16.msra.mxu1 %v4997_v36  ;;  %v296_v60 = vpack.c.bf16 %v3948_v57, %v3948_v57  ;;  %v5501_v63 = vld [vmem:[#allocation3] sm:$0xf]  ;;  %v4449_v0 = vrot.slane %v1743_v54, 11  ;;  %303 = vst [vmem:[#allocation3 + $0x48] sm:$0xf] %v295_v58  ;;  %v299_v2 = vpack.c.bf16 %v3951_v61, %v3951_v61  ;;  %v4994_v9 = vld [vmem:[%s6623_s1 + $0x40] sm:$0xff]  ;;  %vm5530_vm10 = vmor %vm1894_vm8, %vm1895_vm9 }
  0x26   : > { %1431 = vmatpush.bf16.msra.mxu2 %v5005_v37  ;;  %v5503_v1 = vld [vmem:[#allocation3 + $0x4] sm:$0xf]  ;;  %v4091_v5 = vld [vmem:[#allocation3 + $0x90] sm:$0xf]  ;;  %v4972_v6 = vld [vmem:[#allocation3 + $0xb0] sm:$0xf0] }
  0x27   : > { %v4954_v4 = vld [vmem:[#allocation3 + $0x20] sm:$0xf0]  ;;  %1870 = vst [vmem:[#allocation3 + $0x4] sm:$0xf] %v1862_v56  ;;  %v3952_v8 = vld [vmem:[%s5426_s17 + $0x150] ss:$2 sm:$0xff]  ;;  %v1754_v11 = vsel %vm5493_vm7, %v4449_v0, %v1753_v55  ;;  %v4092_v30 = vor.u32 %v4972_v6, %v4091_v5 }
  0x28   : > { %1374 = vmatpush.bf16.msra.mxu0 %v4988_v45  ;;  %5180 = vmatpush.bf16.msra.mxu3 %v4988_v45  ;;  %v5002_v10 = vld [vmem:[%s6623_s1 + $0x80] sm:$0xff]  ;;  %v4021_v12 = vld [vmem:[#allocation3 + $0x24] sm:$0xf0]  ;;  %304 = vst [vmem:[#allocation3 + $0x6c] sm:$0xf] %v296_v60  ;;  %v300_v15 = vpack.c.bf16 %v3952_v8, %v3952_v8  ;;  %v5025_v19 = vld [vmem:[%s6623_s1 + $0x138] sm:$0xff]  ;;  %v4020_v29 = vor.u32 %v4954_v4, %v5501_v63 }
  0x29   : > { %1403 = vmatpush.bf16.msra.mxu1 %v4996_v46  ;;  %v4027_v14 = vld [vmem:[#allocation3 + $0x8] sm:$0xf]  ;;  %v3955_v16 = vld [vmem:[%s5426_s17 + $0x61] ss:$2 sm:$0xff]  ;;  %1854 = vst [vmem:[#allocation3] sm:$0xf] %v1754_v11  ;;  %v4024_v33 = vor.u32 %v5503_v1, %v4021_v12 }
  0x2a   : > { %1432 = vmatpush.bf16.msra.mxu2 %v5004_v47  ;;  %v4955_v17 = vld [vmem:[#allocation3 + $0x28] sm:$0xf0]  ;;  %v327_v21 = vpack.c.bf16 %v3955_v16, %v3955_v16  ;;  %v1879_v22 = vld [vmem:[#allocation2 + $0xc] sm:$0x1]  ;;  %307 = vst [vmem:[#allocation3 + $0xd8] sm:$0xf] %v299_v2 }
  0x2b   : > { %v3956_v20 = vld [vmem:[%s5426_s17 + $0x91] ss:$2 sm:$0xff]  ;;  %v3963_v24 = vld [vmem:[%s5426_s17 + $0x62] ss:$2 sm:$0xff]  ;;  %v1905_v25 = vrot.slane %v1904_v7, 4  ;;  %v1907_v26 = vshll.u32 %v1879_v22, 16  ;;  %v4028_v35 = vor.u32 %v4955_v17, %v4027_v14 }
  0x2c   : > { %1375 = vmatpush.bf16.msra.mxu0 %v4987_v50  ;;  %5181 = vmatpush.bf16.msra.mxu3 %v4987_v50  ;;  %v328_v23 = vpack.c.bf16 %v3956_v20, %v3956_v20  ;;  %308 = vst [vmem:[#allocation3 + $0xfc] sm:$0xf] %v300_v15  ;;  %v3964_v27 = vld [vmem:[%s5426_s17 + $0x92] ss:$2 sm:$0xff]  ;;  %v359_v28 = vpack.c.bf16 %v3963_v24, %v3963_v24  ;;  %v3957_v38 = vld [vmem:[%s5426_s17 + $0xc1] ss:$2 sm:$0xff] }
  0x2d   : > { %1404 = vmatpush.bf16.msra.mxu1 %v4995_v53  ;;  %335 = vst [vmem:[#allocation3 + $0x4c] sm:$0xf] %v327_v21  ;;  %v360_v32 = vpack.c.bf16 %v3964_v27, %v3964_v27  ;;  %v1909_v36 = vrot.slane %v1907_v26, 5  ;;  %v5041_v37 = vld [vmem:[%s6623_s1 + $0x1b8] sm:$0xff]  ;;  %v5016_v41 = vld [vmem:[%s6623_s1 + $0xf0] sm:$0xff]  ;;  %v329_v43 = vpack.c.bf16 %v3957_v38, %v3957_v38  ;;  %v5015_v54 = vld [vmem:[%s6623_s1 + $0xe8] sm:$0xff] }
  0x2e   : > { %1433 = vmatpush.bf16.msra.mxu2 %v5003_v62  ;;  %336 = vst [vmem:[#allocation3 + $0x70] sm:$0xf] %v328_v23  ;;  %v3958_v39 = vld [vmem:[%s5426_s17 + $0xf1] ss:$2 sm:$0xff]  ;;  %v3965_v45 = vld [vmem:[%s5426_s17 + $0xc2] ss:$2 sm:$0xff] }
  0x2f   : > { %367 = vst [vmem:[#allocation3 + $0x50] sm:$0xf] %v359_v28  ;;  %v1910_v40 = vsel %vm5530_vm10, %v1905_v25, %v1909_v36  ;;  %v5024_v42 = vld [vmem:[%s6623_s1 + $0x130] sm:$0xff]  ;;  %v330_v44 = vpack.c.bf16 %v3958_v39, %v3958_v39  ;;  %v361_v47 = vpack.c.bf16 %v3965_v45, %v3965_v45  ;;  %v3969_v48 = vld [vmem:[%s5426_s17 + $0x18] ss:$2 sm:$0xff]  ;;  %v5023_v55 = vld [vmem:[%s6623_s1 + $0x128] sm:$0xff] }
  0x30   : > { %1376 = vmatpush.bf16.msra.mxu0 %v4986_v3  ;;  %5182 = vmatpush.bf16.msra.mxu3 %v4986_v3  ;;  %368 = vst [vmem:[#allocation3 + $0x74] sm:$0xf] %v360_v32  ;;  %v3966_v46 = vld [vmem:[%s5426_s17 + $0xf2] ss:$2 sm:$0xff]  ;;  %v389_v51 = vpack.c.bf16 %v3969_v48, %v3969_v48  ;;  %v3977_v53 = vld [vmem:[%s5426_s17 + $0x19] ss:$2 sm:$0xff] }
  0x31   : > { %1405 = vmatpush.bf16.msra.mxu1 %v4994_v9  ;;  %2017 = vst [vmem:[#allocation3 + $0x8] sm:$0xf] %v1910_v40  ;;  %v362_v49 = vpack.c.bf16 %v3966_v46, %v3966_v46  ;;  %v3970_v50 = vld [vmem:[%s5426_s17 + $0x48] ss:$2 sm:$0xff]  ;;  %v3978_v56 = vld [vmem:[%s5426_s17 + $0x49] ss:$2 sm:$0xff]  ;;  %v421_v57 = vpack.c.bf16 %v3977_v53, %v3977_v53 }
  0x32   : > { %1434 = vmatpush.bf16.msra.mxu2 %v5002_v10  ;;  %337 = vst [vmem:[#allocation3 + $0x94] sm:$0xf] %v329_v43  ;;  %v390_v52 = vpack.c.bf16 %v3970_v50, %v3970_v50  ;;  %v422_v58 = vpack.c.bf16 %v3978_v56, %v3978_v56  ;;  %v5033_v60 = vld [vmem:[%s6623_s1 + $0x178] sm:$0xff]  ;;  %v5040_v61 = vld [vmem:[%s6623_s1 + $0x1b0] sm:$0xff]  ;;  %v5014_v62 = vld [vmem:[%s6623_s1 + $0xe0] sm:$0xff]  ;;  %s5261_s29 = scalar_lea.hbm %s5260_s23, 64 }
  0x33   : > { %1377 = vmatmul.bf16.vlgmr.msra.gmra.mxu0 %v4020_v29  ;;  %1387 = vmatmul.bf16.vlgmr.msra.gmra.mxu3 %v4092_v30  ;;  %338 = vst [vmem:[#allocation3 + $0xb8] sm:$0xf] %v330_v44  ;;  %v5022_v63 = vld [vmem:[%s6623_s1 + $0x120] sm:$0xff]  ;;  %v5032_v0 = vld [vmem:[%s6623_s1 + $0x170] sm:$0xff]  ;;  %v5039_v8 = vld [vmem:[%s6623_s1 + $0x1a8] sm:$0xff]  ;;  %p5262_p11 = scmp.ne.s32.totalorder %s5260_s23, %s5261_s29  ;;  %s5265_s9 = scalar_lea.hbm %s6629_s7, 128 }
  0x34   : > { %1456 = vmatpush.bf16.msrb.mxu3 %v5017_v18  ;;  %1485 = vmatpush.bf16.msrb.mxu0 %v5025_v19  ;;  %369 = vst [vmem:[#allocation3 + $0x98] sm:$0xf] %v361_v47  ;;  %v4055_v1 = vld [vmem:[#allocation3 + $0x48] sm:$0xf]  ;;  %v4963_v2 = vld [vmem:[#allocation3 + $0x68] sm:$0xf0]  ;;  %p5267_p1 = scmp.lt.s32.totalorder %s5265_s9, %s5261_s29 }
  0x35   : > { %1406 = vmatmul.bf16.vlgmr.msra.gmra.mxu1 %v4024_v33  ;;  %1435 = vmatmul.bf16.vlgmr.msra.gmra.mxu2 %v4028_v35  ;;  %370 = vst [vmem:[#allocation3 + $0xbc] sm:$0xf] %v362_v49  ;;  %v4127_v3 = vld [vmem:[#allocation3 + $0xd8] sm:$0xf]  ;;  %v4981_v4 = vld [vmem:[#allocation3 + $0xf8] sm:$0xf0]  ;;  %v4056_v24 = vor.u32 %v4963_v2, %v4055_v1  ;;  %p5263_p12 = pnand %p5262_p11, %p5390_p5 }
  0x36   : > { %1543 = vmatpush.bf16.msrb.mxu2 %v5041_v37  ;;  %397 = vst [vmem:[#allocation3 + $0xc] sm:$0xf] %v389_v51  ;;  %1514 = vmatpush.bf16.msrb.mxu1 %v5033_v60  ;;  %v4959_v5 = vld [vmem:[#allocation3 + $0x4c] sm:$0xf]  ;;  %v4057_v6 = vld [vmem:[#allocation3 + $0x6c] sm:$0xf0]  ;;  %v4128_v25 = vor.u32 %v4981_v4, %v4127_v3  ;;  %p5268_p2 = por %p5267_p1, %p5266_p0 }
  0x37   : > { %398 = vst [vmem:[#allocation3 + $0x30] sm:$0xf] %v390_v52  ;;  %v4063_v7 = vld [vmem:[#allocation3 + $0x50] sm:$0xf]  ;;  %v4964_v9 = vld [vmem:[#allocation3 + $0x70] sm:$0xf0]  ;;  %v4060_v28 = vor.u32 %v4959_v5, %v4057_v6  ;;  %p5264_p13 = pneg %p5263_p12 }
  0x38   : > { %1457 = vmatpush.bf16.msrb.mxu3 %v5016_v41  ;;  %1486 = vmatpush.bf16.msrb.mxu0 %v5024_v42  ;;  %429 = vst [vmem:[#allocation3 + $0x10] sm:$0xf] %v421_v57  ;;  %v5013_v10 = vld [vmem:[%s6623_s1 + $0xd8] sm:$0xff]  ;;  %v3959_v11 = vld [vmem:[%s5426_s17 + $0x121] ss:$2 sm:$0xff]  ;;  %v4064_v29 = vor.u32 %v4964_v9, %v4063_v7  ;;  %v5012_v37 = vld [vmem:[%s6623_s1 + $0xd0] sm:$0xff] }
  0x39   : > { %430 = vst [vmem:[#allocation3 + $0x34] sm:$0xf] %v422_v58  ;;  %v3960_v12 = vld [vmem:[%s5426_s17 + $0x151] ss:$2 sm:$0xff]  ;;  %v5031_v14 = vld [vmem:[%s6623_s1 + $0x168] sm:$0xff]  ;;  %v331_v15 = vpack.c.bf16 %v3959_v11, %v3959_v11  ;;  %v5030_v33 = vld [vmem:[%s6623_s1 + $0x160] sm:$0xff]  ;;  %p5269_p3 = pnand %p5268_p2, %p5264_p13 }
  0x3a   : > { %1544 = vmatpush.bf16.msrb.mxu2 %v5040_v61  ;;  %1515 = vmatpush.bf16.msrb.mxu1 %v5032_v0  ;;  %v332_v16 = vpack.c.bf16 %v3960_v12, %v3960_v12  ;;  %v3967_v17 = vld [vmem:[%s5426_s17 + $0x122] ss:$2 sm:$0xff]  ;;  %v3968_v18 = vld [vmem:[%s5426_s17 + $0x152] ss:$2 sm:$0xff]  ;;  %v3979_v27 = vld [vmem:[%s5426_s17 + $0x79] ss:$2 sm:$0xff] }
  0x3b   : > { %v5021_v19 = vld [vmem:[%s6623_s1 + $0x118] sm:$0xff]  ;;  %v363_v20 = vpack.c.bf16 %v3967_v17, %v3967_v17  ;;  %v364_v21 = vpack.c.bf16 %v3968_v18, %v3968_v18  ;;  %v3972_v23 = vld [vmem:[%s5426_s17 + $0xa8] ss:$2 sm:$0xff]  ;;  %339 = vst [vmem:[#allocation3 + $0xdc] sm:$0xf] %v331_v15  ;;  %v5038_v35 = vld [vmem:[%s6623_s1 + $0x1a0] sm:$0xff]  ;;  %v423_v36 = vpack.c.bf16 %v3979_v27, %v3979_v27 }
  0x3c   : > { %1458 = vmatpush.bf16.msrb.mxu3 %v5015_v54  ;;  %1487 = vmatpush.bf16.msrb.mxu0 %v5023_v55  ;;  %v3971_v22 = vld [vmem:[%s5426_s17 + $0x78] ss:$2 sm:$0xff]  ;;  %340 = vst [vmem:[#allocation3 + $0x100] sm:$0xf] %v332_v16  ;;  %v392_v30 = vpack.c.bf16 %v3972_v23, %v3972_v23  ;;  %v3980_v32 = vld [vmem:[%s5426_s17 + $0xa9] ss:$2 sm:$0xff] }
  0x3d   : > { %v391_v26 = vpack.c.bf16 %v3971_v22, %v3971_v22  ;;  %371 = vst [vmem:[#allocation3 + $0xe0] sm:$0xf] %v363_v20  ;;  %v5020_v38 = vld [vmem:[%s6623_s1 + $0x110] sm:$0xff]  ;;  %v424_v39 = vpack.c.bf16 %v3980_v32, %v3980_v32  ;;  %v5029_v40 = vld [vmem:[%s6623_s1 + $0x158] sm:$0xff]  ;;  %v5011_v42 = vld [vmem:[%s6623_s1 + $0xc8] sm:$0xff] }
  0x3e   : > { %1545 = vmatpush.bf16.msrb.mxu2 %v5039_v8  ;;  %1516 = vmatpush.bf16.msrb.mxu1 %v5031_v14  ;;  %372 = vst [vmem:[#allocation3 + $0x104] sm:$0xf] %v364_v21  ;;  %v5037_v41 = vld [vmem:[%s6623_s1 + $0x198] sm:$0xff]  ;;  %v5019_v43 = vld [vmem:[%s6623_s1 + $0x108] sm:$0xff]  ;;  %v5010_v44 = vld [vmem:[%s6623_s1 + $0xc0] sm:$0xff] }
  0x3f   : > { %399 = vst [vmem:[#allocation3 + $0x54] sm:$0xf] %v391_v26  ;;  %v5018_v45 = vld [vmem:[%s6623_s1 + $0x100] sm:$0xff]  ;;  %v5028_v46 = vld [vmem:[%s6623_s1 + $0x150] sm:$0xff]  ;;  %v5049_v49 = vld [vmem:[%s6623_s1 + $0x1f8] sm:$0xff] }
  0x40   : > { %1459 = vmatpush.bf16.msrb.mxu3 %v5014_v62  ;;  %1488 = vmatpush.bf16.msrb.mxu0 %v5022_v63  ;;  %400 = vst [vmem:[#allocation3 + $0x78] sm:$0xf] %v392_v30  ;;  %v3973_v47 = vld [vmem:[%s5426_s17 + $0xd8] ss:$2 sm:$0xff]  ;;  %v3974_v48 = vld [vmem:[%s5426_s17 + $0x108] ss:$2 sm:$0xff] }
  0x41   : > { %431 = vst [vmem:[#allocation3 + $0x58] sm:$0xf] %v423_v36  ;;  %v5057_v50 = vld [vmem:[%s6623_s1 + $0x238] sm:$0xff]  ;;  %v5036_v51 = vld [vmem:[%s6623_s1 + $0x190] sm:$0xff]  ;;  %v393_v52 = vpack.c.bf16 %v3973_v47, %v3973_v47  ;;  %v394_v53 = vpack.c.bf16 %v3974_v48, %v3974_v48  ;;  %v4093_v0 = vld [vmem:[#allocation3 + $0xb4] sm:$0xf0] }
  0x42   : > { %1517 = vmatpush.bf16.msrb.mxu1 %v5030_v33  ;;  %1546 = vmatpush.bf16.msrb.mxu2 %v5038_v35  ;;  %432 = vst [vmem:[#allocation3 + $0x7c] sm:$0xf] %v424_v39  ;;  %v3981_v54 = vld [vmem:[%s5426_s17 + $0xd9] ss:$2 sm:$0xff]  ;;  %v3982_v55 = vld [vmem:[%s5426_s17 + $0x109] ss:$2 sm:$0xff] }
  0x43   : > { %1382 = vmatmul.bf16.gmra.mxu0 %v4056_v24  ;;  %1392 = vmatmul.bf16.gmra.mxu3 %v4128_v25  ;;  %v4951_v56 = vld [vmem:[#allocation3 + $0xc] sm:$0xf]  ;;  %v4029_v57 = vld [vmem:[#allocation3 + $0x2c] sm:$0xf0]  ;;  %v425_v58 = vpack.c.bf16 %v3981_v54, %v3981_v54  ;;  %v426_v60 = vpack.c.bf16 %v3982_v55, %v3982_v55  ;;  %v4968_v63 = vld [vmem:[#allocation3 + $0x94] sm:$0xf] }
  0x44   : > { %1460 = vmatpush.bf16.msrb.mxu3 %v5013_v10  ;;  %1489 = vmatpush.bf16.msrb.mxu0 %v5021_v19  ;;  %v3985_v61 = vld [vmem:[%s5426_s17 + $0x1a] ss:$2 sm:$0xff]  ;;  %v3986_v62 = vld [vmem:[%s5426_s17 + $0x4a] ss:$2 sm:$0xff]  ;;  %401 = vst [vmem:[#allocation3 + $0x9c] sm:$0xf] %v393_v52  ;;  %v4032_v14 = vor.u32 %v4951_v56, %v4029_v57  ;;  %v4096_v16 = vor.u32 %v4968_v63, %v4093_v0 }
  0x45   : > { %1411 = vmatmul.bf16.gmra.mxu1 %v4060_v28  ;;  %1440 = vmatmul.bf16.gmra.mxu2 %v4064_v29  ;;  %v4099_v1 = vld [vmem:[#allocation3 + $0x98] sm:$0xf]  ;;  %v4035_v2 = vld [vmem:[#allocation3 + $0x10] sm:$0xf]  ;;  %v453_v3 = vpack.c.bf16 %v3985_v61, %v3985_v61  ;;  %v4956_v5 = vld [vmem:[#allocation3 + $0x30] sm:$0xf0]  ;;  %v454_v6 = vpack.c.bf16 %v3986_v62, %v3986_v62 }
  0x46   : > { %1518 = vmatpush.bf16.msrb.mxu1 %v5029_v40  ;;  %1547 = vmatpush.bf16.msrb.mxu2 %v5037_v41  ;;  %v3993_v4 = vld [vmem:[%s5426_s17 + $0x30] ss:$2 sm:$0xff]  ;;  %402 = vst [vmem:[#allocation3 + $0xc0] sm:$0xf] %v394_v53  ;;  %v3994_v7 = vld [vmem:[%s5426_s17 + $0x60] ss:$2 sm:$0xff]  ;;  %v4036_v15 = vor.u32 %v4956_v5, %v4035_v2 }
  0x47   : > { %v4973_v8 = vld [vmem:[#allocation3 + $0xb8] sm:$0xf0]  ;;  %v5027_v9 = vld [vmem:[%s6623_s1 + $0x148] sm:$0xff]  ;;  %433 = vst [vmem:[#allocation3 + $0xa0] sm:$0xf] %v425_v58  ;;  %v485_v11 = vpack.c.bf16 %v3993_v4, %v3993_v4  ;;  %v486_v12 = vpack.c.bf16 %v3994_v7, %v3994_v7  ;;  %v5048_v18 = vld [vmem:[%s6623_s1 + $0x1f0] sm:$0xff] }
  0x48   : > { %1461 = vmatpush.bf16.msrb.mxu3 %v5012_v37  ;;  %1490 = vmatpush.bf16.msrb.mxu0 %v5020_v38  ;;  %v5035_v10 = vld [vmem:[%s6623_s1 + $0x188] sm:$0xff]  ;;  %434 = vst [vmem:[#allocation3 + $0xc4] sm:$0xf] %v426_v60  ;;  %v4100_v17 = vor.u32 %v4973_v8, %v4099_v1  ;;  %v5056_v19 = vld [vmem:[%s6623_s1 + $0x230] sm:$0xff]  ;;  %v5026_v20 = vld [vmem:[%s6623_s1 + $0x140] sm:$0xff] }
  0x49   : > { %461 = vst [vmem:[#allocation3 + $0x14] sm:$0xf] %v453_v3  ;;  %v5034_v21 = vld [vmem:[%s6623_s1 + $0x180] sm:$0xff]  ;;  %v5047_v22 = vld [vmem:[%s6623_s1 + $0x1e8] sm:$0xff]  ;;  %v3995_v39 = vld [vmem:[%s5426_s17 + $0x90] ss:$2 sm:$0xff] }
  0x4a   : > { %1519 = vmatpush.bf16.msrb.mxu1 %v5028_v46  ;;  %1548 = vmatpush.bf16.msrb.mxu2 %v5036_v51  ;;  %462 = vst [vmem:[#allocation3 + $0x38] sm:$0xf] %v454_v6  ;;  %v5055_v23 = vld [vmem:[%s6623_s1 + $0x228] sm:$0xff]  ;;  %v3975_v24 = vld [vmem:[%s5426_s17 + $0x138] ss:$2 sm:$0xff]  ;;  %v487_v47 = vpack.c.bf16 %v3995_v39, %v3995_v39  ;;  %v5044_v58 = vld [vmem:[%s6623_s1 + $0x1d0] sm:$0xff] }
  0x4b   : > { %493 = vst [vmem:[#allocation3 + $0x18] sm:$0xf] %v485_v11  ;;  %v3976_v25 = vld [vmem:[%s5426_s17 + $0x168] ss:$2 sm:$0xff]  ;;  %v395_v26 = vpack.c.bf16 %v3975_v24, %v3975_v24  ;;  %v3983_v28 = vld [vmem:[%s5426_s17 + $0x139] ss:$2 sm:$0xff] }
  0x4c   : > { %1462 = vmatpush.bf16.msrb.mxu3 %v5011_v42  ;;  %1491 = vmatpush.bf16.msrb.mxu0 %v5019_v43  ;;  %494 = vst [vmem:[#allocation3 + $0x3c] sm:$0xf] %v486_v12  ;;  %v396_v27 = vpack.c.bf16 %v3976_v25, %v3976_v25  ;;  %v3984_v29 = vld [vmem:[%s5426_s17 + $0x169] ss:$2 sm:$0xff]  ;;  %v427_v30 = vpack.c.bf16 %v3983_v28, %v3983_v28  ;;  %v3987_v33 = vld [vmem:[%s5426_s17 + $0x7a] ss:$2 sm:$0xff] }
  0x4d   : > { %v428_v32 = vpack.c.bf16 %v3984_v29, %v3984_v29  ;;  %v3988_v35 = vld [vmem:[%s5426_s17 + $0xaa] ss:$2 sm:$0xff]  ;;  %v5046_v36 = vld [vmem:[%s6623_s1 + $0x1e0] sm:$0xff]  ;;  %403 = vst [vmem:[#allocation3 + $0xe4] sm:$0xf] %v395_v26  ;;  %v455_v38 = vpack.c.bf16 %v3987_v33, %v3987_v33 }
  0x4e   : > { %1520 = vmatpush.bf16.msrb.mxu1 %v5027_v9  ;;  %1549 = vmatpush.bf16.msrb.mxu2 %v5035_v10  ;;  %v5054_v37 = vld [vmem:[%s6623_s1 + $0x220] sm:$0xff]  ;;  %404 = vst [vmem:[#allocation3 + $0x108] sm:$0xf] %v396_v27  ;;  %v456_v40 = vpack.c.bf16 %v3988_v35, %v3988_v35  ;;  %v4129_v43 = vld [vmem:[#allocation3 + $0xfc] sm:$0xf0]  ;;  %v5045_v52 = vld [vmem:[%s6623_s1 + $0x1d8] sm:$0xff] }
  0x4f   : > { %v3996_v41 = vld [vmem:[%s5426_s17 + $0xc0] ss:$2 sm:$0xff]  ;;  %435 = vst [vmem:[#allocation3 + $0xe8] sm:$0xf] %v427_v30  ;;  %v5053_v53 = vld [vmem:[%s6623_s1 + $0x218] sm:$0xff]  ;;  %v5052_v60 = vld [vmem:[%s6623_s1 + $0x210] sm:$0xff] }
  0x50   : > { %1463 = vmatpush.bf16.msrb.mxu3 %v5010_v44  ;;  %1492 = vmatpush.bf16.msrb.mxu0 %v5018_v45  ;;  %v4977_v42 = vld [vmem:[#allocation3 + $0xdc] sm:$0xf]  ;;  %v4135_v44 = vld [vmem:[#allocation3 + $0xe0] sm:$0xf]  ;;  %v4960_v45 = vld [vmem:[#allocation3 + $0x54] sm:$0xf] }
  0x51   : > { %v4065_v46 = vld [vmem:[#allocation3 + $0x74] sm:$0xf0]  ;;  %436 = vst [vmem:[#allocation3 + $0x10c] sm:$0xf] %v428_v32  ;;  %v4982_v51 = vld [vmem:[#allocation3 + $0x100] sm:$0xf0]  ;;  %v4132_v56 = vor.u32 %v4977_v42, %v4129_v43 }
  0x52   : > { %1521 = vmatpush.bf16.msrb.mxu1 %v5026_v20  ;;  %1550 = vmatpush.bf16.msrb.mxu2 %v5034_v21  ;;  %v4071_v48 = vld [vmem:[#allocation3 + $0x58] sm:$0xf]  ;;  %463 = vst [vmem:[#allocation3 + $0x5c] sm:$0xf] %v455_v38  ;;  %v4068_v54 = vor.u32 %v4960_v45, %v4065_v46  ;;  %v4136_v57 = vor.u32 %v4982_v51, %v4135_v44  ;;  %v5043_v61 = vld [vmem:[%s6623_s1 + $0x1c8] sm:$0xff] }
  0x53   : > { %1464 = vmatmul.bf16.vlgmr.msrb.gmra.mxu3 %v4032_v14  ;;  %1493 = vmatmul.bf16.vlgmr.msrb.gmra.mxu0 %v4036_v15  ;;  %464 = vst [vmem:[#allocation3 + $0x80] sm:$0xf] %v456_v40  ;;  %v5051_v62 = vld [vmem:[%s6623_s1 + $0x208] sm:$0xff]  ;;  %v5042_v0 = vld [vmem:[%s6623_s1 + $0x1c0] sm:$0xff]  ;;  %v3997_v3 = vld [vmem:[%s5426_s17 + $0xf0] ss:$2 sm:$0xff] }
  0x54   : > { %1572 = vmatpush.bf16.msra.mxu3 %v5049_v49  ;;  %1601 = vmatpush.bf16.msra.mxu0 %v5057_v50  ;;  %v4965_v49 = vld [vmem:[#allocation3 + $0x78] sm:$0xf0]  ;;  %v488_v50 = vpack.c.bf16 %v3996_v41, %v3996_v41  ;;  %495 = vst [vmem:[#allocation3 + $0x60] sm:$0xf] %v487_v47  ;;  %v3990_v1 = vld [vmem:[%s5426_s17 + $0x10a] ss:$2 sm:$0xff]  ;;  %v489_v6 = vpack.c.bf16 %v3997_v3, %v3997_v3 }
  0x55   : > { %1416 = vmatmul.bf16.gmra.mxu1 %v4096_v16  ;;  %1445 = vmatmul.bf16.gmra.mxu2 %v4100_v17  ;;  %v4072_v55 = vor.u32 %v4965_v49, %v4071_v48  ;;  %v3989_v63 = vld [vmem:[%s5426_s17 + $0xda] ss:$2 sm:$0xff]  ;;  %v458_v4 = vpack.c.bf16 %v3990_v1, %v3990_v1  ;;  %v4001_v7 = vld [vmem:[%s5426_s17 + $0x31] ss:$2 sm:$0xff]  ;;  %v4002_v8 = vld [vmem:[%s5426_s17 + $0x61] ss:$2 sm:$0xff] }
  0x56   : > { %496 = vst [vmem:[#allocation3 + $0x84] sm:$0xf] %v488_v50  ;;  %v457_v2 = vpack.c.bf16 %v3989_v63, %v3989_v63  ;;  %v3998_v5 = vld [vmem:[%s5426_s17 + $0x120] ss:$2 sm:$0xff]  ;;  %v517_v10 = vpack.c.bf16 %v4001_v7, %v4001_v7  ;;  %v518_v17 = vpack.c.bf16 %v4002_v8, %v4002_v8  ;;  %v4952_v21 = vld [vmem:[#allocation3 + $0x14] sm:$0xf] }
  0x57   : > { %v490_v9 = vpack.c.bf16 %v3998_v5, %v3998_v5  ;;  %v4009_v11 = vld [vmem:[%s5426_s17 + $0x32] ss:$2 sm:$0xff]  ;;  %v4010_v12 = vld [vmem:[%s5426_s17 + $0x62] ss:$2 sm:$0xff]  ;;  %466 = vst [vmem:[#allocation3 + $0xc8] sm:$0xf] %v458_v4 }
  0x58   : > { %1573 = vmatpush.bf16.msra.mxu3 %v5048_v18  ;;  %1602 = vmatpush.bf16.msra.mxu0 %v5056_v19  ;;  %465 = vst [vmem:[#allocation3 + $0xa4] sm:$0xf] %v457_v2  ;;  %v4969_v14 = vld [vmem:[#allocation3 + $0x9c] sm:$0xf]  ;;  %v4101_v15 = vld [vmem:[#allocation3 + $0xbc] sm:$0xf0]  ;;  %v549_v20 = vpack.c.bf16 %v4009_v11, %v4009_v11 }
  0x59   : > { %v5050_v16 = vld [vmem:[%s6623_s1 + $0x200] sm:$0xff]  ;;  %v4107_v18 = vld [vmem:[#allocation3 + $0xa0] sm:$0xf]  ;;  %v4974_v19 = vld [vmem:[#allocation3 + $0xc0] sm:$0xf0]  ;;  %v4104_v26 = vor.u32 %v4969_v14, %v4101_v15 }
  0x5a   : > { %497 = vst [vmem:[#allocation3 + $0xa8] sm:$0xf] %v489_v6  ;;  %v4043_v24 = vld [vmem:[#allocation3 + $0x18] sm:$0xf]  ;;  %v4957_v25 = vld [vmem:[#allocation3 + $0x38] sm:$0xf0]  ;;  %v4108_v27 = vor.u32 %v4974_v19, %v4107_v18 }
  0x5b   : > { %498 = vst [vmem:[#allocation3 + $0xcc] sm:$0xf] %v490_v9  ;;  %v4044_v29 = vor.u32 %v4957_v25, %v4043_v24  ;;  %v3991_v30 = vld [vmem:[%s5426_s17 + $0x13a] ss:$2 sm:$0xff]  ;;  %v3992_v32 = vld [vmem:[%s5426_s17 + $0x16a] ss:$2 sm:$0xff] }
  0x5c   : > { %1574 = vmatpush.bf16.msra.mxu3 %v5047_v22  ;;  %1603 = vmatpush.bf16.msra.mxu0 %v5055_v23  ;;  %v4037_v22 = vld [vmem:[#allocation3 + $0x34] sm:$0xf0]  ;;  %v550_v23 = vpack.c.bf16 %v4010_v12, %v4010_v12  ;;  %525 = vst [vmem:[#allocation3 + $0x1c] sm:$0xf] %v517_v10  ;;  %v459_v33 = vpack.c.bf16 %v3991_v30, %v3991_v30  ;;  %v4003_v39 = vld [vmem:[%s5426_s17 + $0x91] ss:$2 sm:$0xff] }
  0x5d   : > { %526 = vst [vmem:[#allocation3 + $0x40] sm:$0xf] %v518_v17  ;;  %v4040_v28 = vor.u32 %v4952_v21, %v4037_v22  ;;  %v460_v35 = vpack.c.bf16 %v3992_v32, %v3992_v32  ;;  %v4004_v41 = vld [vmem:[%s5426_s17 + $0xc1] ss:$2 sm:$0xff]  ;;  %v519_v42 = vpack.c.bf16 %v4003_v39, %v4003_v39  ;;  %v4011_v43 = vld [vmem:[%s5426_s17 + $0x92] ss:$2 sm:$0xff] }
  0x5e   : > { %557 = vst [vmem:[#allocation3 + $0x20] sm:$0xf] %v549_v20  ;;  %v4012_v44 = vld [vmem:[%s5426_s17 + $0xc2] ss:$2 sm:$0xff]  ;;  %v520_v47 = vpack.c.bf16 %v4004_v41, %v4004_v41  ;;  %v551_v48 = vpack.c.bf16 %v4011_v43, %v4011_v43  ;;  %v4983_v50 = vld [vmem:[#allocation3 + $0x108] sm:$0xf0] }
  0x5f   : > { %558 = vst [vmem:[#allocation3 + $0x44] sm:$0xf] %v550_v23  ;;  %v4978_v45 = vld [vmem:[#allocation3 + $0xe4] sm:$0xf]  ;;  %v4137_v46 = vld [vmem:[#allocation3 + $0x104] sm:$0xf0]  ;;  %v552_v51 = vpack.c.bf16 %v4012_v44, %v4012_v44 }
  0x60   : > { %1575 = vmatpush.bf16.msra.mxu3 %v5046_v36  ;;  %1604 = vmatpush.bf16.msra.mxu0 %v5054_v37  ;;  %467 = vst [vmem:[#allocation3 + $0xec] sm:$0xf] %v459_v33  ;;  %v3999_v36 = vld [vmem:[%s5426_s17 + $0x150] ss:$2 sm:$0xff]  ;;  %v4000_v37 = vld [vmem:[%s5426_s17 + $0x180] ss:$2 sm:$0xff] }
  0x61   : > { %468 = vst [vmem:[#allocation3 + $0x110] sm:$0xf] %v460_v35  ;;  %v491_v38 = vpack.c.bf16 %v3999_v36, %v3999_v36  ;;  %v492_v40 = vpack.c.bf16 %v4000_v37, %v4000_v37  ;;  %v4143_v49 = vld [vmem:[#allocation3 + $0xe8] sm:$0xf]  ;;  %v4006_v2 = vld [vmem:[%s5426_s17 + $0x121] ss:$2 sm:$0xff] }
  0x62   : > { %527 = vst [vmem:[#allocation3 + $0x64] sm:$0xf] %v519_v42  ;;  %v4005_v1 = vld [vmem:[%s5426_s17 + $0xf1] ss:$2 sm:$0xff]  ;;  %v522_v4 = vpack.c.bf16 %v4006_v2, %v4006_v2  ;;  %v4013_v5 = vld [vmem:[%s5426_s17 + $0xf2] ss:$2 sm:$0xff] }
  0x63   : > { %1469 = vmatmul.bf16.gmra.mxu3 %v4068_v54  ;;  %1498 = vmatmul.bf16.gmra.mxu0 %v4072_v55  ;;  %499 = vst [vmem:[#allocation3 + $0xf0] sm:$0xf] %v491_v38  ;;  %v4079_v54 = vld [vmem:[#allocation3 + $0x60] sm:$0xf]  ;;  %v4966_v55 = vld [vmem:[#allocation3 + $0x80] sm:$0xf0]  ;;  %v521_v3 = vpack.c.bf16 %v4005_v1, %v4005_v1  ;;  %v553_v7 = vpack.c.bf16 %v4013_v5, %v4013_v5 }
  0x64   : > { %1576 = vmatpush.bf16.msra.mxu3 %v5045_v52  ;;  %1605 = vmatpush.bf16.msra.mxu0 %v5053_v53  ;;  %500 = vst [vmem:[#allocation3 + $0x114] sm:$0xf] %v492_v40  ;;  %v4961_v52 = vld [vmem:[#allocation3 + $0x5c] sm:$0xf]  ;;  %v4073_v53 = vld [vmem:[#allocation3 + $0x7c] sm:$0xf0] }
  0x65   : > { %1421 = vmatmul.bf16.gmra.mxu1 %v4132_v56  ;;  %1450 = vmatmul.bf16.gmra.mxu2 %v4136_v57  ;;  %528 = vst [vmem:[#allocation3 + $0x88] sm:$0xf] %v520_v47  ;;  %v4140_v56 = vor.u32 %v4978_v45, %v4137_v46  ;;  %v4144_v57 = vor.u32 %v4983_v50, %v4143_v49  ;;  %v4014_v6 = vld [vmem:[%s5426_s17 + $0x122] ss:$2 sm:$0xff]  ;;  %v4975_v19 = vld [vmem:[#allocation3 + $0xc8] sm:$0xf0] }
  0x66   : > { %559 = vst [vmem:[#allocation3 + $0x68] sm:$0xf] %v551_v48  ;;  %v554_v8 = vpack.c.bf16 %v4014_v6, %v4014_v6  ;;  %v4970_v11 = vld [vmem:[#allocation3 + $0xa4] sm:$0xf]  ;;  %v4109_v12 = vld [vmem:[#allocation3 + $0xc4] sm:$0xf0] }
  0x67   : > { %560 = vst [vmem:[#allocation3 + $0x8c] sm:$0xf] %v552_v51  ;;  %v4115_v14 = vld [vmem:[#allocation3 + $0xa8] sm:$0xf]  ;;  %v4953_v15 = vld [vmem:[#allocation3 + $0x1c] sm:$0xf]  ;;  %v4112_v25 = vor.u32 %v4970_v11, %v4109_v12 }
  0x68   : > { %1577 = vmatpush.bf16.msra.mxu3 %v5044_v58  ;;  %1606 = vmatpush.bf16.msra.mxu0 %v5052_v60  ;;  %v4076_v58 = vor.u32 %v4961_v52, %v4073_v53  ;;  %v4080_v60 = vor.u32 %v4966_v55, %v4079_v54  ;;  %529 = vst [vmem:[#allocation3 + $0xac] sm:$0xf] %v521_v3  ;;  %v4051_v17 = vld [vmem:[#allocation3 + $0x20] sm:$0xf]  ;;  %v4958_v18 = vld [vmem:[#allocation3 + $0x40] sm:$0xf0] }
  0x69   : > { %530 = vst [vmem:[#allocation3 + $0xd0] sm:$0xf] %v522_v4  ;;  %v4052_v24 = vor.u32 %v4958_v18, %v4051_v17  ;;  %v4007_v30 = vld [vmem:[%s5426_s17 + $0x151] ss:$2 sm:$0xff]  ;;  %v4008_v32 = vld [vmem:[%s5426_s17 + $0x181] ss:$2 sm:$0xff] }
  0x6a   : > { %561 = vst [vmem:[#allocation3 + $0xb0] sm:$0xf] %v553_v7  ;;  %v4015_v33 = vld [vmem:[%s5426_s17 + $0x152] ss:$2 sm:$0xff]  ;;  %v523_v35 = vpack.c.bf16 %v4007_v30, %v4007_v30  ;;  %v524_v36 = vpack.c.bf16 %v4008_v32, %v4008_v32  ;;  %v4016_v37 = vld [vmem:[%s5426_s17 + $0x182] ss:$2 sm:$0xff] }
  0x6b   : > { %562 = vst [vmem:[#allocation3 + $0xd4] sm:$0xf] %v554_v8  ;;  %v555_v38 = vpack.c.bf16 %v4015_v33, %v4015_v33  ;;  %v556_v39 = vpack.c.bf16 %v4016_v37, %v4016_v37  ;;  %v4979_v40 = vld [vmem:[#allocation3 + $0xec] sm:$0xf]  ;;  %v4962_v41 = vld [vmem:[#allocation3 + $0x64] sm:$0xf] }
  0x6c   : > { %1578 = vmatpush.bf16.msra.mxu3 %v5043_v61  ;;  %1607 = vmatpush.bf16.msra.mxu0 %v5051_v62  ;;  %v1652_v61 = vld [vmem:[#allocation2 + $0xb8] sm:$0x8]  ;;  %v2337_v62 = vld [vmem:[#allocation2 + $0xbc] sm:$0xf]  ;;  %531 = vst [vmem:[#allocation3 + $0xf4] sm:$0xf] %v523_v35 }
  0x6d   : > { %v1653_v63 = vsel %vm5439_vm2, 0, %v1652_v61  ;;  %v2438_v10 = vshll.u32 %v2337_v62, 16  ;;  %v4081_v42 = vld [vmem:[#allocation3 + $0x84] sm:$0xf0]  ;;  %532 = vst [vmem:[#allocation3 + $0x118] sm:$0xf] %v524_v36 }
  0x6e   : > { %1654 = vst [vmem:[#allocation2 + $0xb8] sm:$0x8] %v1653_v63  ;;  %v4087_v43 = vld [vmem:[#allocation3 + $0x68] sm:$0xf]  ;;  %v4967_v44 = vld [vmem:[#allocation3 + $0x88] sm:$0xf0]  ;;  %v4084_v47 = vor.u32 %v4962_v41, %v4081_v42 }
  0x6f   : > { %563 = vst [vmem:[#allocation3 + $0xf8] sm:$0xf] %v555_v38  ;;  %v4145_v45 = vld [vmem:[#allocation3 + $0x10c] sm:$0xf0]  ;;  %v4088_v48 = vor.u32 %v4967_v44, %v4087_v43  ;;  %v2465_v52 = vld [vmem:[#allocation2 + $0xbc] sm:$0xf] }
  0x70   : > { %1579 = vmatpush.bf16.msra.mxu3 %v5042_v0  ;;  %1608 = vmatpush.bf16.msra.mxu0 %v5050_v16  ;;  %v2435_v0 = vshrl.u32 %v2337_v62, 16  ;;  %v4045_v16 = vld [vmem:[#allocation3 + $0x3c] sm:$0xf0]  ;;  %v4151_v46 = vld [vmem:[#allocation3 + $0xf0] sm:$0xf]  ;;  %v4148_v49 = vor.u32 %v4979_v40, %v4145_v45  ;;  %v5108_v43 = vld [vmem:[%s6625_s3 + $0x70] sm:$0xff] }
  0x71   : > { %v4048_v23 = vor.u32 %v4953_v15, %v4045_v16  ;;  %564 = vst [vmem:[#allocation3 + $0x11c] sm:$0xf] %v556_v39  ;;  %v1656_v53 = vld [vmem:[#allocation2 + $0xc0] sm:$0x1]  ;;  %v2488_v55 = vld [vmem:[#allocation2 + $0xbc] sm:$0xf] }
  0x72   : > { %v2437_v9 = vrot.slane %v2435_v0, 7  ;;  %v1657_v54 = vsel %vm5462_vm5, 0, %v1656_v53  ;;  %v4971_v62 = vld [vmem:[#allocation3 + $0xac] sm:$0xf]  ;;  %v4117_v63 = vld [vmem:[#allocation3 + $0xcc] sm:$0xf0] }
  0x73   : > { %1474 = vmatmul.bf16.gmra.mxu3 %v4104_v26  ;;  %1503 = vmatmul.bf16.gmra.mxu0 %v4108_v27  ;;  %v4116_v26 = vor.u32 %v4975_v19, %v4115_v14  ;;  %1658 = vst [vmem:[#allocation2 + $0xc0] sm:$0x1] %v1657_v54  ;;  %v4123_v0 = vld [vmem:[#allocation3 + $0xb0] sm:$0xf]  ;;  %v4976_v1 = vld [vmem:[#allocation3 + $0xd0] sm:$0xf0]  ;;  %v4120_v5 = vor.u32 %v4971_v62, %v4117_v63 }
  0x74   : > { %v2440_v22 = vor.u32 %v2438_v10, %v2437_v9  ;;  %v4153_v51 = vld [vmem:[#allocation3 + $0x114] sm:$0xf0]  ;;  %v4124_v6 = vor.u32 %v4976_v1, %v4123_v0  ;;  %v4980_v17 = vld [vmem:[#allocation3 + $0xf4] sm:$0xf] }
  0x75   : > { %1522 = vmatmul.bf16.vlgmr.msrb.gmra.mxu1 %v4040_v28  ;;  %1551 = vmatmul.bf16.vlgmr.msrb.gmra.mxu2 %v4044_v29  ;;  %v2336_v20 = vld [vmem:[#allocation2 + $0xb8] sm:$0x8]  ;;  %v4984_v28 = vld [vmem:[#allocation3 + $0x110] sm:$0xf0]  ;;  %2473 = vst [vmem:[#allocation3 + $0x118] sm:$0xf] %v2465_v52 }
  0x76   : > { %v2430_v21 = vshrl.u32 %v2336_v20, 16  ;;  %v4152_v50 = vor.u32 %v4984_v28, %v4151_v46  ;;  %v4159_v18 = vld [vmem:[#allocation3 + $0xf8] sm:$0xf]  ;;  %v5109_v37 = vld [vmem:[%s6625_s3 + $0x78] sm:$0xff] }
  0x77   : > { %3451 = vmatpush.bf16.msra.mxu2 %v5109_v37  ;;  %v5101_v42 = vld [vmem:[%s6625_s3 + $0x38] sm:$0xff]  ;;  %v1684_v1 = vld [vmem:[#allocation2 + $0x20] sm:$0x1] }
  0x78   : > { %v4472_v27 = vrot.slane %v2430_v21, 11  ;;  %v4985_v10 = vld [vmem:[#allocation3 + $0x118] sm:$0xf0]  ;;  %v4156_v21 = vor.u32 %v4980_v17, %v4153_v51  ;;  %3422 = vmatpush.bf16.msra.mxu1 %v5101_v42  ;;  %v5117_v62 = vld [vmem:[%s6625_s3 + $0xb8] sm:$0xff]  ;;  %v1663_v42 = vld [vmem:[#allocation2 + $0x2c] sm:$0x8] }
  0x79   : > { %3480 = vmatpush.bf16.msrb.mxu3 %v5117_v62  ;;  %v5097_v37 = vld [vmem:[%s6625_s3 + $0x18] sm:$0xff] }
  0x7a   : > { %v2441_v29 = vsel %vm5493_vm7, %v4472_v27, %v2440_v22  ;;  %v2489_v2 = vld [vmem:[#allocation2 + $0xc0] sm:$0x1]  ;;  %v4160_v22 = vor.u32 %v4985_v10, %v4159_v18  ;;  %v5125_v10 = vld [vmem:[%s6625_s3 + $0xf8] sm:$0xff] }
  0x7b   : > { %2457 = vst [vmem:[#allocation3 + $0x114] sm:$0xf] %v2441_v29  ;;  %v2598_v4 = vshll.u32 %v2489_v2, 16  ;;  %3452 = vmatpush.bf16.msra.mxu2 %v5108_v43  ;;  %v1685_v2 = vsel %vm5462_vm5, 0, %v1684_v1  ;;  %3509 = vmatpush.bf16.msrb.mxu0 %v5125_v10 }
  0x7c   : > { %1686 = vst [vmem:[#allocation2 + $0x20] sm:$0x1] %v1685_v2 }
  0x7d   : > { %v2600_v7 = vrot.slane %v2598_v4, 5 }
  0x83   : > { %1479 = vmatmul.bf16.gmra.mxu3 %v4140_v56  ;;  %1508 = vmatmul.bf16.gmra.mxu0 %v4144_v57  ;;  %v2589_v56 = vshrl.u32 %v2488_v55, 16  ;;  %v2592_v57 = vshll.u32 %v2488_v55, 16  ;;  %v5099_v55 = vld [vmem:[%s6625_s3 + $0x28] sm:$0xff] }
  0x85   : > { %1527 = vmatmul.bf16.gmra.mxu1 %v4076_v58  ;;  %1556 = vmatmul.bf16.gmra.mxu2 %v4080_v60  ;;  %v2591_v58 = vrot.slane %v2589_v56, 4  ;;  %v2594_v60 = vrot.slane %v2592_v57, 5  ;;  %v5106_v56 = vld [vmem:[%s6625_s3 + $0x60] sm:$0xff] }
  0x87   : > { %v2595_v61 = vor.u32 %v2594_v60, %v2591_v58  ;;  %v5098_v60 = vld [vmem:[%s6625_s3 + $0x20] sm:$0xff] }
  0x89   : > { %v2596_v3 = vrot.slane %v2595_v61, 4  ;;  %v5105_v61 = vld [vmem:[%s6625_s3 + $0x58] sm:$0xff] }
  0x8b   : > { %v2601_v11 = vsel %vm5530_vm10, %v2596_v3, %v2600_v7 }
  0x8c   : > { %2617 = vst [vmem:[#allocation3 + $0x11c] sm:$0xf] %v2601_v11 }
  0x93   : > { %1580 = vmatmul.bf16.vlgmr.msra.gmra.mxu3 %v4048_v23  ;;  %1609 = vmatmul.bf16.vlgmr.msra.gmra.mxu0 %v4052_v24 }
  0x95   : > { %1532 = vmatmul.bf16.gmra.mxu1 %v4112_v25  ;;  %1561 = vmatmul.bf16.gmra.mxu2 %v4116_v26  ;;  %v5762_v25 = vld [vmem:[%s6624_s2] ss:$0 sm:$0xff] }
  0xa3   : > { %1585 = vmatmul.bf16.gmra.mxu3 %v4084_v47  ;;  %1614 = vmatmul.bf16.gmra.mxu0 %v4088_v48 }
  0xa5   : > { %1537 = vmatmul.bf16.gmra.mxu1 %v4148_v49  ;;  %1566 = vmatmul.bf16.gmra.mxu2 %v4152_v50  ;;  %v5100_v49 = vld [vmem:[%s6625_s3 + $0x30] sm:$0xff]  ;;  %v5107_v50 = vld [vmem:[%s6625_s3 + $0x68] sm:$0xff] }
  0xa6   : > { %3423 = vmatpush.bf16.msra.mxu1 %v5100_v49  ;;  %3453 = vmatpush.bf16.msra.mxu2 %v5107_v50  ;;  %v1687_v49 = vld [vmem:[#allocation2 + $0x34] sm:$0x1] }
  0xa7   : > { %v5124_v50 = vld [vmem:[%s6625_s3 + $0xf0] sm:$0xff] }
  0xa8   : > { %3510 = vmatpush.bf16.msrb.mxu0 %v5124_v50  ;;  %v1690_v50 = vld [vmem:[#allocation2 + $0x48] sm:$0x1] }
  0xaa   : > { %3424 = vmatpush.bf16.msra.mxu1 %v5099_v55  ;;  %3454 = vmatpush.bf16.msra.mxu2 %v5106_v56  ;;  %v5114_v56 = vld [vmem:[%s6625_s3 + $0xa0] sm:$0xff] }
  0xae   : > { %3425 = vmatpush.bf16.msra.mxu1 %v5098_v60  ;;  %3455 = vmatpush.bf16.msra.mxu2 %v5105_v61 }
  0xb0   : > { %v5737_v8 = vpop.f32.mrf.mxu0 }
  0xb1   : > { %v1379_v11 = vadd.f32 %v5762_v25, %v5737_v8  ;;  %v5115_v8 = vld [vmem:[%s6625_s3 + $0xa8] sm:$0xff] }
  0xb2   : > { %v5739_v9 = vpop.f32.mrf.mxu1  ;;  %3426 = vmatpush.bf16.msra.mxu1 %v5097_v37  ;;  %v1666_v37 = vld [vmem:[#allocation2 + $0x40] sm:$0x8] }
  0xb3   : > { %1590 = vmatmul.bf16.gmra.mxu3 %v4120_v5  ;;  %1619 = vmatmul.bf16.gmra.mxu0 %v4124_v6  ;;  %v5116_v5 = vld [vmem:[%s6625_s3 + $0xb0] sm:$0xff]  ;;  %v1408_v18 = vadd.f32 %v5739_v9, %v1379_v11 }
  0xb4   : > { %3481 = vmatpush.bf16.msrb.mxu3 %v5116_v5 }
  0xb6   : > { %v5743_v12 = vpop.f32.mrf.mxu3 }
  0xb8   : > { %v5745_v14 = vpop.f32.mrf.mxu2  ;;  %v5747_v15 = vpop.f32.mrf.mxu0  ;;  %3482 = vmatpush.bf16.msrb.mxu3 %v5115_v8 }
  0xb9   : > { %v1437_v9 = vadd.f32 %v5745_v14, %v1408_v18  ;;  %v1688_v14 = vsel %vm5462_vm5, 0, %v1687_v49 }
  0xba   : > { %v5749_v16 = vpop.f32.mrf.mxu1  ;;  %1689 = vst [vmem:[#allocation2 + $0x34] sm:$0x1] %v1688_v14 }
  0xbc   : > { %3483 = vmatpush.bf16.msrb.mxu3 %v5114_v56 }
  0xbe   : > { %v5751_v19 = vpop.f32.mrf.mxu3 }
  0xc0   : > { %v5753_v20 = vpop.f32.mrf.mxu2  ;;  %v5755_v23 = vpop.f32.mrf.mxu0 }
  0xc1   : > { %v1384_v5 = vadd.f32 %v5762_v25, %v5755_v23  ;;  %v5122_v23 = vld [vmem:[%s6625_s3 + $0xe0] sm:$0xff] }
  0xc2   : > { %v5757_v24 = vpop.f32.mrf.mxu1 }
  0xc3   : > { %1595 = vmatmul.bf16.gmra.mxu3 %v4156_v21  ;;  %1624 = vmatmul.bf16.gmra.mxu0 %v4160_v22  ;;  %v5104_v22 = vld [vmem:[%s6625_s3 + $0x50] sm:$0xff] }
  0xc4   : > { %3456 = vmatpush.bf16.msra.mxu2 %v5104_v22 }
  0xc6   : > { %v1393_v26 = vpop.f32.mrf.mxu3 }
  0xc7   : > { %v1394_v27 = vadd.f32 %v5762_v25, %v1393_v26 }
  0xc8   : > { %v5765_v28 = vpop.f32.mrf.mxu2  ;;  %v5767_v29 = vpop.f32.mrf.mxu0 }
  0xca   : > { %v5769_v30 = vpop.f32.mrf.mxu1 }
  0xce   : > { %v5771_v32 = vpop.f32.mrf.mxu3 }
  0xd0   : > { %v5773_v33 = vpop.f32.mrf.mxu2  ;;  %v5775_v35 = vpop.f32.mrf.mxu0 }
  0xd2   : > { %v5777_v36 = vpop.f32.mrf.mxu1 }
  0xd6   : > { %v5782_v38 = vpop.f32.mrf.mxu3 }
  0xd8   : > { %v5784_v39 = vpop.f32.mrf.mxu2  ;;  %v5786_v40 = vpop.f32.mrf.mxu0 }
  0xda   : > { %v5788_v41 = vpop.f32.mrf.mxu1 }
  0xde   : > { %v5796_v44 = vpop.f32.mrf.mxu3 }
  0xe0   : > { %v5798_v45 = vpop.f32.mrf.mxu2  ;;  %v5800_v46 = vpop.f32.mrf.mxu0 }
  0xe2   : > { %v1422_v47 = vpop.f32.mrf.mxu1 }
  0xe3   : > { %v1423_v48 = vadd.f32 %v1422_v47, %v1394_v27 }
  0xe6   : > { %v5808_v51 = vpop.f32.mrf.mxu3 }
  0xe8   : > { %v1451_v52 = vpop.f32.mrf.mxu2  ;;  %v5810_v54 = vpop.f32.mrf.mxu0 }
  0xe9   : > { %v1452_v53 = vadd.f32 %v1451_v52, %v1423_v48  ;;  %v1664_v48 = vsel %vm5439_vm2, 0, %v1663_v42  ;;  %v1381_v52 = vadd.f32 %v5762_v25, %v5747_v15  ;;  %v5103_v15 = vld [vmem:[%s6625_s3 + $0x48] sm:$0xff] }
  0xea   : > { %v5839_v4 = vpop.f32.mrf.mxu1  ;;  %1665 = vst [vmem:[#allocation2 + $0x2c] sm:$0x8] %v1664_v48  ;;  %3457 = vmatpush.bf16.msra.mxu2 %v5103_v15 }
  0xeb   : > { %v1410_v60 = vadd.f32 %v5749_v16, %v1381_v52  ;;  %v5096_v16 = vld [vmem:[%s6625_s3 + $0x10] sm:$0xff] }
  0xec   : > { %3427 = vmatpush.bf16.msra.mxu1 %v5096_v16 }
  0xed   : > { %v1439_v62 = vadd.f32 %v5753_v20, %v1410_v60 }
  0xee   : > { %v5818_v57 = vpop.f32.mrf.mxu3 }
  0xef   : > { %v1468_v10 = vadd.f32 %v5796_v44, %v1439_v62  ;;  %v1413_v44 = vadd.f32 %v5757_v24, %v1384_v5  ;;  %v1691_v24 = vsel %vm5462_vm5, 0, %v1690_v50  ;;  %v1386_v62 = vadd.f32 %v5762_v25, %v5767_v29  ;;  %v5111_v29 = vld [vmem:[%s6625_s3 + $0x88] sm:$0xff] }
  0xf0   : > { %v5820_v58 = vpop.f32.mrf.mxu0  ;;  %v5844_v6 = vpop.f32.mrf.mxu2  ;;  %1692 = vst [vmem:[#allocation2 + $0x48] sm:$0x1] %v1691_v24 }
  0xf1   : > { %v1497_v42 = vadd.f32 %v5786_v40, %v1468_v10  ;;  %v1442_v52 = vadd.f32 %v5765_v28, %v1413_v44  ;;  %v5112_v28 = vld [vmem:[%s6625_s3 + $0x90] sm:$0xff]  ;;  %v1693_v10 = vld [vmem:[#allocation2 + $0x5c] sm:$0x1] }
  0xf2   : > { %v1523_v26 = vpop.f32.mrf.mxu1 }
  0xf3   : > { %v1471_v56 = vadd.f32 %v5808_v51, %v1442_v52  ;;  %v5121_v51 = vld [vmem:[%s6625_s3 + $0xd8] sm:$0xff] }
  0xf6   : > { %v5831_v63 = vpop.f32.mrf.mxu3 }
  0xf8   : > { %v5833_v0 = vpop.f32.mrf.mxu0  ;;  %v1552_v43 = vpop.f32.mrf.mxu2 }
  0xfa   : > { %v1525_v2 = vpop.f32.mrf.mxu1 }
  0xfb   : > { %v1526_v48 = vadd.f32 %v1525_v2, %v1497_v42  ;;  %v1500_v2 = vadd.f32 %v5800_v46, %v1471_v56 }
  0xfe   : > { %v5837_v3 = vpop.f32.mrf.mxu3 }
 0x100   : > { %v1509_v7 = vpop.f32.mrf.mxu0  ;;  %v1554_v20 = vpop.f32.mrf.mxu2 }
 0x101   : > { %v1555_v40 = vadd.f32 %v1554_v20, %v1526_v48 }
 0x106   : > { %v1480_v17 = vpop.f32.mrf.mxu3 }
 0x107   : > { %v1481_v21 = vadd.f32 %v1480_v17, %v1452_v53  ;;  %v1466_v53 = vadd.f32 %v5782_v38, %v1437_v9  ;;  %v5123_v38 = vld [vmem:[%s6625_s3 + $0xe8] sm:$0xff]  ;;  %v1667_v9 = vsel %vm5439_vm2, 0, %v1666_v37 }
 0x108   : > { %v5864_v47 = vpop.f32.mrf.mxu0  ;;  %3511 = vmatpush.bf16.msrb.mxu0 %v5123_v38  ;;  %1668 = vst [vmem:[#allocation2 + $0x40] sm:$0x8] %v1667_v9 }
 0x109   : > { %v5855_v27 = vadd.f32 %v1509_v7, %v1481_v21  ;;  %v1495_v61 = vadd.f32 %v5775_v35, %v1466_v53  ;;  %v5113_v35 = vld [vmem:[%s6625_s3 + $0x98] sm:$0xff]  ;;  %v1528_v53 = vpop.f32.mrf.mxu1 }
 0x10a   : > { %v1660_v7 = vld [vmem:[#allocation2 + $0x18] sm:$0x8]  ;;  %3484 = vmatpush.bf16.msrb.mxu3 %v5113_v35  ;;  %v1415_v35 = vadd.f32 %v5769_v30, %v1386_v62  ;;  %v1389_v30 = vadd.f32 %v5762_v25, %v5743_v12 }
 0x10b   : > { %v1524_v1 = vadd.f32 %v1523_v26, %v1495_v61  ;;  %v1661_v18 = vsel %vm5439_vm2, 0, %v1660_v7  ;;  %v5102_v26 = vld [vmem:[%s6625_s3 + $0x40] sm:$0xff]  ;;  %v1557_v61 = vpop.f32.mrf.mxu2  ;;  %v1529_v7 = vadd.f32 %v1528_v53, %v1500_v2 }
 0x10c   : > { %1662 = vst [vmem:[#allocation2 + $0x18] sm:$0x8] %v1661_v18  ;;  %3512 = vmatpush.bf16.msrb.mxu0 %v5122_v23  ;;  %3458 = vmatpush.bf16.msra.mxu2 %v5102_v26  ;;  %v1444_v20 = vadd.f32 %v5773_v33, %v1415_v35  ;;  %v1694_v33 = vsel %vm5462_vm5, 0, %v1693_v10 }
 0x10d   : > { %v1553_v11 = vadd.f32 %v1552_v43, %v1524_v1  ;;  %v5095_v43 = vld [vmem:[%s6625_s3 + $0x8] sm:$0xff]  ;;  %v1558_v46 = vadd.f32 %v1557_v61, %v1529_v7  ;;  %1695 = vst [vmem:[#allocation2 + $0x5c] sm:$0x1] %v1694_v33  ;;  %v5120_v61 = vld [vmem:[%s6625_s3 + $0xd0] sm:$0xff] }
 0x10e   : > { %v5876_v55 = vpop.f32.mrf.mxu3  ;;  %3428 = vmatpush.bf16.msra.mxu1 %v5095_v43  ;;  %3485 = vmatpush.bf16.msrb.mxu3 %v5112_v28  ;;  %v1473_v37 = vadd.f32 %v5818_v57, %v1444_v20  ;;  %v5094_v57 = vld [vmem:[%s6625_s3] sm:$0xff] }
 0x110   : > { %v1610_v17 = vpop.f32.mrf.mxu0  ;;  %3513 = vmatpush.bf16.msrb.mxu0 %v5121_v51  ;;  %v1502_v2 = vadd.f32 %v5810_v54, %v1473_v37  ;;  %v2180_v54 = vld [vmem:[#allocation2 + $0x34] sm:$0x1] }
 0x111   : > { %v1530_v26 = vpop.f32.mrf.mxu1 }
 0x112   : > { %3486 = vmatpush.bf16.msrb.mxu3 %v5111_v29  ;;  %3429 = vmatpush.bf16.msra.mxu1 %v5094_v57  ;;  %v1531_v20 = vadd.f32 %v1530_v26, %v1502_v2  ;;  %v2217_v26 = vshll.u32 %v2180_v54, 16 }
 0x113   : > { %v1726_v5 = vld [vmem:[#allocation2 + $0x18] sm:$0x8]  ;;  %v1559_v43 = vpop.f32.mrf.mxu2 }
 0x114   : > { %3514 = vmatpush.bf16.msrb.mxu0 %v5120_v61 }
 0x116   : > { %v1581_v21 = vpop.f32.mrf.mxu3 }
 0x117   : > { %v1582_v22 = vadd.f32 %v1581_v21, %v1553_v11  ;;  %v1756_v11 = vshrl.u32 %v1726_v5, 16  ;;  %v2178_v21 = vld [vmem:[#allocation2 + $0x20] sm:$0x1] }
 0x118   : > { %v1612_v15 = vpop.f32.mrf.mxu0  ;;  %v2203_v50 = vshll.u32 %v2178_v21, 16 }
 0x119   : > { %v1611_v8 = vadd.f32 %v1610_v17, %v1582_v22  ;;  %v4450_v24 = vrot.slane %v1756_v11, 11 }
 0x11a   : > { %v2205_v51 = vrot.slane %v2203_v50, 5 }
 0x11b   : > { %v1630_v49 = vmax.f32 %v1611_v8, 0.0  ;;  %v1562_v33 = vpop.f32.mrf.mxu2 }
 0x11d   : > { %v1708_v14 = vpack.c.bf16 %v1630_v49, %v1630_v49 }
 0x11e   : > { %v1583_v60 = vpop.f32.mrf.mxu3 }
 0x11f   : > { %1716 = vst [vmem:[#allocation2 + $0x1c] sm:$0xf] %v1708_v14  ;;  %v1584_v38 = vadd.f32 %v1583_v60, %v1555_v40  ;;  %v1418_v40 = vadd.f32 %v5777_v36, %v1389_v30  ;;  %v2322_v60 = vld [vmem:[#allocation2 + $0x2c] sm:$0x8] }
 0x120   : > { %v1615_v52 = vpop.f32.mrf.mxu0 }
 0x121   : > { %v1613_v1 = vadd.f32 %v1612_v15, %v1584_v38  ;;  %v5110_v15 = vld [vmem:[%s6625_s3 + $0x80] sm:$0xff]  ;;  %v1447_v36 = vadd.f32 %v5784_v39, %v1418_v40 }
 0x122   : > { %3487 = vmatpush.bf16.msrb.mxu3 %v5110_v15 }
 0x123   : > { %v1631_v16 = vmax.f32 %v1613_v1, 0.0  ;;  %v5058_v1 = vld [vmem:[#allocation3 + $0x4] sm:$0xf]  ;;  %v1476_v35 = vadd.f32 %v5831_v63, %v1447_v36 }
 0x125   : > { %v1709_v23 = vpack.c.bf16 %v1631_v16, %v1631_v16  ;;  %v5119_v16 = vld [vmem:[%s6625_s3 + $0xc8] sm:$0xff]  ;;  %v1505_v63 = vadd.f32 %v5820_v58, %v1476_v35 }
 0x126   : > { %v1727_v17 = vld [vmem:[#allocation2 + $0x1c] sm:$0xf]  ;;  %v1586_v22 = vpop.f32.mrf.mxu3  ;;  %3515 = vmatpush.bf16.msrb.mxu0 %v5119_v16 }
 0x127   : > { %v1863_v18 = vld [vmem:[#allocation2 + $0x1c] sm:$0xf]  ;;  %v1761_v44 = vshrl.u32 %v1727_v17, 16  ;;  %v1587_v9 = vadd.f32 %v1586_v22, %v1558_v46  ;;  %v1764_v49 = vshll.u32 %v1727_v17, 16  ;;  %1717 = vst [vmem:[#allocation2 + $0x30] sm:$0xf] %v1709_v23  ;;  %v1560_v22 = vadd.f32 %v1559_v43, %v1531_v20 }
 0x128   : > { %1871 = vst [vmem:[#allocation3 + $0x28] sm:$0xf] %v1863_v18  ;;  %v2161_v42 = vld [vmem:[#allocation2 + $0x1c] sm:$0xf]  ;;  %v2339_v46 = vshrl.u32 %v2322_v60, 16  ;;  %v1391_v60 = vadd.f32 %v5762_v25, %v5751_v19 }
 0x129   : > { %v2177_v8 = vld [vmem:[#allocation2 + $0x1c] sm:$0xf]  ;;  %v1763_v48 = vrot.slane %v1761_v44, 7  ;;  %2169 = vst [vmem:[#allocation3 + $0x10] sm:$0xf] %v2161_v42  ;;  %v1616_v12 = vadd.f32 %v1615_v52, %v1587_v9  ;;  %v1533_v44 = vpop.f32.mrf.mxu1 }
 0x12a   : > { %v2194_v53 = vshrl.u32 %v2177_v8, 16  ;;  %v2197_v14 = vshll.u32 %v2177_v8, 16  ;;  %v1880_v39 = vld [vmem:[#allocation2 + $0x1c] sm:$0xf]  ;;  %v2475_v17 = vld [vmem:[#allocation2 + $0x34] sm:$0x1]  ;;  %v1534_v43 = vadd.f32 %v1533_v44, %v1505_v63 }
 0x12b   : > { %v1766_v56 = vor.u32 %v1764_v49, %v1763_v48  ;;  %v1632_v28 = vmax.f32 %v1616_v12, 0.0  ;;  %v1881_v23 = vld [vmem:[#allocation2 + $0x20] sm:$0x1]  ;;  %v1912_v30 = vshrl.u32 %v1880_v39, 16  ;;  %v1915_v37 = vshll.u32 %v1880_v39, 16 }
 0x12c   : > { %v2196_v38 = vrot.slane %v2194_v53, 4  ;;  %v2199_v62 = vrot.slane %v2197_v14, 5  ;;  %v2324_v9 = vld [vmem:[#allocation2 + $0x40] sm:$0x8]  ;;  %v4465_v48 = vrot.slane %v2339_v46, 11  ;;  %v2500_v49 = vshll.u32 %v2475_v17, 16  ;;  %v1617_v53 = vpop.f32.mrf.mxu0 }
 0x12d   : > { %v1767_v5 = vsel %vm5493_vm7, %v4450_v24, %v1766_v56  ;;  %v1710_v29 = vpack.c.bf16 %v1632_v28, %v1632_v28  ;;  %v1921_v52 = vshll.u32 %v1881_v23, 16  ;;  %v5958_v24 = vld [vmem:[#allocation2 + $0x1c] sm:$0xf]  ;;  %v1914_v58 = vrot.slane %v1912_v30, 4  ;;  %v5963_v19 = vld [vmem:[#allocation2 + $0x48] sm:$0x1] }
 0x12e   : > { %v2200_v7 = vor.u32 %v2199_v62, %v2196_v38  ;;  %v1588_v10 = vpop.f32.mrf.mxu3  ;;  %1855 = vst [vmem:[#allocation3 + $0x24] sm:$0xf] %v1767_v5  ;;  %v2162_v8 = vld [vmem:[#allocation2 + $0x30] sm:$0xf]  ;;  %v2352_v56 = vshrl.u32 %v2324_v9, 16  ;;  %v1563_v61 = vadd.f32 %v1562_v33, %v1534_v43  ;;  %v1917_v15 = vrot.slane %v1915_v37, 5 }
 0x12f   : > { %v4477_v11 = vld [vmem:[#allocation3 + $0x24] sm:$0xf0]  ;;  %1718 = vst [vmem:[#allocation2 + $0x44] sm:$0xf] %v1710_v29  ;;  %v1589_v50 = vadd.f32 %v1588_v10, %v1560_v22  ;;  %v2047_v28 = vshrl.u32 %v5958_v24, 16  ;;  %v2219_v10 = vrot.slane %v2217_v26, 5 }
 0x130   : > { %v4480_v18 = vor.u32 %v5058_v1, %v4477_v11  ;;  %v2201_v21 = vrot.slane %v2200_v7, 4  ;;  %2170 = vst [vmem:[#allocation3 + $0x34] sm:$0xf] %v2162_v8  ;;  %v2179_v40 = vld [vmem:[#allocation2 + $0x30] sm:$0xf]  ;;  %v2502_v11 = vrot.slane %v2500_v49, 5  ;;  %v1918_v22 = vor.u32 %v1917_v15, %v1914_v58 }
 0x131   : > { %v2208_v14 = vshrl.u32 %v2179_v40, 16  ;;  %v2211_v12 = vshll.u32 %v2179_v40, 16  ;;  %v2323_v57 = vld [vmem:[#allocation2 + $0x30] sm:$0xf]  ;;  %v5965_v20 = vrot.slane %v1921_v52, 5  ;;  %v2049_v37 = vrot.slane %v2047_v28, 7 }
 0x132   : > { %3459 = vmatmul.bf16.vlgmr.msra.gmra.mxu2 %v4480_v18  ;;  %v2206_v42 = vsel %vm5530_vm10, %v2201_v21, %v2205_v51  ;;  %v2344_v36 = vshrl.u32 %v2323_v57, 16  ;;  %v2458_v38 = vld [vmem:[#allocation2 + $0x30] sm:$0xf]  ;;  %v1618_v51 = vadd.f32 %v1617_v53, %v1589_v50  ;;  %v2347_v16 = vshll.u32 %v2323_v57, 16  ;;  %v5141_v21 = vld [vmem:[%s6625_s3 + $0x178] sm:$0xff] }
 0x133   : > { %2313 = vst [vmem:[#allocation3 + $0x14] sm:$0xf] %v2206_v42  ;;  %v2474_v62 = vld [vmem:[#allocation2 + $0x30] sm:$0xf]  ;;  %v2210_v1 = vrot.slane %v2208_v14, 4  ;;  %v2213_v2 = vrot.slane %v2211_v12, 5  ;;  %3567 = vmatpush.bf16.msrb.mxu2 %v5141_v21  ;;  %v1420_v49 = vadd.f32 %v5788_v41, %v1391_v60  ;;  %v1564_v21 = vpop.f32.mrf.mxu2 }
 0x134   : > { %2466 = vst [vmem:[#allocation3 + $0x1c] sm:$0xf] %v2458_v38  ;;  %v2346_v5 = vrot.slane %v2344_v36, 7  ;;  %v2491_v35 = vshrl.u32 %v2474_v62, 16  ;;  %v2494_v39 = vshll.u32 %v2474_v62, 16  ;;  %v5967_v18 = vrot.slane %v2352_v56, 11  ;;  %v1620_v14 = vpop.f32.mrf.mxu0 }
 0x135   : > { %v2214_v29 = vor.u32 %v2213_v2, %v2210_v1  ;;  %v2025_v23 = vld [vmem:[#allocation2 + $0x18] sm:$0x8]  ;;  %v1633_v30 = vmax.f32 %v1618_v51, 0.0  ;;  %v2514_v33 = vshll.u32 %v5963_v19, 16  ;;  %v2050_v50 = vshll.u32 %v5958_v24, 16  ;;  %v5118_v24 = vld [vmem:[%s6625_s3 + $0xc0] sm:$0xff] }
 0x136   : > { %v1591_v7 = vpop.f32.mrf.mxu3  ;;  %v2349_v54 = vor.u32 %v2347_v16, %v2346_v5  ;;  %v2493_v46 = vrot.slane %v2491_v35, 4  ;;  %v2496_v17 = vrot.slane %v2494_v39, 5  ;;  %v2325_v26 = vld [vmem:[#allocation2 + $0x44] sm:$0xf]  ;;  %v2042_v40 = vshrl.u32 %v2025_v23, 16  ;;  %3516 = vmatpush.bf16.msrb.mxu0 %v5118_v24 }
 0x137   : > { %v2215_v44 = vrot.slane %v2214_v29, 4  ;;  %v1592_v63 = vadd.f32 %v1591_v7, %v1563_v61  ;;  %v2459_v9 = vld [vmem:[#allocation2 + $0x44] sm:$0xf]  ;;  %v1449_v12 = vadd.f32 %v5798_v45, %v1420_v49  ;;  %v1919_v57 = vrot.slane %v1918_v22, 4  ;;  %v4475_v62 = vld [vmem:[#allocation3] sm:$0xf]  ;;  %v1535_v7 = vpop.f32.mrf.mxu1 }
 0x138   : > { %v2350_v42 = vsel %vm5493_vm7, %v4465_v48, %v2349_v54  ;;  %v2497_v8 = vor.u32 %v2496_v17, %v2493_v46  ;;  %v1865_v43 = vld [vmem:[#allocation2 + $0x44] sm:$0xf]  ;;  %v2357_v48 = vshrl.u32 %v2325_v26, 16  ;;  %2467 = vst [vmem:[#allocation3 + $0x40] sm:$0xf] %v2459_v9  ;;  %v1711_v61 = vpack.c.bf16 %v1633_v30, %v1633_v30  ;;  %v5133_v46 = vld [vmem:[%s6625_s3 + $0x138] sm:$0xff] }
 0x139   : > { %v2220_v52 = vsel %vm5530_vm10, %v2215_v44, %v2219_v10  ;;  %2450 = vst [vmem:[#allocation3 + $0x18] sm:$0xf] %v2350_v42  ;;  %v2163_v58 = vld [vmem:[#allocation2 + $0x44] sm:$0xf]  ;;  %v1621_v41 = vadd.f32 %v1620_v14, %v1592_v63  ;;  %v2052_v60 = vor.u32 %v2050_v50, %v2049_v37  ;;  %v2360_v38 = vshll.u32 %v2325_v26, 16  ;;  %3538 = vmatpush.bf16.msrb.mxu1 %v5133_v46 }
 0x13a   : > { %v2498_v53 = vrot.slane %v2497_v8, 4  ;;  %2314 = vst [vmem:[#allocation3 + $0x38] sm:$0xf] %v2220_v52  ;;  %v2476_v56 = vld [vmem:[#allocation2 + $0x44] sm:$0xf]  ;;  %v2359_v36 = vrot.slane %v2357_v48, 7  ;;  %v1478_v51 = vadd.f32 %v5837_v3, %v1449_v12  ;;  %v1924_v17 = vsel %vm5530_vm10, %v1919_v57, %v5965_v20 }
 0x13b   : > { %1873 = vst [vmem:[#allocation3 + $0x70] sm:$0xf] %v1865_v43  ;;  %v2505_v28 = vshrl.u32 %v2476_v56, 16  ;;  %v2508_v45 = vshll.u32 %v2476_v56, 16  ;;  %v1634_v1 = vmax.f32 %v1621_v41, 0.0  ;;  %v4457_v2 = vrot.slane %v2042_v40, 11 }
 0x13c   : > { %v2503_v15 = vsel %vm5530_vm10, %v2498_v53, %v2502_v11  ;;  %v5986_v5 = vld [vmem:[#allocation2 + $0x30] sm:$0xf]  ;;  %v2362_v35 = vor.u32 %v2360_v38, %v2359_v36  ;;  %2171 = vst [vmem:[#allocation3 + $0x58] sm:$0xf] %v2163_v58  ;;  %v5062_v3 = vld [vmem:[#allocation3 + $0x20] sm:$0xf0]  ;;  %v1507_v37 = vadd.f32 %v5833_v0, %v1478_v51  ;;  %v1396_v43 = vadd.f32 %v5762_v25, %v5771_v32 }
 0x13d   : > { %2610 = vst [vmem:[#allocation3 + $0x20] sm:$0xf] %v2503_v15  ;;  %v1882_v16 = vld [vmem:[#allocation2 + $0x30] sm:$0xf]  ;;  %v2507_v29 = vrot.slane %v2505_v28, 4  ;;  %v2510_v10 = vrot.slane %v2508_v45, 5  ;;  %v1712_v54 = vpack.c.bf16 %v1634_v1, %v1634_v1  ;;  %v4476_v30 = vor.u32 %v5062_v3, %v4475_v62  ;;  %v1622_v1 = vpop.f32.mrf.mxu0 }
 0x13e   : > { %v1696_v39 = vld [vmem:[#allocation2 + $0x70] sm:$0x1]  ;;  %1719 = vst [vmem:[#allocation2 + $0x58] sm:$0xf] %v1711_v61  ;;  %v2363_v19 = vsel %vm5493_vm7, %v5967_v18, %v2362_v35  ;;  %v2516_v44 = vrot.slane %v2514_v33, 5  ;;  %v2053_v63 = vsel %vm5493_vm7, %v4457_v2, %v2052_v60  ;;  %v1774_v20 = vshrl.u32 %v5986_v5, 16  ;;  %v1593_v50 = vpop.f32.mrf.mxu3  ;;  %v1567_v2 = vpop.f32.mrf.mxu2 }
 0x13f   : > { %v1697_v11 = vsel %vm5462_vm5, 0, %v1696_v39  ;;  %v5999_v23 = vld [vmem:[#allocation2 + $0x30] sm:$0xf]  ;;  %v2511_v22 = vor.u32 %v2510_v10, %v2507_v29  ;;  %2451 = vst [vmem:[#allocation3 + $0x3c] sm:$0xf] %v2363_v19  ;;  %v1926_v8 = vshrl.u32 %v1882_v16, 16  ;;  %3430 = vmatmul.bf16.vlgmr.msra.gmra.mxu1 %v4476_v30  ;;  %v1536_v9 = vadd.f32 %v1535_v7, %v1507_v37  ;;  %v1538_v24 = vpop.f32.mrf.mxu1 }
 0x140   : > { %1698 = vst [vmem:[#allocation2 + $0x70] sm:$0x1] %v1697_v11  ;;  %v5140_v18 = vld [vmem:[%s6625_s3 + $0x170] sm:$0xff]  ;;  %v1929_v33 = vshll.u32 %v1882_v16, 16  ;;  %v2060_v49 = vshrl.u32 %v5999_v23, 16  ;;  %v6015_v58 = vrot.slane %v1774_v20, 7  ;;  %v1425_v38 = vadd.f32 %v5839_v4, %v1396_v43 }
 0x141   : > { %1720 = vst [vmem:[#allocation2 + $0x6c] sm:$0xf] %v1712_v54  ;;  %v1864_v42 = vld [vmem:[#allocation2 + $0x30] sm:$0xf]  ;;  %v2512_v26 = vrot.slane %v2511_v22, 4  ;;  %3568 = vmatpush.bf16.msrb.mxu2 %v5140_v18  ;;  %v1565_v40 = vadd.f32 %v1564_v21, %v1536_v9  ;;  %v1777_v48 = vshll.u32 %v5986_v5, 16  ;;  %v1539_v7 = vadd.f32 %v1538_v24, %v5855_v27 }
 0x142   : > { %2018 = vst [vmem:[#allocation3 + $0x2c] sm:$0xf] %v1924_v17  ;;  %v6009_v52 = vld [vmem:[#allocation2 + $0x44] sm:$0xf]  ;;  %v6018_v14 = vrot.slane %v1926_v8, 4  ;;  %v2063_v12 = vshll.u32 %v5999_v23, 16  ;;  %v1454_v39 = vadd.f32 %v5844_v6, %v1425_v38 }
 0x143   : > { %2153 = vst [vmem:[#allocation3 + $0xc] sm:$0xf] %v2053_v63  ;;  %v2517_v0 = vsel %vm5530_vm10, %v2512_v26, %v2516_v44  ;;  %v1884_v53 = vld [vmem:[#allocation2 + $0x44] sm:$0xf]  ;;  %v6021_v57 = vrot.slane %v1929_v33, 5  ;;  %v2062_v56 = vrot.slane %v2060_v49, 7  ;;  %v1594_v36 = vadd.f32 %v1593_v50, %v1565_v40 }
 0x144   : > { %1872 = vst [vmem:[#allocation3 + $0x4c] sm:$0xf] %v1864_v42  ;;  %v1787_v61 = vshrl.u32 %v6009_v52, 16  ;;  %v1790_v41 = vshll.u32 %v6009_v52, 16  ;;  %v1940_v25 = vshrl.u32 %v1884_v53, 16  ;;  %v1943_v32 = vshll.u32 %v1884_v53, 16 }
 0x145   : > { %2611 = vst [vmem:[#allocation3 + $0x44] sm:$0xf] %v2517_v0  ;;  %v6025_v60 = vld [vmem:[#allocation2 + $0x44] sm:$0xf]  ;;  %v1866_v15 = vld [vmem:[#allocation2 + $0x58] sm:$0xf]  ;;  %v1623_v3 = vadd.f32 %v1622_v1, %v1594_v36  ;;  %v1568_v46 = vadd.f32 %v1567_v2, %v1539_v7  ;;  %v1483_v63 = vadd.f32 %v5876_v55, %v1454_v39  ;;  %v6036_v37 = vor.u32 %v2063_v12, %v2062_v56  ;;  %v1625_v2 = vpop.f32.mrf.mxu0 }
 0x146   : > { %v2181_v62 = vld [vmem:[#allocation2 + $0x44] sm:$0xf]  ;;  %v2164_v28 = vld [vmem:[#allocation2 + $0x58] sm:$0xf]  ;;  %v2479_v45 = vld [vmem:[#allocation2 + $0x5c] sm:$0x1]  ;;  %v1596_v27 = vpop.f32.mrf.mxu3  ;;  %v1779_v36 = vor.u32 %v1777_v48, %v6015_v58 }
 0x147   : > { %v2460_v51 = vld [vmem:[#allocation2 + $0x58] sm:$0xf]  ;;  %v2027_v35 = vld [vmem:[#allocation2 + $0x2c] sm:$0x8]  ;;  %v2073_v29 = vshrl.u32 %v6025_v60, 16  ;;  %v2222_v19 = vshrl.u32 %v2181_v62, 16  ;;  %v1597_v50 = vadd.f32 %v1596_v27, %v1568_v46  ;;  %v1540_v38 = vpop.f32.mrf.mxu1 }
 0x148   : > { %v2478_v16 = vld [vmem:[#allocation2 + $0x58] sm:$0xf]  ;;  %1874 = vst [vmem:[#allocation3 + $0x94] sm:$0xf] %v1866_v15  ;;  %v1728_v11 = vld [vmem:[#allocation2 + $0x2c] sm:$0x8] }
 0x149   : > { %v2519_v10 = vshrl.u32 %v2478_v16, 16  ;;  %v2522_v54 = vshll.u32 %v2478_v16, 16  ;;  %v2528_v4 = vshll.u32 %v2479_v45, 16  ;;  %2172 = vst [vmem:[#allocation3 + $0x7c] sm:$0xf] %v2164_v28  ;;  %v2225_v17 = vshll.u32 %v2181_v62, 16 }
 0x14a   : > { %2468 = vst [vmem:[#allocation3 + $0x64] sm:$0xf] %v2460_v51  ;;  %v2055_v23 = vshrl.u32 %v2027_v35, 16  ;;  %v5132_v6 = vld [vmem:[%s6625_s3 + $0x130] sm:$0xff]  ;;  %v1789_v22 = vrot.slane %v1787_v61, 7  ;;  %v2076_v44 = vshll.u32 %v6025_v60, 16  ;;  %v1512_v16 = vadd.f32 %v5864_v47, %v1483_v63 }
 0x14b   : > { %v2521_v21 = vrot.slane %v2519_v10, 4  ;;  %v2524_v30 = vrot.slane %v2522_v54, 5  ;;  %v1769_v18 = vshrl.u32 %v1728_v11, 16  ;;  %v6038_v42 = vrot.slane %v1940_v25, 4  ;;  %v6042_v8 = vld [vmem:[#allocation2 + $0x58] sm:$0xf]  ;;  %3539 = vmatpush.bf16.msrb.mxu1 %v5132_v6 }
 0x14c   : > { %v6040_v20 = vrot.slane %v1943_v32, 5  ;;  %v1730_v26 = vld [vmem:[#allocation2 + $0x40] sm:$0x8]  ;;  %v2530_v33 = vrot.slane %v2528_v4, 5  ;;  %v1635_v49 = vmax.f32 %v1623_v3, 0.0  ;;  %v6044_v0 = vrot.slane %v2073_v29, 7 }
 0x14d   : > { %v2525_v9 = vor.u32 %v2524_v30, %v2521_v21  ;;  %v6046_v43 = vrot.slane %v2222_v19, 4  ;;  %v6048_v40 = vrot.slane %v2225_v17, 5  ;;  %v1867_v55 = vld [vmem:[#allocation2 + $0x6c] sm:$0xf]  ;;  %v4483_v53 = vld [vmem:[#allocation3 + $0x8] sm:$0xf]  ;;  %v1626_v48 = vadd.f32 %v1625_v2, %v1597_v50 }
 0x14e   : > { %v4458_v12 = vrot.slane %v2055_v23, 11  ;;  %v6050_v56 = vld [vmem:[#allocation2 + $0x58] sm:$0xf]  ;;  %v1954_v61 = vshrl.u32 %v6042_v8, 16  ;;  %v2480_v25 = vld [vmem:[#allocation2 + $0x6c] sm:$0xf]  ;;  %v1713_v58 = vpack.c.bf16 %v1635_v49, %v1635_v49  ;;  %v1792_v19 = vor.u32 %v1790_v41, %v1789_v22 }
 0x14f   : > { %v2526_v24 = vrot.slane %v2525_v9, 4  ;;  %v4451_v32 = vrot.slane %v1769_v18, 11  ;;  %v1782_v15 = vshrl.u32 %v1730_v26, 16  ;;  %v6056_v62 = vld [vmem:[#allocation2 + $0x58] sm:$0xf]  ;;  %v2533_v1 = vshrl.u32 %v2480_v25, 16 }
 0x150   : > { %v2165_v28 = vld [vmem:[#allocation2 + $0x6c] sm:$0xf]  ;;  %v2481_v45 = vld [vmem:[#allocation2 + $0x70] sm:$0x1]  ;;  %1875 = vst [vmem:[#allocation3 + $0xb8] sm:$0xf] %v1867_v55  ;;  %v1541_v54 = vadd.f32 %v1540_v38, %v1512_v16  ;;  %v2066_v3 = vsel %vm5493_vm7, %v4458_v12, %v6036_v37  ;;  %v1946_v17 = vor.u32 %v6040_v20, %v6038_v42  ;;  %v1569_v37 = vpop.f32.mrf.mxu2  ;;  %v2228_v9 = vor.u32 %v6048_v40, %v6046_v43 }
 0x151   : > { %v5139_v51 = vld [vmem:[%s6625_s3 + $0x168] sm:$0xff]  ;;  %v2531_v35 = vsel %vm5530_vm10, %v2526_v24, %v2530_v33  ;;  %v5063_v5 = vld [vmem:[#allocation3 + $0x28] sm:$0xf0]  ;;  %v1957_v7 = vshll.u32 %v6042_v8, 16  ;;  %v2535_v29 = vrot.slane %v2533_v1, 4  ;;  %v2536_v10 = vshll.u32 %v2480_v25, 16 }
 0x152   : > { %v2461_v39 = vld [vmem:[#allocation2 + $0x6c] sm:$0xf]  ;;  %2612 = vst [vmem:[#allocation3 + $0x68] sm:$0xf] %v2531_v35  ;;  %v2542_v11 = vshll.u32 %v2481_v45, 16  ;;  %3569 = vmatpush.bf16.msrb.mxu2 %v5139_v51  ;;  %v4484_v4 = vor.u32 %v5063_v5, %v4483_v53  ;;  %v1800_v21 = vshrl.u32 %v6050_v56, 16  ;;  %v1780_v41 = vsel %vm5493_vm7, %v4451_v32, %v1779_v36 }
 0x153   : > { %v2183_v47 = vld [vmem:[#allocation2 + $0x58] sm:$0xf]  ;;  %2173 = vst [vmem:[#allocation3 + $0xa0] sm:$0xf] %v2165_v28  ;;  %v5067_v46 = vld [vmem:[#allocation3 + $0x4c] sm:$0xf]  ;;  %v1570_v25 = vadd.f32 %v1569_v37, %v1541_v54 }
 0x154   : > { %v6073_v23 = vld [vmem:[#allocation2 + $0x58] sm:$0xf]  ;;  %v2538_v6 = vrot.slane %v2536_v10, 5  ;;  %2469 = vst [vmem:[#allocation3 + $0x88] sm:$0xf] %v2461_v39  ;;  %v2086_v27 = vshrl.u32 %v6056_v62, 16  ;;  %3488 = vmatmul.bf16.vlgmr.msrb.gmra.mxu3 %v4484_v4 }
 0x155   : > { %v4513_v52 = vld [vmem:[#allocation3 + $0x6c] sm:$0xf0]  ;;  %1721 = vst [vmem:[#allocation2 + $0x80] sm:$0xf] %v1713_v58  ;;  %v1636_v30 = vmax.f32 %v1626_v48, 0.0  ;;  %v4452_v18 = vrot.slane %v1782_v15, 11 }
 0x156   : > { %v4516_v22 = vor.u32 %v5067_v46, %v4513_v52  ;;  %v5131_v63 = vld [vmem:[%s6625_s3 + $0x128] sm:$0xff]  ;;  %v1956_v42 = vrot.slane %v1954_v61, 4  ;;  %v1959_v20 = vrot.slane %v1957_v7, 5  ;;  %v2539_v8 = vor.u32 %v2538_v6, %v2535_v29  ;;  %2154 = vst [vmem:[#allocation3 + $0x30] sm:$0xf] %v2066_v3  ;;  %v5138_v32 = vld [vmem:[%s6625_s3 + $0x160] sm:$0xff] }
 0x157   : > { %v2544_v26 = vrot.slane %v2542_v11, 5  ;;  %v6083_v33 = vld [vmem:[#allocation2 + $0x6c] sm:$0xf]  ;;  %v1714_v49 = vpack.c.bf16 %v1636_v30, %v1636_v30  ;;  %v1793_v50 = vsel %vm5493_vm7, %v4452_v18, %v1792_v19  ;;  %1856 = vst [vmem:[#allocation3 + $0x48] sm:$0xf] %v1780_v41  ;;  %3540 = vmatpush.bf16.msrb.mxu1 %v5131_v63  ;;  %v2236_v53 = vshrl.u32 %v2183_v47, 16  ;;  %3570 = vmatpush.bf16.msrb.mxu2 %v5138_v32  ;;  %v1598_v19 = vpop.f32.mrf.mxu3 }
 0x158   : > { %3464 = vmatmul.bf16.gmra.mxu2 %v4516_v22  ;;  %v1669_v55 = vld [vmem:[#allocation2 + $0x54] sm:$0x8]  ;;  %v2239_v12 = vshll.u32 %v2183_v47, 16  ;;  %v2540_v61 = vrot.slane %v2539_v8, 4  ;;  %1857 = vst [vmem:[#allocation3 + $0x6c] sm:$0xf] %v1793_v50  ;;  %v1960_v36 = vor.u32 %v1959_v20, %v1956_v42  ;;  %v1599_v18 = vadd.f32 %v1598_v19, %v1570_v25 }
 0x159   : > { %v1670_v24 = vsel %vm5439_vm2, 0, %v1669_v55  ;;  %v2370_v43 = vshrl.u32 %v6073_v23, 16  ;;  %v1888_v40 = vld [vmem:[#allocation2 + $0x6c] sm:$0xf]  ;;  %1722 = vst [vmem:[#allocation2 + $0x94] sm:$0xf] %v1714_v49  ;;  %v1932_v20 = vor.u32 %v6021_v57, %v6018_v14  ;;  %v1627_v55 = vpop.f32.mrf.mxu0 }
 0x15a   : > { %v6093_v15 = vrot.slane %v1946_v17, 4  ;;  %v1813_v38 = vshrl.u32 %v6083_v33, 16  ;;  %v2185_v28 = vld [vmem:[#allocation2 + $0x6c] sm:$0xf]  ;;  %v2545_v45 = vsel %vm5530_vm10, %v2540_v61, %v2544_v26  ;;  %1671 = vst [vmem:[#allocation2 + $0x54] sm:$0x8] %v1670_v24 }
 0x15b   : > { %v6098_v1 = vrot.slane %v2228_v9, 4  ;;  %v6100_v2 = vrot.slane %v1800_v21, 7  ;;  %v1803_v51 = vshll.u32 %v6050_v56, 16  ;;  %v2089_v16 = vshll.u32 %v6056_v62, 16  ;;  %2613 = vst [vmem:[#allocation3 + $0x8c] sm:$0xf] %v2545_v45 }
 0x15c   : > { %v6104_v35 = vrot.slane %v2086_v27, 7  ;;  %v2238_v39 = vrot.slane %v2236_v53, 4  ;;  %v2241_v5 = vrot.slane %v2239_v12, 5  ;;  %v1968_v58 = vshrl.u32 %v1888_v40, 16  ;;  %v6109_v10 = vld [vmem:[#allocation2 + $0x6c] sm:$0xf] }
 0x15d   : > { %v6106_v48 = vrot.slane %v2370_v43, 7  ;;  %v2373_v7 = vshll.u32 %v6073_v23, 16  ;;  %v1971_v29 = vshll.u32 %v1888_v40, 16  ;;  %v2250_v11 = vshrl.u32 %v2185_v28, 16  ;;  %v1868_v46 = vld [vmem:[#allocation2 + $0x80] sm:$0xf] }
 0x15e   : > { %v6111_v54 = vrot.slane %v1960_v36, 4  ;;  %v6113_v47 = vrot.slane %v1813_v38, 7  ;;  %v1816_v4 = vshll.u32 %v6083_v33, 16  ;;  %v2253_v3 = vshll.u32 %v2185_v28, 16  ;;  %v2166_v17 = vld [vmem:[#allocation2 + $0x80] sm:$0xf] }
 0x15f   : > { %v1883_v21 = vld [vmem:[#allocation2 + $0x34] sm:$0x1]  ;;  %v1885_v6 = vld [vmem:[#allocation2 + $0x48] sm:$0x1]  ;;  %v2242_v52 = vor.u32 %v2241_v5, %v2238_v39  ;;  %v1970_v41 = vrot.slane %v1968_v58, 4  ;;  %v2099_v27 = vshrl.u32 %v6109_v10, 16  ;;  %v1628_v43 = vadd.f32 %v1627_v55, %v1599_v18 }
 0x160   : > { %v6117_v22 = vld [vmem:[#allocation2 + $0x6c] sm:$0xf]  ;;  %v2462_v30 = vld [vmem:[#allocation2 + $0x80] sm:$0xf]  ;;  %v1973_v63 = vrot.slane %v1971_v29, 5  ;;  %v2252_v37 = vrot.slane %v2250_v11, 4 }
 0x161   : > { %1876 = vst [vmem:[#allocation3 + $0xdc] sm:$0xf] %v1868_v46  ;;  %v5059_v42 = vld [vmem:[#allocation3 + $0xc] sm:$0xf]  ;;  %v2255_v8 = vrot.slane %v2253_v3, 5  ;;  %v1935_v26 = vshll.u32 %v1883_v21, 16 }
 0x162   : > { %2174 = vst [vmem:[#allocation3 + $0xc4] sm:$0xf] %v2166_v17  ;;  %v1949_v9 = vshll.u32 %v1885_v6, 16  ;;  %v5130_v49 = vld [vmem:[%s6625_s3 + $0x120] sm:$0xff]  ;;  %v4485_v50 = vld [vmem:[#allocation3 + $0x2c] sm:$0xf0]  ;;  %v1974_v57 = vor.u32 %v1973_v63, %v1970_v41  ;;  %v2078_v6 = vor.u32 %v2076_v44, %v6044_v0 }
 0x163   : > { %2470 = vst [vmem:[#allocation3 + $0xac] sm:$0xf] %v2462_v30  ;;  %v2029_v53 = vld [vmem:[#allocation2 + $0x40] sm:$0x8]  ;;  %v6124_v12 = vrot.slane %v2242_v52, 4  ;;  %v2102_v61 = vshll.u32 %v6109_v10, 16  ;;  %v4488_v25 = vor.u32 %v5059_v42, %v4485_v50  ;;  %3541 = vmatpush.bf16.msrb.mxu1 %v5130_v49  ;;  %v2256_v38 = vor.u32 %v2255_v8, %v2252_v37 }
 0x164   : > { %v1890_v24 = vld [vmem:[#allocation2 + $0x80] sm:$0xf]  ;;  %v5137_v14 = vld [vmem:[%s6625_s3 + $0x158] sm:$0xff]  ;;  %v6130_v40 = vrot.slane %v2099_v27, 7  ;;  %v2383_v32 = vshrl.u32 %v6117_v22, 16  ;;  %v2386_v36 = vshll.u32 %v6117_v22, 16 }
 0x165   : > { %3517 = vmatmul.bf16.vlgmr.msrb.gmra.mxu0 %v4488_v25  ;;  %v1933_v28 = vrot.slane %v1932_v20, 4  ;;  %v1937_v45 = vrot.slane %v1935_v26, 5  ;;  %v2068_v39 = vshrl.u32 %v2029_v53, 16  ;;  %3571 = vmatpush.bf16.msrb.mxu2 %v5137_v14  ;;  %v5149_v5 = vld [vmem:[%s6625_s3 + $0x1b8] sm:$0xff]  ;;  %v6137_v58 = vld [vmem:[#allocation2 + $0x80] sm:$0xf] }
 0x166   : > { %v1982_v29 = vshrl.u32 %v1890_v24, 16  ;;  %v1951_v11 = vrot.slane %v1949_v9, 5  ;;  %v1672_v19 = vld [vmem:[#allocation2 + $0x68] sm:$0x8]  ;;  %v1985_v3 = vshll.u32 %v1890_v24, 16  ;;  %v1637_v21 = vmax.f32 %v1628_v43, 0.0  ;;  %3596 = vmatpush.bf16.msra.mxu3 %v5149_v5 }
 0x167   : > { %v6139_v46 = vld [vmem:[#allocation2 + $0x80] sm:$0xf]  ;;  %v1869_v17 = vld [vmem:[#allocation2 + $0x94] sm:$0xf]  ;;  %v6144_v52 = vrot.slane %v1974_v57, 4  ;;  %v6146_v41 = vrot.slane %v2383_v32, 7  ;;  %v1938_v37 = vsel %vm5530_vm10, %v1933_v28, %v1937_v45  ;;  %v2091_v32 = vor.u32 %v2089_v16, %v6104_v35 }
 0x168   : > { %v6148_v27 = vld [vmem:[#allocation2 + $0x80] sm:$0xf]  ;;  %v2167_v30 = vld [vmem:[#allocation2 + $0x94] sm:$0xf]  ;;  %v6150_v18 = vrot.slane %v2256_v38, 4  ;;  %v4459_v42 = vrot.slane %v2068_v39, 11  ;;  %v1952_v8 = vsel %vm5530_vm10, %v6093_v15, %v1951_v11  ;;  %v1715_v55 = vpack.c.bf16 %v1637_v21, %v1637_v21 }
 0x169   : > { %v2463_v63 = vld [vmem:[#allocation2 + $0x94] sm:$0xf]  ;;  %v1673_v20 = vsel %vm5439_vm2, 0, %v1672_v19  ;;  %v1826_v60 = vshrl.u32 %v6137_v58, 16  ;;  %v1829_v44 = vshll.u32 %v6137_v58, 16  ;;  %v2112_v0 = vshrl.u32 %v6139_v46, 16 }
 0x16a   : > { %1877 = vst [vmem:[#allocation3 + $0x100] sm:$0xf] %v1869_v17  ;;  %v1887_v26 = vld [vmem:[#allocation2 + $0x5c] sm:$0x1]  ;;  %v6162_v9 = vrot.slane %v1982_v29, 4  ;;  %v6164_v49 = vrot.slane %v1985_v3, 5  ;;  %v2079_v57 = vsel %vm5493_vm7, %v4459_v42, %v2078_v6  ;;  %v2104_v33 = vor.u32 %v2102_v61, %v6130_v40 }
 0x16b   : > { %v2264_v50 = vshrl.u32 %v6148_v27, 16  ;;  %2175 = vst [vmem:[#allocation3 + $0xe8] sm:$0xf] %v2167_v30  ;;  %v5129_v53 = vld [vmem:[%s6625_s3 + $0x118] sm:$0xff]  ;;  %v6170_v24 = vld [vmem:[#allocation2 + $0x80] sm:$0xf] }
 0x16c   : > { %2471 = vst [vmem:[#allocation3 + $0xd0] sm:$0xf] %v2463_v63  ;;  %v4511_v25 = vld [vmem:[#allocation3 + $0x48] sm:$0xf]  ;;  %v6172_v43 = vld [vmem:[#allocation2 + $0x80] sm:$0xf]  ;;  %3542 = vmatpush.bf16.msrb.mxu1 %v5129_v53 }
 0x16d   : > { %v5071_v15 = vld [vmem:[#allocation3 + $0x68] sm:$0xf0]  ;;  %2019 = vst [vmem:[#allocation3 + $0x50] sm:$0xf] %v1938_v37  ;;  %v5076_v45 = vld [vmem:[#allocation3 + $0x94] sm:$0xf] }
 0x16e   : > { %v2031_v14 = vld [vmem:[#allocation2 + $0x54] sm:$0x8]  ;;  %v4512_v38 = vor.u32 %v5071_v15, %v4511_v25  ;;  %2020 = vst [vmem:[#allocation3 + $0x74] sm:$0xf] %v1952_v8  ;;  %v5157_v39 = vld [vmem:[%s6625_s3 + $0x1f8] sm:$0xff]  ;;  %v2267_v5 = vshll.u32 %v6148_v27, 16  ;;  %v1988_v15 = vor.u32 %v6164_v49, %v6162_v9 }
 0x16f   : > { %v2081_v28 = vshrl.u32 %v2031_v14, 16  ;;  %1723 = vst [vmem:[#allocation2 + $0xa8] sm:$0xf] %v1715_v55  ;;  %v4549_v29 = vld [vmem:[#allocation3 + $0xb4] sm:$0xf0]  ;;  %v1963_v11 = vshll.u32 %v1887_v26, 16  ;;  %3625 = vmatpush.bf16.msra.mxu0 %v5157_v39 }
 0x170   : > { %v2396_v19 = vshrl.u32 %v6170_v24, 16  ;;  %3435 = vmatmul.bf16.gmra.mxu1 %v4512_v38  ;;  %2155 = vst [vmem:[#allocation3 + $0x54] sm:$0xf] %v2079_v57  ;;  %v4552_v62 = vor.u32 %v5076_v45, %v4549_v29  ;;  %v1732_v16 = vld [vmem:[#allocation2 + $0x54] sm:$0x8]  ;;  %v2547_v6 = vshrl.u32 %v6172_v43, 16  ;;  %v1805_v57 = vor.u32 %v1803_v51, %v6100_v2 }
 0x171   : > { %v4460_v3 = vrot.slane %v2081_v28, 11  ;;  %1674 = vst [vmem:[#allocation2 + $0x68] sm:$0x8] %v1673_v20  ;;  %v1795_v35 = vshrl.u32 %v1732_v16, 16  ;;  %v1889_v17 = vld [vmem:[#allocation2 + $0x70] sm:$0x1] }
 0x172   : > { %v1965_v21 = vrot.slane %v1963_v11, 5  ;;  %3469 = vmatmul.bf16.gmra.mxu2 %v4552_v62  ;;  %v1977_v63 = vshll.u32 %v1889_v17, 16  ;;  %v5136_v37 = vld [vmem:[%s6625_s3 + $0x150] sm:$0xff]  ;;  %v1675_v8 = vld [vmem:[#allocation2 + $0x7c] sm:$0x8]  ;;  %v2550_v20 = vshll.u32 %v6172_v43, 16 }
 0x173   : > { %v2092_v30 = vsel %vm5493_vm7, %v4460_v3, %v2091_v32  ;;  %v5148_v42 = vld [vmem:[%s6625_s3 + $0x1b0] sm:$0xff]  ;;  %v1676_v55 = vsel %vm5439_vm2, 0, %v1675_v8  ;;  %v4453_v14 = vrot.slane %v1795_v35, 11  ;;  %3572 = vmatpush.bf16.msrb.mxu2 %v5136_v37  ;;  %v1828_v9 = vrot.slane %v1826_v60, 7  ;;  %v5147_v37 = vld [vmem:[%s6625_s3 + $0x1a8] sm:$0xff] }
 0x174   : > { %2156 = vst [vmem:[#allocation3 + $0x78] sm:$0xf] %v2092_v30  ;;  %v1966_v26 = vsel %vm5530_vm10, %v6111_v54, %v1965_v21  ;;  %v5128_v53 = vld [vmem:[%s6625_s3 + $0x110] sm:$0xff]  ;;  %3597 = vmatpush.bf16.msra.mxu3 %v5148_v42  ;;  %v5135_v54 = vld [vmem:[%s6625_s3 + $0x148] sm:$0xff]  ;;  %v4519_v32 = vld [vmem:[#allocation3 + $0x50] sm:$0xf]  ;;  %v1818_v42 = vor.u32 %v1816_v4, %v6113_v47 }
 0x175   : > { %v5156_v25 = vld [vmem:[%s6625_s3 + $0x1f0] sm:$0xff]  ;;  %2021 = vst [vmem:[#allocation3 + $0x98] sm:$0xf] %v1966_v26  ;;  %v5072_v38 = vld [vmem:[#allocation3 + $0x70] sm:$0xf0]  ;;  %3543 = vmatpush.bf16.msrb.mxu1 %v5128_v53  ;;  %v2115_v49 = vshll.u32 %v6139_v46, 16  ;;  %v1806_v35 = vsel %vm5493_vm7, %v4453_v14, %v1805_v57 }
 0x176   : > { %v6207_v43 = vld [vmem:[#allocation2 + $0x94] sm:$0xf]  ;;  %1677 = vst [vmem:[#allocation2 + $0x7c] sm:$0x8] %v1676_v55  ;;  %3626 = vmatpush.bf16.msra.mxu0 %v5156_v25  ;;  %v4520_v28 = vor.u32 %v5072_v38, %v4519_v32  ;;  %v2168_v45 = vld [vmem:[#allocation2 + $0xa8] sm:$0xf] }
 0x177   : > { %v1979_v39 = vrot.slane %v1977_v63, 5  ;;  %v2114_v29 = vrot.slane %v2112_v0, 7  ;;  %v6222_v56 = vrot.slane %v2264_v50, 4  ;;  %v2399_v2 = vshll.u32 %v6170_v24, 16  ;;  %v6226_v11 = vld [vmem:[#allocation2 + $0x94] sm:$0xf]  ;;  %3573 = vmatpush.bf16.msrb.mxu2 %v5135_v54 }
 0x178   : > { %v1839_v51 = vshrl.u32 %v6207_v43, 16  ;;  %v6228_v3 = vrot.slane %v1988_v15, 4  ;;  %v6230_v60 = vrot.slane %v2267_v5, 5  ;;  %v6232_v62 = vrot.slane %v2396_v19, 7  ;;  %3493 = vmatmul.bf16.gmra.mxu3 %v4520_v28  ;;  %v2464_v46 = vld [vmem:[#allocation2 + $0xa8] sm:$0xf] }
 0x179   : > { %v6234_v16 = vrot.slane %v2547_v6, 4  ;;  %v6236_v27 = vrot.slane %v2550_v20, 5  ;;  %v1842_v0 = vshll.u32 %v6207_v43, 16  ;;  %v6239_v50 = vld [vmem:[#allocation2 + $0x94] sm:$0xf]  ;;  %v1996_v5 = vshrl.u32 %v6226_v11, 16  ;;  %3598 = vmatpush.bf16.msra.mxu3 %v5147_v37 }
 0x17a   : > { %2176 = vst [vmem:[#allocation3 + $0x10c] sm:$0xf] %v2168_v45  ;;  %v1999_v19 = vshll.u32 %v6226_v11, 16  ;;  %v5068_v17 = vld [vmem:[#allocation3 + $0x54] sm:$0xf]  ;;  %v1980_v21 = vsel %vm5530_vm10, %v6144_v52, %v1979_v39  ;;  %v6248_v6 = vrot.slane %v1839_v51, 7  ;;  %v2117_v54 = vor.u32 %v2115_v49, %v2114_v29 }
 0x17b   : > { %2472 = vst [vmem:[#allocation3 + $0xf4] sm:$0xf] %v2464_v46  ;;  %v4521_v30 = vld [vmem:[#allocation3 + $0x74] sm:$0xf0]  ;;  %v1734_v63 = vld [vmem:[#allocation2 + $0x68] sm:$0x8]  ;;  %v1831_v51 = vor.u32 %v1829_v44, %v1828_v9 }
 0x17c   : > { %v2125_v8 = vshrl.u32 %v6239_v50, 16  ;;  %v4524_v20 = vor.u32 %v5068_v17, %v4521_v30  ;;  %v1808_v26 = vshrl.u32 %v1734_v63, 16  ;;  %1858 = vst [vmem:[#allocation3 + $0x90] sm:$0xf] %v1806_v35  ;;  %v5085_v55 = vld [vmem:[#allocation3 + $0xdc] sm:$0xf] }
 0x17d   : > { %v2128_v52 = vshll.u32 %v6239_v50, 16  ;;  %2022 = vst [vmem:[#allocation3 + $0xbc] sm:$0xf] %v1980_v21  ;;  %v2033_v53 = vld [vmem:[#allocation2 + $0x68] sm:$0x8]  ;;  %v5146_v25 = vld [vmem:[%s6625_s3 + $0x1a0] sm:$0xff] }
 0x17e   : > { %3522 = vmatmul.bf16.gmra.mxu0 %v4524_v20  ;;  %v4454_v47 = vrot.slane %v1808_v26, 11  ;;  %v2035_v4 = vld [vmem:[#allocation2 + $0x7c] sm:$0x8]  ;;  %v2094_v15 = vshrl.u32 %v2033_v53, 16  ;;  %v4585_v14 = vld [vmem:[#allocation3 + $0xfc] sm:$0xf0]  ;;  %3599 = vmatpush.bf16.msra.mxu3 %v5146_v25 }
 0x17f   : > { %v2107_v57 = vshrl.u32 %v2035_v4, 16  ;;  %v4588_v32 = vor.u32 %v5085_v55, %v4585_v14  ;;  %v1678_v38 = vld [vmem:[#allocation2 + $0x90] sm:$0x8]  ;;  %v1736_v28 = vld [vmem:[#allocation2 + $0x7c] sm:$0x8]  ;;  %v5127_v45 = vld [vmem:[%s6625_s3 + $0x108] sm:$0xff] }
 0x180   : > { %v6267_v39 = vrot.slane %v1996_v5, 4  ;;  %v1819_v10 = vsel %vm5493_vm7, %v4454_v47, %v1818_v42  ;;  %v4461_v61 = vrot.slane %v2094_v15, 11  ;;  %v1679_v40 = vsel %vm5439_vm2, 0, %v1678_v38  ;;  %v5155_v49 = vld [vmem:[%s6625_s3 + $0x1e8] sm:$0xff]  ;;  %v1699_v29 = vld [vmem:[#allocation2 + $0x84] sm:$0x1]  ;;  %3544 = vmatpush.bf16.msrb.mxu1 %v5127_v45 }
 0x181   : > { %v6278_v11 = vld [vmem:[#allocation2 + $0x94] sm:$0xf]  ;;  %1859 = vst [vmem:[#allocation3 + $0xb4] sm:$0xf] %v1819_v10  ;;  %v4462_v46 = vrot.slane %v2107_v57, 11  ;;  %v1821_v35 = vshrl.u32 %v1736_v28, 16  ;;  %3627 = vmatpush.bf16.msra.mxu0 %v5155_v49 }
 0x182   : > { %v1700_v5 = vsel %vm5462_vm5, 0, %v1699_v29  ;;  %v5134_v17 = vld [vmem:[%s6625_s3 + $0x140] sm:$0xff]  ;;  %v6285_v21 = vld [vmem:[#allocation2 + $0xa8] sm:$0xf]  ;;  %v2105_v58 = vsel %vm5493_vm7, %v4461_v61, %v2104_v33  ;;  %3474 = vmatmul.bf16.gmra.mxu2 %v4588_v32  ;;  %1680 = vst [vmem:[#allocation2 + $0x90] sm:$0x8] %v1679_v40  ;;  %v1844_v61 = vor.u32 %v1842_v0, %v6248_v6 }
 0x183   : > { %v1702_v44 = vld [vmem:[#allocation2 + $0x98] sm:$0x1]  ;;  %v5154_v30 = vld [vmem:[%s6625_s3 + $0x1e0] sm:$0xff]  ;;  %v2001_v63 = vrot.slane %v1999_v19, 5  ;;  %v2118_v42 = vsel %vm5493_vm7, %v4462_v46, %v2117_v54  ;;  %2157 = vst [vmem:[#allocation3 + $0x9c] sm:$0xf] %v2105_v58  ;;  %3574 = vmatpush.bf16.msrb.mxu2 %v5134_v17 }
 0x184   : > { %v5145_v9 = vld [vmem:[%s6625_s3 + $0x198] sm:$0xff]  ;;  %v4555_v37 = vld [vmem:[#allocation3 + $0x98] sm:$0xf]  ;;  %v4455_v20 = vrot.slane %v1821_v35, 11  ;;  %v6297_v26 = vld [vmem:[#allocation2 + $0x94] sm:$0xf] }
 0x185   : > { %v5081_v55 = vld [vmem:[#allocation3 + $0xb8] sm:$0xf0]  ;;  %2158 = vst [vmem:[#allocation3 + $0xc0] sm:$0xf] %v2118_v42  ;;  %v1703_v53 = vsel %vm5462_vm5, 0, %v1702_v44  ;;  %v2127_v33 = vrot.slane %v2125_v8, 7  ;;  %3600 = vmatpush.bf16.msra.mxu3 %v5145_v9  ;;  %3628 = vmatpush.bf16.msra.mxu0 %v5154_v30  ;;  %v2002_v32 = vor.u32 %v2001_v63, %v6267_v39 }
 0x186   : > { %v5126_v25 = vld [vmem:[%s6625_s3 + $0x100] sm:$0xff]  ;;  %v4556_v19 = vor.u32 %v5081_v55, %v4555_v37  ;;  %v1832_v47 = vsel %vm5493_vm7, %v4455_v20, %v1831_v51  ;;  %1701 = vst [vmem:[#allocation2 + $0x84] sm:$0x1] %v1700_v5  ;;  %v5144_v4 = vld [vmem:[%s6625_s3 + $0x190] sm:$0xff]  ;;  %v2278_v14 = vshrl.u32 %v6278_v11, 16  ;;  %v2281_v54 = vshll.u32 %v6278_v11, 16 }
 0x187   : > { %v1681_v15 = vld [vmem:[#allocation2 + $0xa4] sm:$0x8]  ;;  %1860 = vst [vmem:[#allocation3 + $0xd8] sm:$0xf] %v1832_v47  ;;  %3545 = vmatpush.bf16.msrb.mxu1 %v5126_v25  ;;  %v5153_v57 = vld [vmem:[%s6625_s3 + $0x1d8] sm:$0xff]  ;;  %v2138_v28 = vshrl.u32 %v6285_v21, 16  ;;  %v2130_v39 = vor.u32 %v2128_v52, %v2127_v33  ;;  %v2270_v37 = vor.u32 %v6230_v60, %v6222_v56 }
 0x188   : > { %v1682_v8 = vsel %vm5439_vm2, 0, %v1681_v15  ;;  %v6317_v38 = vld [vmem:[#allocation2 + $0x94] sm:$0xf]  ;;  %1704 = vst [vmem:[#allocation2 + $0x98] sm:$0x1] %v1703_v53  ;;  %v6323_v45 = vld [vmem:[%s6627_s5 + $0x38] sm:$0xff]  ;;  %3498 = vmatmul.bf16.gmra.mxu3 %v4556_v19 }
 0x189   : > { %v4547_v10 = vld [vmem:[#allocation3 + $0x90] sm:$0xf]  ;;  %v5080_v13 = vld [vmem:[#allocation3 + $0xb0] sm:$0xf0]  ;;  %1683 = vst [vmem:[#allocation2 + $0xa4] sm:$0x8] %v1682_v8  ;;  %3601 = vmatpush.bf16.msra.mxu3 %v5144_v4  ;;  %3763 = vmatpush.bf16.msra.mxu2 %v6323_v45 }
 0x18a   : > { %v2409_v40 = vshrl.u32 %v6297_v26, 16  ;;  %v4548_v49 = vor.u32 %v5080_v13, %v4547_v10  ;;  %v1738_v29 = vld [vmem:[#allocation2 + $0x90] sm:$0x8]  ;;  %v5143_v11 = vld [vmem:[%s6625_s3 + $0x188] sm:$0xff]  ;;  %v6335_v46 = vrot.slane %v2278_v14, 4  ;;  %v2561_v43 = vshrl.u32 %v6317_v38, 16  ;;  %3629 = vmatpush.bf16.msra.mxu0 %v5153_v57 }
 0x18b   : > { %v2037_v51 = vld [vmem:[#allocation2 + $0x90] sm:$0x8]  ;;  %v1834_v0 = vshrl.u32 %v1738_v29, 16  ;;  %v2003_v52 = vrot.slane %v2002_v32, 4  ;;  %v5077_v35 = vld [vmem:[#allocation3 + $0x9c] sm:$0xf] }
 0x18c   : > { %v2120_v6 = vshrl.u32 %v2037_v51, 16  ;;  %v5152_v50 = vld [vmem:[%s6625_s3 + $0x1d0] sm:$0xff]  ;;  %3440 = vmatmul.bf16.gmra.mxu1 %v4548_v49  ;;  %v4557_v5 = vld [vmem:[#allocation3 + $0xbc] sm:$0xf0]  ;;  %v6344_v17 = vld [vmem:[%s6625_s3 + $0x238] sm:$0xff]  ;;  %v2140_v58 = vrot.slane %v2138_v28, 7 }
 0x18d   : > { %v4560_v44 = vor.u32 %v5077_v35, %v4557_v5  ;;  %v4456_v9 = vrot.slane %v1834_v0, 11  ;;  %v1891_v30 = vld [vmem:[#allocation2 + $0x84] sm:$0x1]  ;;  %v5060_v20 = vld [vmem:[#allocation3 + $0x14] sm:$0xf]  ;;  %3602 = vmatpush.bf16.msra.mxu3 %v5143_v11  ;;  %5183 = vmatpush.bf16.msra.mxu1 %v6344_v17  ;;  %v2283_v25 = vrot.slane %v2281_v54, 5 }
 0x18e   : > { %v4463_v63 = vrot.slane %v2120_v6, 11  ;;  %v1991_v42 = vshll.u32 %v1891_v30, 16  ;;  %v4493_v55 = vld [vmem:[#allocation3 + $0x34] sm:$0xf0]  ;;  %v2141_v33 = vshll.u32 %v6285_v21, 16  ;;  %v5151_v60 = vld [vmem:[%s6625_s3 + $0x1c8] sm:$0xff]  ;;  %3630 = vmatpush.bf16.msra.mxu0 %v5152_v50 }
 0x18f   : > { %v5142_v53 = vld [vmem:[%s6625_s3 + $0x180] sm:$0xff]  ;;  %3527 = vmatmul.bf16.gmra.mxu0 %v4560_v44  ;;  %v1845_v19 = vsel %vm5493_vm7, %v4456_v9, %v1844_v61  ;;  %v1893_v47 = vld [vmem:[#allocation2 + $0x98] sm:$0x1]  ;;  %v5172_v4 = vld [vmem:[%s6627_s5 + $0x30] sm:$0xff]  ;;  %v2564_v54 = vshll.u32 %v6317_v38, 16  ;;  %v4496_v32 = vor.u32 %v5060_v20, %v4493_v55  ;;  %v6369_v10 = vrot.slane %v2270_v37, 4 }
 0x190   : > { %v2131_v56 = vsel %vm5493_vm7, %v4463_v63, %v2130_v39  ;;  %1861 = vst [vmem:[#allocation3 + $0xfc] sm:$0xf] %v1845_v19  ;;  %v1993_v15 = vrot.slane %v1991_v42, 5  ;;  %v2005_v14 = vshll.u32 %v1893_v47, 16  ;;  %v2039_v21 = vld [vmem:[#allocation2 + $0xa4] sm:$0x8]  ;;  %v2143_v8 = vor.u32 %v2141_v33, %v2140_v58  ;;  %3764 = vmatpush.bf16.msra.mxu2 %v5172_v4 }
 0x191   : > { %v2133_v57 = vshrl.u32 %v2039_v21, 16  ;;  %2159 = vst [vmem:[#allocation3 + $0xe4] sm:$0xf] %v2131_v56  ;;  %v6367_v28 = vld [vmem:[%s6625_s3 + $0x230] sm:$0xff]  ;;  %v2412_v13 = vshll.u32 %v6297_v26, 16  ;;  %3603 = vmatpush.bf16.msra.mxu3 %v5142_v53  ;;  %v5171_v49 = vld [vmem:[%s6627_s5 + $0x28] sm:$0xff]  ;;  %v2284_v29 = vor.u32 %v2283_v25, %v6335_v46  ;;  %v2401_v21 = vor.u32 %v2399_v2, %v6232_v62 }
 0x192   : > { %v1994_v61 = vsel %vm5530_vm10, %v6228_v3, %v1993_v15  ;;  %v2007_v39 = vrot.slane %v2005_v14, 5  ;;  %v2182_v38 = vld [vmem:[#allocation2 + $0x48] sm:$0x1]  ;;  %3575 = vmatmul.bf16.vlgmr.msrb.gmra.mxu2 %v4496_v32  ;;  %5184 = vmatpush.bf16.msra.mxu1 %v6367_v28  ;;  %v2184_v11 = vld [vmem:[#allocation2 + $0x5c] sm:$0x1]  ;;  %v2411_v6 = vrot.slane %v2409_v40, 7 }
 0x193   : > { %2023 = vst [vmem:[#allocation3 + $0xe0] sm:$0xf] %v1994_v61  ;;  %v4464_v51 = vrot.slane %v2133_v57, 11  ;;  %v2231_v0 = vshll.u32 %v2182_v38, 16  ;;  %v6382_v3 = vrot.slane %v2561_v43, 4  ;;  %3631 = vmatpush.bf16.msra.mxu0 %v5151_v60  ;;  %v5150_v46 = vld [vmem:[%s6625_s3 + $0x1c0] sm:$0xff] }
 0x194   : > { %v6384_v50 = vld [vmem:[#allocation2 + $0xa8] sm:$0xf]  ;;  %v2008_v35 = vsel %vm5530_vm10, %v2003_v52, %v2007_v39  ;;  %v2245_v5 = vshll.u32 %v2184_v11, 16  ;;  %v6392_v58 = vrot.slane %v2564_v54, 5  ;;  %3765 = vmatpush.bf16.msra.mxu2 %v5171_v49  ;;  %v2326_v44 = vld [vmem:[#allocation2 + $0x54] sm:$0x8]  ;;  %v2375_v52 = vor.u32 %v2373_v7, %v6106_v48 }
 0x195   : > { %5191 = vmatpush.bf16.msrb.mxu3 %v6323_v45  ;;  %2024 = vst [vmem:[#allocation3 + $0x104] sm:$0xf] %v2008_v35  ;;  %v2144_v40 = vsel %vm5493_vm7, %v4464_v51, %v2143_v8  ;;  %v2233_v43 = vrot.slane %v2231_v0, 5  ;;  %v2328_v30 = vld [vmem:[#allocation2 + $0x68] sm:$0x8]  ;;  %v2365_v63 = vshrl.u32 %v2326_v44, 16  ;;  %v2388_v45 = vor.u32 %v2386_v36, %v6146_v41 }
 0x196   : > { %2160 = vst [vmem:[#allocation3 + $0x108] sm:$0xf] %v2144_v40  ;;  %v2247_v9 = vrot.slane %v2245_v5, 5  ;;  %v6402_v37 = vrot.slane %v2284_v29, 4  ;;  %v4583_v42 = vld [vmem:[#allocation3 + $0xd8] sm:$0xf]  ;;  %v2414_v39 = vor.u32 %v2412_v13, %v2411_v6  ;;  %v2567_v34 = vor.u32 %v6392_v58, %v6382_v3 }
 0x197   : > { %v5089_v20 = vld [vmem:[#allocation3 + $0xf8] sm:$0xf0]  ;;  %v2234_v55 = vsel %vm5530_vm10, %v6098_v1, %v2233_v43  ;;  %v2378_v53 = vshrl.u32 %v2328_v30, 16  ;;  %v2292_v23 = vshrl.u32 %v6384_v50, 16  ;;  %3632 = vmatpush.bf16.msra.mxu0 %v5150_v46  ;;  %v4467_v22 = vrot.slane %v2365_v63, 11 }
 0x198   : > { %v4584_v48 = vor.u32 %v5089_v20, %v4583_v42  ;;  %v2248_v7 = vsel %vm5530_vm10, %v6124_v12, %v2247_v9  ;;  %2315 = vst [vmem:[#allocation3 + $0x5c] sm:$0xf] %v2234_v55  ;;  %v2295_v36 = vshll.u32 %v6384_v50, 16  ;;  %v6412_v41 = vld [vmem:[#allocation2 + $0xa8] sm:$0xf]  ;;  %v5170_v2 = vld [vmem:[%s6627_s5 + $0x20] sm:$0xff] }
 0x199   : > { %5192 = vmatpush.bf16.msrb.mxu3 %v5172_v4  ;;  %2316 = vst [vmem:[#allocation3 + $0x80] sm:$0xf] %v2248_v7  ;;  %v4468_v25 = vrot.slane %v2378_v53, 11  ;;  %v6415_v1 = vld [vmem:[#allocation2 + $0xa8] sm:$0xf]  ;;  %v2376_v33 = vsel %vm5493_vm7, %v4467_v22, %v2375_v52  ;;  %v2422_v15 = vshrl.u32 %v6412_v41, 16  ;;  %3766 = vmatpush.bf16.msra.mxu2 %v5170_v2  ;;  %v2553_v7 = vor.u32 %v6236_v27, %v6234_v16 }
 0x19a   : > { %v2186_v19 = vld [vmem:[#allocation2 + $0x70] sm:$0x1]  ;;  %v2188_v47 = vld [vmem:[#allocation2 + $0x84] sm:$0x1]  ;;  %v4591_v56 = vld [vmem:[#allocation3 + $0xe0] sm:$0xf] }
 0x19b   : > { %3654 = vmatpush.bf16.msrb.mxu0 %v6344_v17  ;;  %v2389_v12 = vsel %vm5493_vm7, %v4468_v25, %v2388_v45  ;;  %2452 = vst [vmem:[#allocation3 + $0x60] sm:$0xf] %v2376_v33  ;;  %v2259_v60 = vshll.u32 %v2186_v19, 16  ;;  %v2273_v4 = vshll.u32 %v2188_v47, 16  ;;  %v5163_v17 = vld [vmem:[%s6625_s3 + $0x228] sm:$0xff]  ;;  %v2425_v38 = vshll.u32 %v6412_v41, 16 }
 0x19c   : > { %3445 = vmatmul.bf16.gmra.mxu1 %v4584_v48  ;;  %v5090_v14 = vld [vmem:[#allocation3 + $0x100] sm:$0xf0]  ;;  %2453 = vst [vmem:[#allocation3 + $0x84] sm:$0xf] %v2389_v12  ;;  %v2575_v29 = vshrl.u32 %v6415_v1, 16  ;;  %v2424_v0 = vrot.slane %v2422_v15, 7 }
 0x19d   : > { %5193 = vmatpush.bf16.msrb.mxu3 %v5171_v49  ;;  %v4592_v54 = vor.u32 %v5090_v14, %v4591_v56  ;;  %v5086_v8 = vld [vmem:[#allocation3 + $0xe4] sm:$0xf]  ;;  %v4593_v57 = vld [vmem:[#allocation3 + $0x104] sm:$0xf0]  ;;  %v2261_v32 = vrot.slane %v2259_v60, 5  ;;  %v2275_v61 = vrot.slane %v2273_v4, 5  ;;  %5185 = vmatpush.bf16.msra.mxu1 %v5163_v17 }
 0x19e   : > { %v4596_v51 = vor.u32 %v5086_v8, %v4593_v57  ;;  %v2330_v49 = vld [vmem:[#allocation2 + $0x7c] sm:$0x8]  ;;  %v2332_v11 = vld [vmem:[#allocation2 + $0x90] sm:$0x8]  ;;  %v5162_v50 = vld [vmem:[%s6625_s3 + $0x220] sm:$0xff]  ;;  %v2578_v35 = vshll.u32 %v6415_v1, 16  ;;  %v2427_v55 = vor.u32 %v2425_v38, %v2424_v0 }
 0x19f   : > { %3655 = vmatpush.bf16.msrb.mxu0 %v6367_v28  ;;  %3503 = vmatmul.bf16.gmra.mxu3 %v4592_v54  ;;  %v5069_v24 = vld [vmem:[#allocation3 + $0x5c] sm:$0xf]  ;;  %v2262_v62 = vsel %vm5530_vm10, %v6150_v18, %v2261_v32  ;;  %v2276_v26 = vsel %vm5530_vm10, %v6369_v10, %v2275_v61  ;;  %v2391_v28 = vshrl.u32 %v2330_v49, 16  ;;  %v2404_v13 = vshrl.u32 %v2332_v11, 16  ;;  %v5169_v18 = vld [vmem:[%s6627_s5 + $0x18] sm:$0xff]  ;;  %v5168_v11 = vld [vmem:[%s6627_s5 + $0x10] sm:$0xff] }
 0x1a0   : > { %3532 = vmatmul.bf16.gmra.mxu0 %v4596_v51  ;;  %v4529_v6 = vld [vmem:[#allocation3 + $0x7c] sm:$0xf0]  ;;  %2317 = vst [vmem:[#allocation3 + $0xa4] sm:$0xf] %v2262_v62  ;;  %v2294_v40 = vrot.slane %v2292_v23, 4  ;;  %v2297_v43 = vrot.slane %v2295_v36, 5  ;;  %3767 = vmatpush.bf16.msra.mxu2 %v5169_v18 }
 0x1a1   : > { %v4532_v46 = vor.u32 %v5069_v24, %v4529_v6  ;;  %2318 = vst [vmem:[#allocation3 + $0xc8] sm:$0xf] %v2276_v26  ;;  %v4469_v10 = vrot.slane %v2391_v28, 11  ;;  %v4470_v5 = vrot.slane %v2404_v13, 11  ;;  %5186 = vmatpush.bf16.msra.mxu1 %v5162_v50  ;;  %v1705_v44 = vld [vmem:[#allocation2 + $0xac] sm:$0x1]  ;;  %5194 = vmatpush.bf16.msrb.mxu3 %v5170_v2 }
 0x1a2   : > { %v2190_v52 = vld [vmem:[#allocation2 + $0x98] sm:$0x1]  ;;  %v1706_v63 = vsel %vm5462_vm5, 0, %v1705_v44  ;;  %v2577_v42 = vrot.slane %v2575_v29, 4  ;;  %v2334_v20 = vld [vmem:[#allocation2 + $0xa4] sm:$0x8]  ;;  %v2298_v22 = vor.u32 %v2297_v43, %v2294_v40 }
 0x1a3   : > { %3656 = vmatpush.bf16.msrb.mxu0 %v5163_v17  ;;  %3580 = vmatmul.bf16.gmra.mxu2 %v4532_v46  ;;  %v2402_v9 = vsel %vm5493_vm7, %v4469_v10, %v2401_v21  ;;  %v2415_v30 = vsel %vm5493_vm7, %v4470_v5, %v2414_v39  ;;  %v2287_v45 = vshll.u32 %v2190_v52, 16  ;;  %v2580_v53 = vrot.slane %v2578_v35, 5  ;;  %1707 = vst [vmem:[#allocation2 + $0xac] sm:$0x1] %v1706_v63  ;;  %v5064_v36 = vld [vmem:[#allocation3 + $0x30] sm:$0xf0] }
 0x1a4   : > { %2454 = vst [vmem:[#allocation3 + $0xa8] sm:$0xf] %v2402_v9  ;;  %v2417_v48 = vshrl.u32 %v2334_v20, 16  ;;  %v4491_v33 = vld [vmem:[#allocation3 + $0x10] sm:$0xf]  ;;  %v2554_v27 = vrot.slane %v2553_v7, 4  ;;  %3768 = vmatpush.bf16.msra.mxu2 %v5168_v11 }
 0x1a5   : > { %2455 = vst [vmem:[#allocation3 + $0xcc] sm:$0xf] %v2415_v30  ;;  %v2289_v23 = vrot.slane %v2287_v45, 5  ;;  %5195 = vmatpush.bf16.msrb.mxu3 %v5169_v18  ;;  %v2581_v1 = vor.u32 %v2580_v53, %v2577_v42  ;;  %v5065_v19 = vld [vmem:[#allocation3 + $0x38] sm:$0xf0]  ;;  %v4492_v56 = vor.u32 %v5064_v36, %v4491_v33  ;;  %v2568_v58 = vrot.slane %v2567_v34, 4 }
 0x1a6   : > { %v4471_v25 = vrot.slane %v2417_v48, 11  ;;  %v2483_v16 = vld [vmem:[#allocation2 + $0x84] sm:$0x1]  ;;  %v2485_v12 = vld [vmem:[#allocation2 + $0x98] sm:$0x1]  ;;  %v2299_v60 = vrot.slane %v2298_v22, 4 }
 0x1a7   : > { %3657 = vmatpush.bf16.msrb.mxu0 %v5162_v50  ;;  %v2290_v41 = vsel %vm5530_vm10, %v6402_v37, %v2289_v23  ;;  %v2556_v3 = vshll.u32 %v2483_v16, 16  ;;  %v4501_v4 = vld [vmem:[#allocation3 + $0x3c] sm:$0xf0]  ;;  %v2570_v15 = vshll.u32 %v2485_v12, 16  ;;  %v4499_v37 = vld [vmem:[#allocation3 + $0x18] sm:$0xf] }
 0x1a8   : > { %2319 = vst [vmem:[#allocation3 + $0xec] sm:$0xf] %v2290_v41  ;;  %v2428_v47 = vsel %vm5493_vm7, %v4471_v25, %v2427_v55  ;;  %v5061_v14 = vld [vmem:[#allocation3 + $0x1c] sm:$0xf]  ;;  %v5161_v17 = vld [vmem:[%s6625_s3 + $0x218] sm:$0xff]  ;;  %v2582_v59 = vrot.slane %v2581_v1, 4  ;;  %v4500_v54 = vor.u32 %v5065_v19, %v4499_v37 }
 0x1a9   : > { %2456 = vst [vmem:[#allocation3 + $0xf0] sm:$0xf] %v2428_v47  ;;  %v2558_v21 = vrot.slane %v2556_v3, 5  ;;  %v2572_v57 = vrot.slane %v2570_v15, 5  ;;  %v4504_v61 = vor.u32 %v5061_v14, %v4501_v4  ;;  %v4565_v39 = vld [vmem:[#allocation3 + $0xc4] sm:$0xf0]  ;;  %5187 = vmatpush.bf16.msra.mxu1 %v5161_v17  ;;  %5196 = vmatpush.bf16.msrb.mxu3 %v5168_v11 }
 0x1aa   : > { %v2192_v8 = vld [vmem:[#allocation2 + $0xac] sm:$0x1]  ;;  %v5160_v2 = vld [vmem:[%s6625_s3 + $0x210] sm:$0xff]  ;;  %v5073_v50 = vld [vmem:[#allocation3 + $0x78] sm:$0xf0] }
 0x1ab   : > { %v2487_v32 = vld [vmem:[#allocation2 + $0xac] sm:$0x1]  ;;  %v2301_v38 = vshll.u32 %v2192_v8, 16  ;;  %3658 = vmatpush.bf16.msrb.mxu0 %v5161_v17  ;;  %v2559_v29 = vsel %vm5530_vm10, %v2554_v27, %v2558_v21  ;;  %v2573_v24 = vsel %vm5530_vm10, %v2568_v58, %v2572_v57  ;;  %v4527_v35 = vld [vmem:[#allocation3 + $0x58] sm:$0xf] }
 0x1ac   : > { %3546 = vmatmul.bf16.vlgmr.msrb.gmra.mxu1 %v4492_v56  ;;  %v2584_v51 = vshll.u32 %v2487_v32, 16  ;;  %v5078_v49 = vld [vmem:[#allocation3 + $0xa4] sm:$0xf]  ;;  %2614 = vst [vmem:[#allocation3 + $0xb0] sm:$0xf] %v2559_v29  ;;  %v4528_v46 = vor.u32 %v5073_v50, %v4527_v35  ;;  %v5166_v9 = vld [vmem:[%s6627_s5] sm:$0xff] }
 0x1ad   : > { %v2303_v62 = vrot.slane %v2301_v38, 5  ;;  %2615 = vst [vmem:[#allocation3 + $0xd4] sm:$0xf] %v2573_v24  ;;  %v4568_v28 = vor.u32 %v5078_v49, %v4565_v39  ;;  %v5167_v13 = vld [vmem:[%s6627_s5 + $0x8] sm:$0xff]  ;;  %5188 = vmatpush.bf16.msra.mxu1 %v5160_v2  ;;  %v4537_v10 = vld [vmem:[#allocation3 + $0x84] sm:$0xf0] }
 0x1ae   : > { %v2586_v26 = vrot.slane %v2584_v51, 5  ;;  %3769 = vmatpush.bf16.msra.mxu2 %v5167_v13  ;;  %5197 = vmatpush.bf16.msrb.mxu3 %v5167_v13  ;;  %v5074_v18 = vld [vmem:[#allocation3 + $0x80] sm:$0xf0]  ;;  %v4535_v5 = vld [vmem:[#allocation3 + $0x60] sm:$0xf]  ;;  %v5158_v63 = vld [vmem:[%s6625_s3 + $0x200] sm:$0xff] }
 0x1af   : > { %3604 = vmatmul.bf16.vlgmr.msra.gmra.mxu3 %v4500_v54  ;;  %v2304_v0 = vsel %vm5530_vm10, %v2299_v60, %v2303_v62  ;;  %3659 = vmatpush.bf16.msrb.mxu0 %v5160_v2  ;;  %v5159_v40 = vld [vmem:[%s6625_s3 + $0x208] sm:$0xff]  ;;  %v4536_v43 = vor.u32 %v5074_v18, %v4535_v5  ;;  %v5087_v30 = vld [vmem:[#allocation3 + $0xec] sm:$0xf]  ;;  %v6496_v20 = vld [vmem:[%s6626_s4] ss:$0 sm:$0xff] }
 0x1b0   : > { %3633 = vmatmul.bf16.vlgmr.msra.gmra.mxu0 %v4504_v61  ;;  %v2587_v6 = vsel %vm5530_vm10, %v2582_v59, %v2586_v26  ;;  %2320 = vst [vmem:[#allocation3 + $0x110] sm:$0xf] %v2304_v0  ;;  %v5070_v44 = vld [vmem:[#allocation3 + $0x64] sm:$0xf]  ;;  %v4563_v48 = vld [vmem:[#allocation3 + $0xa0] sm:$0xf] }
 0x1b1   : > { %2616 = vst [vmem:[#allocation3 + $0xf8] sm:$0xf] %v2587_v6  ;;  %v4540_v31 = vor.u32 %v5070_v44, %v4537_v10  ;;  %5189 = vmatpush.bf16.msra.mxu1 %v5159_v40  ;;  %v5082_v53 = vld [vmem:[#allocation3 + $0xc0] sm:$0xf0]  ;;  %v5083_v34 = vld [vmem:[#allocation3 + $0xc8] sm:$0xf0] }
 0x1b2   : > { %3770 = vmatpush.bf16.msra.mxu2 %v5166_v9  ;;  %5198 = vmatpush.bf16.msrb.mxu3 %v5166_v9  ;;  %v4564_v7 = vor.u32 %v5082_v53, %v4563_v48  ;;  %v4573_v22 = vld [vmem:[#allocation3 + $0xcc] sm:$0xf0]  ;;  %v4571_v36 = vld [vmem:[#allocation3 + $0xa8] sm:$0xf]  ;;  %v5079_v47 = vld [vmem:[#allocation3 + $0xac] sm:$0xf] }
 0x1b3   : > { %3585 = vmatmul.bf16.gmra.mxu2 %v4568_v28  ;;  %3660 = vmatpush.bf16.msrb.mxu0 %v5159_v40  ;;  %v4905_v41 = vld [vmem:[%s5426_s17 + $0x19] ss:$2 sm:$0xff]  ;;  %v4906_v25 = vld [vmem:[%s5426_s17 + $0x49] ss:$2 sm:$0xff]  ;;  %v4572_v19 = vor.u32 %v5083_v34, %v4571_v36  ;;  %v4576_v27 = vor.u32 %v5079_v47, %v4573_v22 }
 0x1b4   : > { %v3691_v56 = vpack.c.bf16 %v4906_v25, %v4905_v41  ;;  %v5091_v58 = vld [vmem:[#allocation3 + $0x108] sm:$0xf0]  ;;  %v4599_v4 = vld [vmem:[#allocation3 + $0xe8] sm:$0xf]  ;;  %v4607_v14 = vld [vmem:[#allocation3 + $0xf0] sm:$0xf] }
 0x1b5   : > { %5190 = vmatpush.bf16.msra.mxu1 %v5158_v63  ;;  %v3460_v55 = vpop.f32.mrf.mxu2  ;;  %v4600_v37 = vor.u32 %v5091_v58, %v4599_v4  ;;  %v5092_v17 = vld [vmem:[#allocation3 + $0x110] sm:$0xf0]  ;;  %v4609_v59 = vld [vmem:[#allocation3 + $0x114] sm:$0xf0]  ;;  %v4908_v8 = vld [vmem:[%s5426_s17 + $0xa9] ss:$2 sm:$0xff] }
 0x1b6   : > { %v5088_v21 = vld [vmem:[#allocation3 + $0xf4] sm:$0xf]  ;;  %v4608_v57 = vor.u32 %v5092_v17, %v4607_v14  ;;  %v5075_v11 = vld [vmem:[#allocation3 + $0x88] sm:$0xf0]  ;;  %v4543_v62 = vld [vmem:[#allocation3 + $0x68] sm:$0xf] }
 0x1b7   : > { %v4601_v52 = vld [vmem:[#allocation3 + $0x10c] sm:$0xf0]  ;;  %3661 = vmatpush.bf16.msrb.mxu0 %v5158_v63  ;;  %v4612_v32 = vor.u32 %v5088_v21, %v4609_v59  ;;  %v4912_v2 = vld [vmem:[%s5426_s17 + $0x169] ss:$2 sm:$0xff]  ;;  %v4544_v26 = vor.u32 %v5075_v11, %v4543_v62  ;;  %v5084_v9 = vld [vmem:[#allocation3 + $0xd0] sm:$0xf0] }
 0x1b8   : > { %v4604_v45 = vor.u32 %v5087_v30, %v4601_v52  ;;  %v4907_v54 = vld [vmem:[%s5426_s17 + $0x79] ss:$2 sm:$0xff]  ;;  %v5066_v28 = vld [vmem:[#allocation3 + $0x40] sm:$0xf0]  ;;  %v4507_v18 = vld [vmem:[#allocation3 + $0x20] sm:$0xf] }
 0x1b9   : > { %v3692_v61 = vpack.c.bf16 %v4908_v8, %v4907_v54  ;;  %v4911_v24 = vld [vmem:[%s5426_s17 + $0x139] ss:$2 sm:$0xff]  ;;  %v4508_v10 = vor.u32 %v5066_v28, %v4507_v18 }
 0x1ba   : > { %v3694_v0 = vpack.c.bf16 %v4912_v2, %v4911_v24  ;;  %v4909_v35 = vld [vmem:[%s5426_s17 + $0xd9] ss:$2 sm:$0xff] }
 0x1bb   : > { %v4579_v63 = vld [vmem:[#allocation3 + $0xb0] sm:$0xf] }
 0x1bc   : > { %3551 = vmatmul.bf16.gmra.mxu1 %v4528_v46  ;;  %v3431_v42 = vpop.f32.mrf.mxu1  ;;  %v4910_v46 = vld [vmem:[%s5426_s17 + $0x109] ss:$2 sm:$0xff] }
 0x1bd   : > { %v3432_v23 = vadd.f32 %v6496_v20, %v3431_v42  ;;  %v3462_v12 = vpop.f32.mrf.mxu2  ;;  %v4580_v42 = vor.u32 %v5084_v9, %v4579_v63 }
 0x1bf   : > { %3609 = vmatmul.bf16.gmra.mxu3 %v4536_v43  ;;  %v3461_v33 = vadd.f32 %v3460_v55, %v3432_v23  ;;  %v3693_v43 = vpack.c.bf16 %v4910_v46, %v4909_v35 }
 0x1c0   : > { %3638 = vmatmul.bf16.gmra.mxu0 %v4540_v31 }
 0x1c3   : > { %3590 = vmatmul.bf16.gmra.mxu2 %v4604_v45 }
 0x1c4   : > { %v3433_v1 = vpop.f32.mrf.mxu1 }
 0x1c5   : > { %v3434_v16 = vadd.f32 %v6496_v20, %v3433_v1  ;;  %v4615_v1 = vld [vmem:[#allocation3 + $0xf8] sm:$0xf] }
 0x1c7   : > { %v3463_v3 = vadd.f32 %v3462_v12, %v3434_v16 }
 0x1cc   : > { %3556 = vmatmul.bf16.gmra.mxu1 %v4564_v7 }
 0x1cf   : > { %3614 = vmatmul.bf16.gmra.mxu3 %v4572_v19 }
 0x1d0   : > { %3643 = vmatmul.bf16.gmra.mxu0 %v4576_v27 }
 0x1d3   : > { %3771 = vmatmul.bf16.vlgmr.msra.gmra.mxu2 %v3691_v56 }
 0x1d7   : > { %v3489_v60 = vpop.f32.mrf.mxu3 }
 0x1d8   : > { %v3490_v15 = vadd.f32 %v3489_v60, %v3461_v33  ;;  %v5093_v33 = vld [vmem:[#allocation3 + $0x118] sm:$0xf0] }
 0x1d9   : > { %v4616_v16 = vor.u32 %v5093_v33, %v4615_v1 }
 0x1db   : > { %v3465_v29 = vpop.f32.mrf.mxu2 }
 0x1dc   : > { %3561 = vmatmul.bf16.gmra.mxu1 %v4600_v37 }
 0x1df   : > { %3619 = vmatmul.bf16.gmra.mxu3 %v4608_v57  ;;  %v3491_v39 = vpop.f32.mrf.mxu3 }
 0x1e0   : > { %3648 = vmatmul.bf16.gmra.mxu0 %v4612_v32  ;;  %v3492_v38 = vadd.f32 %v3491_v39, %v3463_v3 }
 0x1e2   : > { %v3518_v51 = vpop.f32.mrf.mxu0 }
 0x1e3   : > { %3776 = vmatmul.bf16.gmra.mxu2 %v3692_v61  ;;  %v6504_v49 = vadd.f32 %v3518_v51, %v3490_v15  ;;  %v3467_v50 = vpop.f32.mrf.mxu2 }
 0x1ea   : > { %v3520_v13 = vpop.f32.mrf.mxu0 }
 0x1eb   : > { %v6508_v6 = vadd.f32 %v3520_v13, %v3492_v38 }
 0x1ec   : > { %3667 = vmatmul.bf16.vlgmr.msra.gmra.mxu1 %v4544_v26 }
 0x1ed   : > { %v3436_v5 = vpop.f32.mrf.mxu1 }
 0x1ee   : > { %v3437_v40 = vadd.f32 %v6496_v20, %v3436_v5 }
 0x1ef   : > { %3786 = vmatmul.bf16.vlgmr.msrb.gmra.mxu3 %v3694_v0 }
 0x1f0   : > { %3662 = vmatmul.bf16.vlgmr.msrb.gmra.mxu0 %v4508_v10  ;;  %v3466_v44 = vadd.f32 %v3465_v29, %v3437_v40 }
 0x1f3   : > { %3781 = vmatmul.bf16.gmra.mxu2 %v3693_v43 }
 0x1f5   : > { %v3438_v31 = vpop.f32.mrf.mxu1  ;;  %v3470_v52 = vpop.f32.mrf.mxu2 }
 0x1f6   : > { %v3439_v30 = vadd.f32 %v6496_v20, %v3438_v31 }
 0x1f8   : > { %v3468_v45 = vadd.f32 %v3467_v50, %v3439_v30 }
 0x1fb   : > { %v3494_v55 = vpop.f32.mrf.mxu3  ;;  %v3523_v53 = vpop.f32.mrf.mxu0 }
 0x1fc   : > { %3672 = vmatmul.bf16.gmra.mxu1 %v4580_v42  ;;  %v3495_v23 = vadd.f32 %v3494_v55, %v3466_v44 }
 0x1fd   : > { %v3472_v48 = vpop.f32.mrf.mxu2 }
 0x1fe   : > { %v6514_v7 = vadd.f32 %v3523_v53, %v3495_v23 }
 0x203   : > { %v3496_v34 = vpop.f32.mrf.mxu3  ;;  %v3525_v22 = vpop.f32.mrf.mxu0 }
 0x204   : > { %v3497_v36 = vadd.f32 %v3496_v34, %v3468_v45 }
 0x205   : > { %v3475_v41 = vpop.f32.mrf.mxu2 }
 0x206   : > { %v6516_v25 = vadd.f32 %v3525_v22, %v3497_v36 }
 0x209   : > { %v3441_v19 = vpop.f32.mrf.mxu1 }
 0x20a   : > { %v3442_v47 = vadd.f32 %v6496_v20, %v3441_v19 }
 0x20b   : > { %v3499_v56 = vpop.f32.mrf.mxu3 }
 0x20c   : > { %3677 = vmatmul.bf16.gmra.mxu1 %v4616_v16  ;;  %v3471_v27 = vadd.f32 %v3470_v52, %v3442_v47  ;;  %v3528_v12 = vpop.f32.mrf.mxu0 }
 0x20d   : > { %v3477_v58 = vpop.f32.mrf.mxu2 }
 0x20e   : > { %v3500_v3 = vadd.f32 %v3499_v56, %v3471_v27 }
 0x210   : > { %v6519_v60 = vadd.f32 %v3528_v12, %v3500_v3 }
 0x211   : > { %v3443_v4 = vpop.f32.mrf.mxu1 }
 0x212   : > { %v3444_v15 = vadd.f32 %v6496_v20, %v3443_v4 }
 0x213   : > { %v3501_v14 = vpop.f32.mrf.mxu3 }
 0x214   : > { %v3473_v37 = vadd.f32 %v3472_v48, %v3444_v15  ;;  %v3530_v17 = vpop.f32.mrf.mxu0 }
 0x215   : > { %v3576_v59 = vpop.f32.mrf.mxu2 }
 0x216   : > { %v3502_v21 = vadd.f32 %v3501_v14, %v3473_v37 }
 0x218   : > { %v6522_v54 = vadd.f32 %v3530_v17, %v3502_v21 }
 0x219   : > { %v3446_v8 = vpop.f32.mrf.mxu1 }
 0x21a   : > { %v3447_v57 = vadd.f32 %v6496_v20, %v3446_v8 }
 0x21c   : > { %v3476_v32 = vadd.f32 %v3475_v41, %v3447_v57 }
 0x21d   : > { %v3533_v61 = vpop.f32.mrf.mxu0  ;;  %v3578_v39 = vpop.f32.mrf.mxu2 }
 0x221   : > { %v3448_v38 = vpop.f32.mrf.mxu1 }
 0x222   : > { %v3449_v29 = vadd.f32 %v6496_v20, %v3448_v38  ;;  %v3504_v51 = vpop.f32.mrf.mxu3 }
 0x223   : > { %v3505_v11 = vadd.f32 %v3504_v51, %v3476_v32 }
 0x224   : > { %v3478_v24 = vadd.f32 %v3477_v58, %v3449_v29  ;;  %v6553_v58 = vld [vmem:[%s6628_s6] ss:$0 sm:$0xff] }
 0x225   : > { %v6526_v2 = vadd.f32 %v3533_v61, %v3505_v11  ;;  %v3535_v62 = vpop.f32.mrf.mxu0 }
 0x226   : > { %v3581_v26 = vpop.f32.mrf.mxu2 }
 0x229   : > { %v3547_v28 = vpop.f32.mrf.mxu1 }
 0x22a   : > { %v3506_v13 = vpop.f32.mrf.mxu3  ;;  %v3548_v0 = vadd.f32 %v3547_v28, %v6504_v49 }
 0x22b   : > { %v3507_v50 = vadd.f32 %v3506_v13, %v3478_v24 }
 0x22c   : > { %v3577_v35 = vadd.f32 %v3576_v59, %v3548_v0 }
 0x22d   : > { %v6529_v46 = vadd.f32 %v3535_v62, %v3507_v50  ;;  %v3634_v18 = vpop.f32.mrf.mxu0 }
 0x22e   : > { %v3583_v10 = vpop.f32.mrf.mxu2 }
 0x231   : > { %v3549_v5 = vpop.f32.mrf.mxu1 }
 0x232   : > { %v3550_v20 = vadd.f32 %v3549_v5, %v6508_v6  ;;  %v3605_v31 = vpop.f32.mrf.mxu3 }
 0x233   : > { %v3606_v15 = vadd.f32 %v3605_v31, %v3577_v35 }
 0x234   : > { %v3579_v40 = vadd.f32 %v3578_v39, %v3550_v20 }
 0x235   : > { %v3636_v43 = vpop.f32.mrf.mxu0  ;;  %v3635_v8 = vadd.f32 %v3634_v18, %v3606_v15 }
 0x236   : > { %v3586_v44 = vpop.f32.mrf.mxu2 }
 0x239   : > { %v3552_v52 = vpop.f32.mrf.mxu1 }
 0x23a   : > { %v3607_v63 = vpop.f32.mrf.mxu3  ;;  %v3553_v33 = vadd.f32 %v3552_v52, %v6514_v7 }
 0x23b   : > { %v3608_v11 = vadd.f32 %v3607_v63, %v3579_v40 }
 0x23c   : > { %v3582_v27 = vadd.f32 %v3581_v26, %v3553_v33 }
 0x23d   : > { %v3639_v9 = vpop.f32.mrf.mxu0  ;;  %v3637_v35 = vadd.f32 %v3636_v43, %v3608_v11 }
 0x23e   : > { %v6532_v30 = vpop.f32.mrf.mxu2 }
 0x241   : > { %v3554_v45 = vpop.f32.mrf.mxu1 }
 0x242   : > { %v3610_v53 = vpop.f32.mrf.mxu3  ;;  %v3555_v3 = vadd.f32 %v3554_v45, %v6516_v25 }
 0x243   : > { %v3611_v56 = vadd.f32 %v3610_v53, %v3582_v27 }
 0x244   : > { %v3584_v21 = vadd.f32 %v3583_v10, %v3555_v3 }
 0x245   : > { %v3641_v49 = vpop.f32.mrf.mxu0  ;;  %v3640_v37 = vadd.f32 %v3639_v9, %v3611_v56 }
 0x246   : > { %v6534_v42 = vpop.f32.mrf.mxu2 }
 0x249   : > { %v3557_v55 = vpop.f32.mrf.mxu1 }
 0x24a   : > { %v3612_v6 = vpop.f32.mrf.mxu3  ;;  %v3558_v61 = vadd.f32 %v3557_v55, %v6519_v60 }
 0x24b   : > { %v3613_v57 = vadd.f32 %v3612_v6, %v3584_v21 }
 0x24c   : > { %v3587_v13 = vadd.f32 %v3586_v44, %v3558_v61 }
 0x24d   : > { %v3644_v23 = vpop.f32.mrf.mxu0  ;;  %v3642_v24 = vadd.f32 %v3641_v49, %v3613_v57 }
 0x24e   : > { %v6536_v48 = vpop.f32.mrf.mxu2 }
 0x251   : > { %v3559_v34 = vpop.f32.mrf.mxu1 }
 0x252   : > { %v3615_v47 = vpop.f32.mrf.mxu3  ;;  %v3560_v20 = vadd.f32 %v3559_v34, %v6522_v54 }
 0x253   : > { %v3616_v18 = vadd.f32 %v3615_v47, %v3587_v13 }
 0x254   : > { %v3589_v43 = vadd.f32 %v6532_v30, %v3560_v20 }
 0x255   : > { %v6538_v22 = vpop.f32.mrf.mxu0  ;;  %v3645_v63 = vadd.f32 %v3644_v23, %v3616_v18 }
 0x256   : > { %v3772_v36 = vpop.f32.mrf.mxu2 }
 0x257   : > { %v3773_v39 = vadd.f32 %v6553_v58, %v3772_v36 }
 0x259   : > { %v6540_v41 = vpop.f32.mrf.mxu1 }
 0x25a   : > { %v3617_v14 = vpop.f32.mrf.mxu3  ;;  %v3563_v34 = vadd.f32 %v6540_v41, %v6526_v2 }
 0x25b   : > { %v3618_v6 = vadd.f32 %v3617_v14, %v3589_v43 }
 0x25c   : > { %v3592_v30 = vadd.f32 %v6534_v42, %v3563_v34 }
 0x25d   : > { %v6542_v1 = vpop.f32.mrf.mxu0 }
 0x25e   : > { %v3774_v19 = vpop.f32.mrf.mxu2 }
 0x25f   : > { %v3775_v40 = vadd.f32 %v6553_v58, %v3774_v19  ;;  %v3647_v19 = vadd.f32 %v6538_v22, %v3618_v6 }
 0x261   : > { %v6545_v16 = vpop.f32.mrf.mxu1 }
 0x262   : > { %v3620_v50 = vpop.f32.mrf.mxu3  ;;  %v3565_v2 = vadd.f32 %v6545_v16, %v6529_v46 }
 0x263   : > { %v3621_v3 = vadd.f32 %v3620_v50, %v3592_v30 }
 0x264   : > { %v3594_v14 = vadd.f32 %v6536_v48, %v3565_v2 }
 0x265   : > { %v6547_v12 = vpop.f32.mrf.mxu0 }
 0x266   : > { %v3777_v4 = vpop.f32.mrf.mxu2 }
 0x267   : > { %v3778_v7 = vadd.f32 %v6553_v58, %v3777_v4 }
 0x269   : > { %v3668_v17 = vpop.f32.mrf.mxu1 }
 0x26a   : > { %v3669_v59 = vadd.f32 %v3668_v17, %v3640_v37  ;;  %v3622_v54 = vpop.f32.mrf.mxu3  ;;  %v3650_v37 = vadd.f32 %v6542_v1, %v3621_v3 }
 0x26b   : > { %v3623_v42 = vadd.f32 %v3622_v54, %v3594_v14 }
 0x26c   : > { %v3794_v25 = vadd.f32 %v3778_v7, %v3669_v59 }
 0x26d   : > { %v3663_v32 = vpop.f32.mrf.mxu0  ;;  %v3652_v46 = vadd.f32 %v6547_v12, %v3623_v42 }
 0x26e   : > { %v3664_v38 = vadd.f32 %v3663_v32, %v3635_v8  ;;  %v3802_v29 = vmax.f32 %v3794_v25, 0.0  ;;  %v3779_v51 = vpop.f32.mrf.mxu2 }
 0x26f   : > { %v3780_v26 = vadd.f32 %v6553_v58, %v3779_v51 }
 0x270   : > { %v3792_v62 = vadd.f32 %v3773_v39, %v3664_v38  ;;  %3810 = vst [vmem:[%s6561_s15 + $0x10] sm:$0xff] %v3802_v29 }
 0x271   : > { %v3670_v28 = vpop.f32.mrf.mxu1 }
 0x272   : > { %v3800_v0 = vmax.f32 %v3792_v62, 0.0  ;;  %v3671_v60 = vadd.f32 %v3670_v28, %v3642_v24  ;;  %v3787_v15 = vpop.f32.mrf.mxu3 }
 0x273   : > { %v3788_v22 = vadd.f32 %v6553_v58, %v3787_v15 }
 0x274   : > { %3808 = vst [vmem:[%s6561_s15] sm:$0xff] %v3800_v0  ;;  %v3795_v10 = vadd.f32 %v3780_v26, %v3671_v60 }
 0x275   : > { %v3665_v5 = vpop.f32.mrf.mxu0 }
 0x276   : > { %v3666_v31 = vadd.f32 %v3665_v5, %v3637_v35  ;;  %v3803_v52 = vmax.f32 %v3795_v10, 0.0  ;;  %v3782_v9 = vpop.f32.mrf.mxu2 }
 0x277   : > { %v3783_v45 = vadd.f32 %v6553_v58, %v3782_v9 }
 0x278   : > { %v3793_v44 = vadd.f32 %v3775_v40, %v3666_v31  ;;  %3811 = vst [vmem:[%s6561_s15 + $0x18] sm:$0xff] %v3803_v52 }
 0x279   : > { %v3673_v49 = vpop.f32.mrf.mxu1 }
 0x27a   : > { %v3801_v55 = vmax.f32 %v3793_v44, 0.0  ;;  %v3674_v53 = vadd.f32 %v3673_v49, %v3645_v63  ;;  %v3789_v8 = vpop.f32.mrf.mxu3 }
 0x27b   : > { %v3790_v16 = vadd.f32 %v6553_v58, %v3789_v8 }
 0x27c   : > { %3809 = vst [vmem:[%s6561_s15 + $0x8] sm:$0xff] %v3801_v55  ;;  %v3796_v36 = vadd.f32 %v3783_v45, %v3674_v53 }
 0x27e   : > { %v3804_v33 = vmax.f32 %v3796_v36, 0.0  ;;  %v3784_v23 = vpop.f32.mrf.mxu2 }
 0x27f   : > { %v3785_v47 = vadd.f32 %v6553_v58, %v3784_v23 }
 0x280   : > { %3812 = vst [vmem:[%s6561_s15 + $0x20] sm:$0xff] %v3804_v33 }
 0x281   : > { %v3675_v27 = vpop.f32.mrf.mxu1 }
 0x282   : > { %v3676_v56 = vadd.f32 %v3675_v27, %v3647_v19 }
 0x284   : > { %v3797_v4 = vadd.f32 %v3785_v47, %v3676_v56 }
 0x286   : > { %v3805_v41 = vmax.f32 %v3797_v4, 0.0 }
 0x288   : > { %3813 = vst [vmem:[%s6561_s15 + $0x28] sm:$0xff] %v3805_v41 }
 0x289   : > { %v3678_v7 = vpop.f32.mrf.mxu1 }
 0x28a   : > { %v3679_v17 = vadd.f32 %v3678_v7, %v3650_v37 }
 0x28c   : > { %v3798_v21 = vadd.f32 %v3788_v22, %v3679_v17 }
 0x28e   : > { %v3806_v59 = vmax.f32 %v3798_v21, 0.0 }
 0x290   : > { %3814 = vst [vmem:[%s6561_s15 + $0x30] sm:$0xff] %v3806_v59 }
 0x291   : > { %v3680_v1 = vpop.f32.mrf.mxu1 }
 0x292   : > { %v3681_v48 = vadd.f32 %v3680_v1, %v3652_v46 }
 0x294   : > { %v3799_v57 = vadd.f32 %v3790_v16, %v3681_v48 }
 0x296   : > { %v3807_v25 = vmax.f32 %v3799_v57, 0.0 }
 0x298   : > { %3815 = vst [vmem:[%s6561_s15 + $0x38] sm:$0xff] %v3807_v25 }
 0x299   : > { %5272 = shalt.err (!%p5269_p3)
}
 0x29a   : > { %s5310_s13 = smov 128   ;;  %s5311_s15 = smov 8  }
 0x29b   : > { %5200 = dma.vmem_to_hbm [thread:$0]  (%p5390_p5), %s3830_s21, 1024, %s3832_s22, %s3817_s28, %s5310_s13, %s5310_s13, %s5311_s15  }
 0x29c PF: > { %p5206_p4 = scmp.ge.s32.totalorder %s5307_s27, 2  ;;  %s3846_s18 = sand.u32 1, %s5295_s24  }
 0x29d   : > { %s3847_s19 = scalar_lea.sflag [#allocation5], %s3846_s18 }
 0x29e   : > { %p5203_p7 = pnand %p5206_p4, %p5394_p6 }
 0x2a0   : > { %p5204_p8 = pneg %p5203_p7 }
 0x2a2   : > { %5290 = dma.done.wait (%p5204_p8), %s3847_s19, 1024  }
 0x2a3   : > { %5292 = vsyncadd (%p5204_p8), %s3847_s19, 4294966272  ;;  %p17_p9 = scmp.ge.s32.totalorder %s5377_s30, 4   ;;  %s6640_s24 = smov %s5299_s25 }
 0x2a4   : > { %s6641_s25 = smov %s5303_s26  ;;  %s6642_s26 = smov %s5388_s10 }
 0x2a5   : > { %s6643_s27 = smov %s5377_s30  ;;  %19 = sbr.rel (!%p17_p9) target bundleno = 3 (0x3), region = 157 }
 0x2aa   :  { %3853 = vsyncpa [#allocation5], 1 }
 0x2ab   :  { %3855 = vsyncpa [#allocation5 + $0x1], 1 }

</bundles_post_ra>
